<compile_context>
chip_gen: v7x
topology: tpu7x:2x2x1
jax: 0.10.0
libtpu: 0.0.40
codegen_flags: <defaults>
</compile_context>

<pallas_src>
import functools
import math

import jax
import jax.numpy as jnp
from jax.experimental import pallas as pl
from jax.experimental.pallas import tpu as pltpu

# ----------------------------- config (small, lane-friendly) -----------------
B = 2            # batch
C_IN = 1         # audio spectrogram has 1 channel
H = W = 16       # spectrogram spatial size (real model: 128 x 204)
K_PATCH = 6      # conv kernel (real: 16)
STRIDE = 5       # conv stride  (real: 10) -- overlapping, like ImageBind audio
EMBED = 128      # trunk embed dim (real: 768) -- lane-dense (128)
HEADS = 4        # attention heads (real: 12)
HD = EMBED // HEADS
DEPTH = 2        # transformer blocks (real: 12)
MLP_HID = 4 * EMBED
OUT_EMBED = 128  # head output dim (real: 1024)
FC_HID = 128     # fc hidden (real: 512)
CLASSES = 10     # (real: 264)
LOGIT_SCALE = 20.0
_INV_SQRT2 = 0.7071067811865476

_OH = (H - K_PATCH) // STRIDE + 1
N_PATCH = _OH * _OH
NTOK = N_PATCH + 1                      # real tokens incl. cls (= 10 here)
NTOK_PAD = ((NTOK + 15) // 16) * 16     # pad tokens to bf16 sublane multiple (16)
CKK = C_IN * K_PATCH * K_PATCH


# ------------------------------ shared helpers --------------------------------
def _ln(x, g, b, eps):
    """f32 LayerNorm over the last dim (stats kept in f32)."""
    mu = jnp.mean(x, axis=-1, keepdims=True)
    cen = x - mu
    var = jnp.mean(cen * cen, axis=-1, keepdims=True)
    return cen * jax.lax.rsqrt(var + eps) * g + b


def _gelu(x):
    # exact erf-based GELU, matching nn.GELU() default
    return 0.5 * x * (1.0 + jax.lax.erf(x * _INV_SQRT2))


# ------------------------------ Pallas kernels --------------------------------
def _patch_embed_kernel(pat_ref, wp_ref, g_ref, b_ref, poscls_ref, o_ref,
                        *, eps, ntok):
    """Conv patch-embed (as matmul) + LayerNorm + cls prepend + pos add, per batch.

    pat_ref rows: row 0 = zero pad row (cls slot); rows 1..ntok-1 = im2col
    patches; rows ntok.. = token padding (zero).  poscls_ref row 0 =
    cls_token + pos[0], rows 1..ntok-1 = pos[1..], pad rows = 0.
    """
    pat = pat_ref[...]                                            # (Npad, CKK) bf16
    tok = jnp.dot(pat, wp_ref[...], preferred_element_type=jnp.float32)
    tok = _ln(tok, g_ref[...], b_ref[...], eps)                   # (Npad, D) f32
    row = jax.lax.broadcasted_iota(jnp.int32, tok.shape, 0)
    # zero the cls-slot row (raw cls arrives via poscls, un-normalized, as in
    # the reference) and the token-padding rows.
    valid = (row > 0) & (row < ntok)
    tok = jnp.where(valid, tok, 0.0) + poscls_ref[...]
    o_ref[...] = tok.astype(o_ref.dtype)


def _trunk_layer_kernel(x_ref,
                        n1g_ref, n1b_ref, wqkv_ref, bqkv_ref, bk_ref, bv_ref,
                        wo_ref, bo_ref, n2g_ref, n2b_ref, w1_ref, b1_ref,
                        w2_ref, b2_ref,
                        o_ref,
                        resid, qkv_s, ctx_s,
                        *, heads, hd, ntok, eps):
    """One fused transformer layer (pre-LN MHA with add_bias_kv + pre-LN MLP).

    grid = (B, DEPTH); weights are indexed by the layer axis so layer l+1's
    weights are prefetched while layer l computes.  The f32 residual stream is
    carried in `resid` (VMEM scratch) across the layer axis; only the cls row
    is written back to HBM at the last layer.
    """
    l = pl.program_id(1)
    nlayers = pl.num_programs(1)

    @pl.when(l == 0)
    def _():
        resid[...] = x_ref[...].astype(jnp.float32)

    x = resid[...]                                                # (N, D) f32
    n, d = x.shape
    scale = 1.0 / math.sqrt(hd)

    # ---------------- attention sub-block (drop_path = identity, eval) ------
    h = _ln(x, n1g_ref[...], n1b_ref[...], eps)
    # fused QKV projection: one MXU pass, lane-dense (3D) output, stored once
    # to a bf16 VMEM scratch so per-head slices are Ref views (bounded ranges).
    qkv_s[...] = (jnp.dot(h.astype(jnp.bfloat16), wqkv_ref[...],
                          preferred_element_type=jnp.float32)
                  + bqkv_ref[...]).astype(jnp.bfloat16)           # (N, 3D)

    kidx = jax.lax.broadcasted_iota(jnp.int32, (n, n), 1)
    key_mask = kidx < ntok                                        # mask padded keys

    # Static per-head loop with Ref-based slices.
    # TODO(synk): at real sizes (heads=12, hd=64) switch to
    # lax.fori_loop(..., unroll=True) with lane-aligned head slabs.
    for hix in range(heads):
        lo = hix * hd
        q = qkv_s[:, lo:lo + hd]                                  # (N, hd) bf16
        k = qkv_s[:, d + lo:d + lo + hd]
        v = qkv_s[:, 2 * d + lo:2 * d + lo + hd]
        bk = bk_ref[:, lo:lo + hd].astype(jnp.float32)            # (1, hd)
        bv = bv_ref[:, lo:lo + hd].astype(jnp.float32)
        # scores against the real keys (MXU, bf16 in / f32 acc), scale after
        s1 = jax.lax.dot_general(q, k, (((1,), (1,)), ((), ())),
                                 preferred_element_type=jnp.float32) * scale
        s1 = jnp.where(key_mask, s1, -1e30)
        # score against the learned bias-K token, handled analytically
        s2 = jnp.sum(q.astype(jnp.float32) * bk, axis=-1, keepdims=True) * scale
        m = jnp.maximum(jnp.max(s1, axis=-1, keepdims=True), s2)
        p1 = jnp.exp(s1 - m)
        p2 = jnp.exp(s2 - m)
        inv = pl.reciprocal(jnp.sum(p1, axis=-1, keepdims=True) + p2, approx=True)
        ctx = jax.lax.dot_general(p1.astype(jnp.bfloat16), v,
                                  (((1,), (0,)), ((), ())),
                                  preferred_element_type=jnp.float32)
        ctx = (ctx + p2 * bv) * inv
        ctx_s[:, lo:lo + hd] = ctx.astype(jnp.bfloat16)

    # one full-width out-projection (K = D) instead of `heads` K=hd matmuls
    attn = jnp.dot(ctx_s[...], wo_ref[...],
                   preferred_element_type=jnp.float32) + bo_ref[...]
    x = x + attn                                                  # residual (f32)

    # ---------------- MLP sub-block -----------------------------------------
    h2 = _ln(x, n2g_ref[...], n2b_ref[...], eps)
    h1 = jnp.dot(h2.astype(jnp.bfloat16), w1_ref[...],
                 preferred_element_type=jnp.float32) + b1_ref[...]
    h1 = _gelu(h1)
    x = x + jnp.dot(h1.astype(jnp.bfloat16), w2_ref[...],
                    preferred_element_type=jnp.float32) + b2_ref[...]

    resid[...] = x

    @pl.when(l == nlayers - 1)
    def _():
        # head only consumes SelectElement(0): write the cls row only.
        o_ref[...] = x[0:1, :].astype(o_ref.dtype)


def _head_kernel(x_ref, hg_ref, hb_ref, hw_ref,
                 w1_ref, b1_ref, fg_ref, fb_ref, w2_ref, b2_ref, o_ref,
                 *, logit_scale):
    """Trunk final LN + head + postprocessor + fc, on the B cls rows only."""
    x = x_ref[...].astype(jnp.float32)                            # (B, D)
    h = _ln(x, hg_ref[...], hb_ref[...], 1e-6)                    # trunk final LN
    e = jnp.dot(h.astype(jnp.bfloat16), hw_ref[...],
                preferred_element_type=jnp.float32)               # head Linear (no bias)
    # postprocessor: F.normalize(dim=-1, eps=1e-12) * logit_scale
    nrm = jnp.sqrt(jnp.sum(e * e, axis=-1, keepdims=True))
    e = e / jnp.maximum(nrm, 1e-12) * logit_scale
    # fc: Linear -> LayerNorm(1e-5) -> GELU -> Dropout(identity) -> Linear
    z = jnp.dot(e.astype(jnp.bfloat16), w1_ref[...],
                preferred_element_type=jnp.float32) + b1_ref[...]
    z = _ln(z, fg_ref[...], fb_ref[...], 1e-5)
    z = _gelu(z)
    # TODO(synk): Dropout(0.1) / drop_path are identity in eval mode; no kernel emitted.
    o_ref[...] = jnp.dot(z.astype(jnp.bfloat16), w2_ref[...],
                         preferred_element_type=jnp.float32) + b2_ref[...]


# ------------------------------ kernel wrappers -------------------------------
def _bcast_spec(shape):
    nd = len(shape)
    return pl.BlockSpec(shape, lambda *_: (0,) * nd)


def patch_embed(patches, p, pos_cls):
    b = patches.shape[0]
    return pl.pallas_call(
        functools.partial(_patch_embed_kernel, eps=1e-5, ntok=NTOK),
        out_shape=jax.ShapeDtypeStruct((b, NTOK_PAD, EMBED), jnp.bfloat16),
        grid=(b,),
        in_specs=[
            pl.BlockSpec((None, NTOK_PAD, CKK), lambda i: (i, 0, 0)),
            _bcast_spec((CKK, EMBED)),
            _bcast_spec((1, EMBED)), _bcast_spec((1, EMBED)),
            _bcast_spec((NTOK_PAD, EMBED)),
        ],
        out_specs=pl.BlockSpec((None, NTOK_PAD, EMBED), lambda i: (i, 0, 0)),
        compiler_params=pltpu.CompilerParams(
            dimension_semantics=("parallel",),
            vmem_limit_bytes=32 * 1024 * 1024),
    )(patches, p["patch_w"], p["patch_ln_g"], p["patch_ln_b"], pos_cls)


def trunk(tok, sp):
    """All DEPTH transformer layers in one pallas_call; returns (B, 1, D) cls rows."""
    b, n, d = tok.shape
    depth = sp["wqkv"].shape[0]

    def wspec(shape):
        nd = len(shape)
        return pl.BlockSpec((None,) + shape, lambda bi, li: (li,) + (0,) * nd)

    # advisory cost estimate so XLA overlaps the surrounding im2col/pad/gather
    flops_layer = (2 * n * d * 3 * d + 4 * n * n * d + 2 * n * d * d
                   + 4 * n * d * MLP_HID)
    w_bytes_layer = 2 * (3 * d * d + d * d + 2 * d * MLP_HID)
    cost = pl.CostEstimate(
        flops=b * depth * flops_layer,
        transcendentals=b * depth * (HEADS * n * (n + 1) + n * MLP_HID),
        bytes_accessed=b * depth * w_bytes_layer + b * n * d * 2 + b * d * 2)

    return pl.pallas_call(
        functools.partial(_trunk_layer_kernel, heads=HEADS, hd=HD,
                          ntok=NTOK, eps=1e-6),
        out_shape=jax.ShapeDtypeStruct((b, 1, d), jnp.bfloat16),
        grid=(b, depth),
        in_specs=[
            pl.BlockSpec((None, n, d), lambda bi, li: (bi, 0, 0)),   # tokens
            wspec((1, d)), wspec((1, d)),                            # n1 g/b
            wspec((d, 3 * d)), wspec((1, 3 * d)),                    # wqkv, bqkv
            wspec((1, d)), wspec((1, d)),                            # bias_k, bias_v
            wspec((d, d)), wspec((1, d)),                            # wo, bo
            wspec((1, d)), wspec((1, d)),                            # n2 g/b
            wspec((d, MLP_HID)), wspec((1, MLP_HID)),                # w1, b1
            wspec((MLP_HID, d)), wspec((1, d)),                      # w2, b2
        ],
        out_specs=pl.BlockSpec((None, 1, d), lambda bi, li: (bi, 0, 0)),
        scratch_shapes=[
            pltpu.VMEM((n, d), jnp.float32),        # f32 residual stream carry
            pltpu.VMEM((n, 3 * d), jnp.bfloat16),   # fused qkv
            pltpu.VMEM((n, d), jnp.bfloat16),       # per-head context slab
        ],
        compiler_params=pltpu.CompilerParams(
            dimension_semantics=("parallel", "arbitrary"),
            vmem_limit_bytes=64 * 1024 * 1024),
        cost_estimate=cost,
    )(tok,
      sp["n1_g"], sp["n1_b"], sp["wqkv"], sp["bqkv"], sp["bias_k"], sp["bias_v"],
      sp["wo"], sp["bo"], sp["n2_g"], sp["n2_b"], sp["w1"], sp["b1"],
      sp["w2"], sp["b2"])


def head_fc(cls_x, p):
    b, d = cls_x.shape
    return pl.pallas_call(
        functools.partial(_head_kernel, logit_scale=LOGIT_SCALE),
        out_shape=jax.ShapeDtypeStruct((b, CLASSES), jnp.float32),
        grid=(1,),
        in_specs=[
            _bcast_spec((b, d)),
            _bcast_spec((1, d)), _bcast_spec((1, d)),
            _bcast_spec((d, OUT_EMBED)),
            _bcast_spec((OUT_EMBED, FC_HID)), _bcast_spec((1, FC_HID)),
            _bcast_spec((1, FC_HID)), _bcast_spec((1, FC_HID)),
            _bcast_spec((FC_HID, CLASSES)), _bcast_spec((1, CLASSES)),
        ],
        out_specs=_bcast_spec((b, CLASSES)),
        compiler_params=pltpu.CompilerParams(
            dimension_semantics=("arbitrary",),
            vmem_limit_bytes=32 * 1024 * 1024),
    )(cls_x, p["head_ln_g"], p["head_ln_b"], p["head_w"],
      p["fc_w1"], p["fc_b1"], p["fc_ln_g"], p["fc_ln_b"], p["fc_w2"], p["fc_b2"])


# ------------------------------- forward pass ---------------------------------
def imagebind_audio_forward(x, p):
    b = x.shape[0]
    # --- preprocessor: conv patch-embed as im2col (feature order (C, kh, kw)
    #     matches the PyTorch conv weight reshape (D, C*k*k)) ---
    patches = jax.lax.conv_general_dilated_patches(
        x, (K_PATCH, K_PATCH), (STRIDE, STRIDE), "VALID")   # (B, C*k*k, OH, OW)
    patches = patches.reshape(b, CKK, -1).transpose(0, 2, 1)      # (B, P, CKK)
    # zero cls-slot row in front + pad token dim to NTOK_PAD (sublane-friendly)
    patches = jnp.pad(patches, ((0, 0), (1, NTOK_PAD - NTOK), (0, 0)))
    patches = patches.astype(jnp.bfloat16)
    # row 0 = cls + pos[0], rows 1.. = pos[1..], pad rows = 0
    pos_cls = jnp.concatenate(
        [p["cls_token"] + p["pos_embed"][0:1], p["pos_embed"][1:]], axis=0)
    pos_cls = jnp.pad(pos_cls, ((0, NTOK_PAD - NTOK), (0, 0)))
    tok = patch_embed(patches, p, pos_cls)                        # (B, Npad, D) bf16
    # --- trunk (audio: pre_transformer_ln=False), all layers in one call ---
    cls_tok = trunk(tok, p["stacked"])                            # (B, 1, D)
    # --- head / postprocessor / fc, cls rows only ---
    cls_x = cls_tok[:, 0, :]                                      # SelectElement(0)
    return head_fc(cls_x, p)


# ------------------------------ parameter init --------------------------------
def init_params(key):
    def nrm(k, shape, std=0.02):
        return std * jax.random.normal(k, shape, dtype=jnp.float32)

    keys = iter(jax.random.split(key, 64))
    bf = jnp.bfloat16
    p = {
        # conv weight pre-reshaped/transposed: (C*k*k, D) == conv_w.reshape(D,-1).T
        "patch_w": nrm(next(keys), (CKK, EMBED)).astype(bf),
        "patch_ln_g": jnp.ones((1, EMBED), jnp.float32),
        "patch_ln_b": jnp.zeros((1, EMBED), jnp.float32),
        "cls_token": nrm(next(keys), (1, EMBED)),
        "pos_embed": nrm(next(keys), (NTOK, EMBED)),
        "head_ln_g": jnp.ones((1, EMBED), jnp.float32),
        "head_ln_b": jnp.zeros((1, EMBED), jnp.float32),
        "head_w": nrm(next(keys), (EMBED, OUT_EMBED)).astype(bf),
        "fc_w1": nrm(next(keys), (OUT_EMBED, FC_HID)).astype(bf),
        "fc_b1": jnp.zeros((1, FC_HID), jnp.float32),
        "fc_ln_g": jnp.ones((1, FC_HID), jnp.float32),
        "fc_ln_b": jnp.zeros((1, FC_HID), jnp.float32),
        "fc_w2": nrm(next(keys), (FC_HID, CLASSES)).astype(bf),
        "fc_b2": jnp.zeros((1, CLASSES), jnp.float32),
        # per-layer trunk weights stacked along a leading DEPTH axis so the
        # single trunk pallas_call can index them with the layer grid axis.
        "stacked": {
            "n1_g": jnp.ones((DEPTH, 1, EMBED), jnp.float32),
            "n1_b": jnp.zeros((DEPTH, 1, EMBED), jnp.float32),
            "wqkv": nrm(next(keys), (DEPTH, EMBED, 3 * EMBED)).astype(bf),  # Q|K|V
            "bqkv": jnp.zeros((DEPTH, 1, 3 * EMBED), jnp.float32),
            "bias_k": nrm(next(keys), (DEPTH, 1, EMBED)),                   # add_bias_kv
            "bias_v": nrm(next(keys), (DEPTH, 1, EMBED)),
            "wo": nrm(next(keys), (DEPTH, EMBED, EMBED)).astype(bf),
            "bo": jnp.zeros((DEPTH, 1, EMBED), jnp.float32),
            "n2_g": jnp.ones((DEPTH, 1, EMBED), jnp.float32),
            "n2_b": jnp.zeros((DEPTH, 1, EMBED), jnp.float32),
            "w1": nrm(next(keys), (DEPTH, EMBED, MLP_HID)).astype(bf),
            "b1": jnp.zeros((DEPTH, 1, MLP_HID), jnp.float32),
            "w2": nrm(next(keys), (DEPTH, MLP_HID, EMBED)).astype(bf),
            "b2": jnp.zeros((DEPTH, 1, EMBED), jnp.float32),
        },
    }
    return p


# ----------------------------------- main --------------------------------------
if __name__ == "__main__":
    root = jax.random.PRNGKey(0)
    k_x, k_p = jax.random.split(root)
    x = jax.random.normal(k_x, (B, C_IN, H, W), dtype=jnp.float32)  # NCHW input
    params = init_params(k_p)

    fwd = jax.jit(imagebind_audio_forward)
    out = fwd(x, params)
    out = jax.block_until_ready(out)

    assert out.shape == (B, CLASSES), out.shape
    assert bool(jnp.all(jnp.isfinite(out)))
    print("KERNEL_OK")
</pallas_src>

<mosaic_0001>
module attributes {stable_mosaic.version = 11 : i64} {
  func.func @_patch_embed_kernel(%arg0: i32, %arg1: memref<1x16x36xbf16, #tpu.memory_space<vmem>>, %arg2: memref<36x128xbf16, #tpu.memory_space<vmem>>, %arg3: memref<1x128xf32, #tpu.memory_space<vmem>>, %arg4: memref<1x128xf32, #tpu.memory_space<vmem>>, %arg5: memref<16x128xf32, #tpu.memory_space<vmem>>, %arg6: memref<1x16x128xbf16, #tpu.memory_space<vmem>>) attributes {dimension_semantics = [#tpu.dimension_semantics<parallel>], iteration_bounds = array<i64: 2>, scalar_prefetch = 0 : i64, scratch_operands = 0 : i64, tpu.core_type = #tpu.core_type<tc>, window_params = [{transform_indices = @transform_0, window_bounds = array<i64: 1, 16, 36>}, {pipeline_mode = #tpu.pipeline_mode<synchronous>, transform_indices = @transform_1, window_bounds = array<i64: 36, 128>}, {pipeline_mode = #tpu.pipeline_mode<synchronous>, transform_indices = @transform_2, window_bounds = array<i64: 1, 128>}, {pipeline_mode = #tpu.pipeline_mode<synchronous>, transform_indices = @transform_3, window_bounds = array<i64: 1, 128>}, {pipeline_mode = #tpu.pipeline_mode<synchronous>, transform_indices = @transform_4, window_bounds = array<i64: 16, 128>}, {transform_indices = @transform_5, window_bounds = array<i64: 1, 16, 128>}]} {
    %c0 = arith.constant 0 : index
    %c0_0 = arith.constant 0 : index
    %c0_1 = arith.constant 0 : index
    %0 = vector.load %arg1[%c0, %c0_0, %c0_1] : memref<1x16x36xbf16, #tpu.memory_space<vmem>>, vector<1x16x36xbf16>
    %1 = vector.shape_cast %0 : vector<1x16x36xbf16> to vector<16x36xbf16>
    %c0_2 = arith.constant 0 : index
    %c0_3 = arith.constant 0 : index
    %2 = vector.load %arg2[%c0_2, %c0_3] : memref<36x128xbf16, #tpu.memory_space<vmem>>, vector<36x128xbf16>
    %cst = arith.constant dense<0.000000e+00> : vector<16x128xf32>
    %3 = tpu.matmul %1, %2, %cst {dimension_numbers = #tpu.dot_dimension_numbers<[1], [0], [0], [1], [0, 0, 1, 1], [], []>} : vector<16x36xbf16>, vector<36x128xbf16>, vector<16x128xf32> -> vector<16x128xf32>
    %c0_4 = arith.constant 0 : index
    %c0_5 = arith.constant 0 : index
    %4 = vector.load %arg3[%c0_4, %c0_5] : memref<1x128xf32, #tpu.memory_space<vmem>>, vector<1x128xf32>
    %c0_6 = arith.constant 0 : index
    %c0_7 = arith.constant 0 : index
    %5 = vector.load %arg4[%c0_6, %c0_7] : memref<1x128xf32, #tpu.memory_space<vmem>>, vector<1x128xf32>
    %cst_8 = arith.constant dense<0.000000e+00> : vector<16xf32>
    %6 = vector.multi_reduction <add>, %3, %cst_8 [1] : vector<16x128xf32> to vector<16xf32>
    %7 = vector.shape_cast %6 : vector<16xf32> to vector<16x1xf32>
    %cst_9 = arith.constant 1.280000e+02 : f32
    %8 = vector.broadcast %cst_9 : f32 to vector<16x1xf32>
    %9 = arith.divf %7, %8 : vector<16x1xf32>
    %10 = vector.broadcast %9 : vector<16x1xf32> to vector<16x128xf32>
    %11 = arith.subf %3, %10 : vector<16x128xf32>
    %12 = arith.mulf %11, %11 : vector<16x128xf32>
    %cst_10 = arith.constant dense<0.000000e+00> : vector<16xf32>
    %13 = vector.multi_reduction <add>, %12, %cst_10 [1] : vector<16x128xf32> to vector<16xf32>
    %14 = vector.shape_cast %13 : vector<16xf32> to vector<16x1xf32>
    %cst_11 = arith.constant 1.280000e+02 : f32
    %15 = vector.broadcast %cst_11 : f32 to vector<16x1xf32>
    %16 = arith.divf %14, %15 : vector<16x1xf32>
    %cst_12 = arith.constant 9.99999974E-6 : f32
    %17 = vector.broadcast %cst_12 : f32 to vector<16x1xf32>
    %18 = arith.addf %16, %17 : vector<16x1xf32>
    %19 = math.rsqrt %18 : vector<16x1xf32>
    %20 = vector.broadcast %19 : vector<16x1xf32> to vector<16x128xf32>
    %21 = arith.mulf %11, %20 : vector<16x128xf32>
    %22 = vector.broadcast %4 : vector<1x128xf32> to vector<16x128xf32>
    %23 = arith.mulf %21, %22 : vector<16x128xf32>
    %24 = vector.broadcast %5 : vector<1x128xf32> to vector<16x128xf32>
    %25 = arith.addf %23, %24 : vector<16x128xf32>
    %26 = tpu.iota {dimensions = array<i32: 0>} : vector<16x128xi32>
    %c0_i32 = arith.constant 0 : i32
    %27 = vector.broadcast %c0_i32 : i32 to vector<16x128xi32>
    %28 = arith.cmpi sgt, %26, %27 : vector<16x128xi32>
    %c10_i32 = arith.constant 10 : i32
    %29 = vector.broadcast %c10_i32 : i32 to vector<16x128xi32>
    %30 = arith.cmpi slt, %26, %29 : vector<16x128xi32>
    %31 = arith.andi %28, %30 : vector<16x128xi1>
    %cst_13 = arith.constant 0.000000e+00 : f32
    %32 = vector.broadcast %cst_13 : f32 to vector<16x128xf32>
    %33 = arith.select %31, %25, %32 : vector<16x128xi1>, vector<16x128xf32>
    %c0_14 = arith.constant 0 : index
    %c0_15 = arith.constant 0 : index
    %34 = vector.load %arg5[%c0_14, %c0_15] : memref<16x128xf32, #tpu.memory_space<vmem>>, vector<16x128xf32>
    %35 = arith.addf %33, %34 : vector<16x128xf32>
    %36 = arith.truncf %35 : vector<16x128xf32> to vector<16x128xbf16>
    %c0_16 = arith.constant 0 : index
    %c0_17 = arith.constant 0 : index
    %c0_18 = arith.constant 0 : index
    %37 = vector.load %arg6[%c0_16, %c0_17, %c0_18] : memref<1x16x128xbf16, #tpu.memory_space<vmem>>, vector<1x16x128xbf16>
    %38 = vector.shape_cast %37 : vector<1x16x128xbf16> to vector<16x128xbf16>
    %39 = vector.shape_cast %36 : vector<16x128xbf16> to vector<1x16x128xbf16>
    tpu.vector_store %arg6[%c0_16, %c0_17, %c0_18], %39 {strides = array<i32>} : memref<1x16x128xbf16, #tpu.memory_space<vmem>>, vector<1x16x128xbf16>,
    return
  }
  func.func @transform_0(%arg0: i32) -> (i32, i32, i32) {
    %c0_i32 = arith.constant 0 : i32
    %c0_i32_0 = arith.constant 0 : i32
    %c0_i32_1 = arith.constant 0 : i32
    return %arg0, %c0_i32, %c0_i32_0 : i32, i32, i32
  }
  func.func @transform_1(%arg0: i32) -> (i32, i32) {
    %c0_i32 = arith.constant 0 : i32
    %c0_i32_0 = arith.constant 0 : i32
    %c0_i32_1 = arith.constant 0 : i32
    return %c0_i32, %c0_i32_0 : i32, i32
  }
  func.func @transform_2(%arg0: i32) -> (i32, i32) {
    %c0_i32 = arith.constant 0 : i32
    %c0_i32_0 = arith.constant 0 : i32
    %c0_i32_1 = arith.constant 0 : i32
    return %c0_i32, %c0_i32_0 : i32, i32
  }
  func.func @transform_3(%arg0: i32) -> (i32, i32) {
    %c0_i32 = arith.constant 0 : i32
    %c0_i32_0 = arith.constant 0 : i32
    %c0_i32_1 = arith.constant 0 : i32
    return %c0_i32, %c0_i32_0 : i32, i32
  }
  func.func @transform_4(%arg0: i32) -> (i32, i32) {
    %c0_i32 = arith.constant 0 : i32
    %c0_i32_0 = arith.constant 0 : i32
    %c0_i32_1 = arith.constant 0 : i32
    return %c0_i32, %c0_i32_0 : i32, i32
  }
  func.func @transform_5(%arg0: i32) -> (i32, i32, i32) {
    %c0_i32 = arith.constant 0 : i32
    %c0_i32_0 = arith.constant 0 : i32
    %c0_i32_1 = arith.constant 0 : i32
    return %arg0, %c0_i32, %c0_i32_0 : i32, i32, i32
  }
}

module attributes {stable_mosaic.version = 11 : i64} {
  func.func @_trunk_layer_kernel(%arg0: i32, %arg1: i32, %arg2: memref<1x16x128xbf16, #tpu.memory_space<vmem>>, %arg3: memref<1x1x128xf32, #tpu.memory_space<vmem>>, %arg4: memref<1x1x128xf32, #tpu.memory_space<vmem>>, %arg5: memref<1x128x384xbf16, #tpu.memory_space<vmem>>, %arg6: memref<1x1x384xf32, #tpu.memory_space<vmem>>, %arg7: memref<1x1x128xf32, #tpu.memory_space<vmem>>, %arg8: memref<1x1x128xf32, #tpu.memory_space<vmem>>, %arg9: memref<1x128x128xbf16, #tpu.memory_space<vmem>>, %arg10: memref<1x1x128xf32, #tpu.memory_space<vmem>>, %arg11: memref<1x1x128xf32, #tpu.memory_space<vmem>>, %arg12: memref<1x1x128xf32, #tpu.memory_space<vmem>>, %arg13: memref<1x128x512xbf16, #tpu.memory_space<vmem>>, %arg14: memref<1x1x512xf32, #tpu.memory_space<vmem>>, %arg15: memref<1x512x128xbf16, #tpu.memory_space<vmem>>, %arg16: memref<1x1x128xf32, #tpu.memory_space<vmem>>, %arg17: memref<1x1x128xbf16, #tpu.memory_space<vmem>>, %arg18: memref<16x128xf32, #tpu.memory_space<vmem>>, %arg19: memref<16x384xbf16, #tpu.memory_space<vmem>>, %arg20: memref<16x128xbf16, #tpu.memory_space<vmem>>) attributes {dimension_semantics = [#tpu.dimension_semantics<parallel>, #tpu.dimension_semantics<arbitrary>], iteration_bounds = array<i64: 2, 2>, scalar_prefetch = 0 : i64, scratch_operands = 3 : i64, tpu.core_type = #tpu.core_type<tc>, window_params = [{transform_indices = @transform_0, window_bounds = array<i64: 1, 16, 128>}, {transform_indices = @transform_1, window_bounds = array<i64: 1, 1, 128>}, {transform_indices = @transform_2, window_bounds = array<i64: 1, 1, 128>}, {transform_indices = @transform_3, window_bounds = array<i64: 1, 128, 384>}, {transform_indices = @transform_4, window_bounds = array<i64: 1, 1, 384>}, {transform_indices = @transform_5, window_bounds = array<i64: 1, 1, 128>}, {transform_indices = @transform_6, window_bounds = array<i64: 1, 1, 128>}, {transform_indices = @transform_7, window_bounds = array<i64: 1, 128, 128>}, {transform_indices = @transform_8, window_bounds = array<i64: 1, 1, 128>}, {transform_indices = @transform_9, window_bounds = array<i64: 1, 1, 128>}, {transform_indices = @transform_10, window_bounds = array<i64: 1, 1, 128>}, {transform_indices = @transform_11, window_bounds = array<i64: 1, 128, 512>}, {transform_indices = @transform_12, window_bounds = array<i64: 1, 1, 512>}, {transform_indices = @transform_13, window_bounds = array<i64: 1, 512, 128>}, {transform_indices = @transform_14, window_bounds = array<i64: 1, 1, 128>}, {transform_indices = @transform_15, window_bounds = array<i64: 1, 1, 128>}]} {
    %c0_i32 = arith.constant 0 : i32
    %0 = arith.cmpi eq, %arg1, %c0_i32 : i32
    %1 = arith.extui %0 : i1 to i32
    %c0_i32_0 = arith.constant 0 : i32
    %2 = arith.cmpi ne, %1, %c0_i32_0 : i32
    scf.if %2 {
      %c0_138 = arith.constant 0 : index
      %c0_139 = arith.constant 0 : index
      %c0_140 = arith.constant 0 : index
      %267 = vector.load %arg2[%c0_138, %c0_139, %c0_140] : memref<1x16x128xbf16, #tpu.memory_space<vmem>>, vector<1x16x128xbf16>
      %268 = vector.shape_cast %267 : vector<1x16x128xbf16> to vector<16x128xbf16>
      %269 = arith.extf %268 : vector<16x128xbf16> to vector<16x128xf32>
      %c0_141 = arith.constant 0 : index
      %c0_142 = arith.constant 0 : index
      %270 = vector.load %arg18[%c0_141, %c0_142] : memref<16x128xf32, #tpu.memory_space<vmem>>, vector<16x128xf32>
      tpu.vector_store %arg18[%c0_141, %c0_142], %269 {strides = array<i32>} : memref<16x128xf32, #tpu.memory_space<vmem>>, vector<16x128xf32>,
    } else {
    }
    %c0 = arith.constant 0 : index
    %c0_1 = arith.constant 0 : index
    %3 = vector.load %arg18[%c0, %c0_1] : memref<16x128xf32, #tpu.memory_space<vmem>>, vector<16x128xf32>
    %c0_2 = arith.constant 0 : index
    %c0_3 = arith.constant 0 : index
    %c0_4 = arith.constant 0 : index
    %4 = vector.load %arg3[%c0_2, %c0_3, %c0_4] : memref<1x1x128xf32, #tpu.memory_space<vmem>>, vector<1x1x128xf32>
    %5 = vector.shape_cast %4 : vector<1x1x128xf32> to vector<1x128xf32>
    %c0_5 = arith.constant 0 : index
    %c0_6 = arith.constant 0 : index
    %c0_7 = arith.constant 0 : index
    %6 = vector.load %arg4[%c0_5, %c0_6, %c0_7] : memref<1x1x128xf32, #tpu.memory_space<vmem>>, vector<1x1x128xf32>
    %7 = vector.shape_cast %6 : vector<1x1x128xf32> to vector<1x128xf32>
    %cst = arith.constant dense<0.000000e+00> : vector<16xf32>
    %8 = vector.multi_reduction <add>, %3, %cst [1] : vector<16x128xf32> to vector<16xf32>
    %9 = vector.shape_cast %8 : vector<16xf32> to vector<16x1xf32>
    %cst_8 = arith.constant 1.280000e+02 : f32
    %10 = vector.broadcast %cst_8 : f32 to vector<16x1xf32>
    %11 = arith.divf %9, %10 : vector<16x1xf32>
    %12 = vector.broadcast %11 : vector<16x1xf32> to vector<16x128xf32>
    %13 = arith.subf %3, %12 : vector<16x128xf32>
    %14 = arith.mulf %13, %13 : vector<16x128xf32>
    %cst_9 = arith.constant dense<0.000000e+00> : vector<16xf32>
    %15 = vector.multi_reduction <add>, %14, %cst_9 [1] : vector<16x128xf32> to vector<16xf32>
    %16 = vector.shape_cast %15 : vector<16xf32> to vector<16x1xf32>
    %cst_10 = arith.constant 1.280000e+02 : f32
    %17 = vector.broadcast %cst_10 : f32 to vector<16x1xf32>
    %18 = arith.divf %16, %17 : vector<16x1xf32>
    %cst_11 = arith.constant 9.99999997E-7 : f32
    %19 = vector.broadcast %cst_11 : f32 to vector<16x1xf32>
    %20 = arith.addf %18, %19 : vector<16x1xf32>
    %21 = math.rsqrt %20 : vector<16x1xf32>
    %22 = vector.broadcast %21 : vector<16x1xf32> to vector<16x128xf32>
    %23 = arith.mulf %13, %22 : vector<16x128xf32>
    %24 = vector.broadcast %5 : vector<1x128xf32> to vector<16x128xf32>
    %25 = arith.mulf %23, %24 : vector<16x128xf32>
    %26 = vector.broadcast %7 : vector<1x128xf32> to vector<16x128xf32>
    %27 = arith.addf %25, %26 : vector<16x128xf32>
    %28 = arith.truncf %27 : vector<16x128xf32> to vector<16x128xbf16>
    %c0_12 = arith.constant 0 : index
    %c0_13 = arith.constant 0 : index
    %c0_14 = arith.constant 0 : index
    %29 = vector.load %arg5[%c0_12, %c0_13, %c0_14] : memref<1x128x384xbf16, #tpu.memory_space<vmem>>, vector<1x128x384xbf16>
    %30 = vector.shape_cast %29 : vector<1x128x384xbf16> to vector<128x384xbf16>
    %cst_15 = arith.constant dense<0.000000e+00> : vector<16x384xf32>
    %31 = tpu.matmul %28, %30, %cst_15 {dimension_numbers = #tpu.dot_dimension_numbers<[1], [0], [0], [1], [0, 0, 1, 1], [], []>} : vector<16x128xbf16>, vector<128x384xbf16>, vector<16x384xf32> -> vector<16x384xf32>
    %c0_16 = arith.constant 0 : index
    %c0_17 = arith.constant 0 : index
    %c0_18 = arith.constant 0 : index
    %32 = vector.load %arg6[%c0_16, %c0_17, %c0_18] : memref<1x1x384xf32, #tpu.memory_space<vmem>>, vector<1x1x384xf32>
    %33 = vector.shape_cast %32 : vector<1x1x384xf32> to vector<1x384xf32>
    %34 = vector.broadcast %33 : vector<1x384xf32> to vector<16x384xf32>
    %35 = arith.addf %31, %34 : vector<16x384xf32>
    %36 = arith.truncf %35 : vector<16x384xf32> to vector<16x384xbf16>
    %c0_19 = arith.constant 0 : index
    %c0_20 = arith.constant 0 : index
    %37 = vector.load %arg19[%c0_19, %c0_20] : memref<16x384xbf16, #tpu.memory_space<vmem>>, vector<16x384xbf16>
    tpu.vector_store %arg19[%c0_19, %c0_20], %36 {strides = array<i32>} : memref<16x384xbf16, #tpu.memory_space<vmem>>, vector<16x384xbf16>,
    %38 = tpu.iota {dimensions = array<i32: 1>} : vector<16x16xi32>
    %c10_i32 = arith.constant 10 : i32
    %39 = vector.broadcast %c10_i32 : i32 to vector<16x16xi32>
    %40 = arith.cmpi slt, %38, %39 : vector<16x16xi32>
    %c0_21 = arith.constant 0 : index
    %c0_22 = arith.constant 0 : index
    %41 = vector.load %arg19[%c0_21, %c0_22] : memref<16x384xbf16, #tpu.memory_space<vmem>>, vector<16x32xbf16>
    %c0_23 = arith.constant 0 : index
    %c128 = arith.constant 128 : index
    %42 = vector.load %arg19[%c0_23, %c128] : memref<16x384xbf16, #tpu.memory_space<vmem>>, vector<16x32xbf16>
    %c0_24 = arith.constant 0 : index
    %c256 = arith.constant 256 : index
    %43 = vector.load %arg19[%c0_24, %c256] : memref<16x384xbf16, #tpu.memory_space<vmem>>, vector<16x32xbf16>
    %c0_25 = arith.constant 0 : index
    %c0_26 = arith.constant 0 : index
    %c0_27 = arith.constant 0 : index
    %44 = vector.load %arg7[%c0_25, %c0_26, %c0_27] : memref<1x1x128xf32, #tpu.memory_space<vmem>>, vector<1x1x32xf32>
    %45 = vector.shape_cast %44 : vector<1x1x32xf32> to vector<1x32xf32>
    %c0_28 = arith.constant 0 : index
    %c0_29 = arith.constant 0 : index
    %c0_30 = arith.constant 0 : index
    %46 = vector.load %arg8[%c0_28, %c0_29, %c0_30] : memref<1x1x128xf32, #tpu.memory_space<vmem>>, vector<1x1x32xf32>
    %47 = vector.shape_cast %46 : vector<1x1x32xf32> to vector<1x32xf32>
    %cst_31 = arith.constant dense<0.000000e+00> : vector<16x16xf32>
    %48 = tpu.matmul %41, %42, %cst_31 {dimension_numbers = #tpu.dot_dimension_numbers<[1], [1], [0], [0], [0, 0, 1, 0], [], []>} : vector<16x32xbf16>, vector<16x32xbf16>, vector<16x16xf32> -> vector<16x16xf32>
    %cst_32 = arith.constant 0.176776692 : f32
    %49 = vector.broadcast %cst_32 : f32 to vector<16x16xf32>
    %50 = arith.mulf %48, %49 : vector<16x16xf32>
    %cst_33 = arith.constant -1.000000e+30 : f32
    %51 = vector.broadcast %cst_33 : f32 to vector<16x16xf32>
    %52 = arith.select %40, %50, %51 : vector<16x16xi1>, vector<16x16xf32>
    %53 = arith.extf %41 : vector<16x32xbf16> to vector<16x32xf32>
    %54 = vector.broadcast %45 : vector<1x32xf32> to vector<16x32xf32>
    %55 = arith.mulf %53, %54 : vector<16x32xf32>
    %cst_34 = arith.constant dense<0.000000e+00> : vector<16xf32>
    %56 = vector.multi_reduction <add>, %55, %cst_34 [1] : vector<16x32xf32> to vector<16xf32>
    %57 = vector.shape_cast %56 : vector<16xf32> to vector<16x1xf32>
    %cst_35 = arith.constant 0.176776692 : f32
    %58 = vector.broadcast %cst_35 : f32 to vector<16x1xf32>
    %59 = arith.mulf %57, %58 : vector<16x1xf32>
    %cst_36 = arith.constant dense<0xFF800000> : vector<16xf32>
    %60 = vector.multi_reduction <maximumf>, %52, %cst_36 [1] : vector<16x16xf32> to vector<16xf32>
    %61 = vector.shape_cast %60 : vector<16xf32> to vector<16x1xf32>
    %62 = arith.maximumf %61, %59 : vector<16x1xf32>
    %63 = vector.broadcast %62 : vector<16x1xf32> to vector<16x16xf32>
    %64 = arith.subf %52, %63 : vector<16x16xf32>
    %65 = math.exp %64 : vector<16x16xf32>
    %66 = arith.subf %59, %62 : vector<16x1xf32>
    %67 = math.exp %66 : vector<16x1xf32>
    %cst_37 = arith.constant dense<0.000000e+00> : vector<16xf32>
    %68 = vector.multi_reduction <add>, %65, %cst_37 [1] : vector<16x16xf32> to vector<16xf32>
    %69 = vector.shape_cast %68 : vector<16xf32> to vector<16x1xf32>
    %70 = arith.addf %69, %67 : vector<16x1xf32>
    %71 = tpu.reciprocal %70 {approx = true} : vector<16x1xf32> -> vector<16x1xf32>
    %72 = arith.truncf %65 : vector<16x16xf32> to vector<16x16xbf16>
    %cst_38 = arith.constant dense<0.000000e+00> : vector<16x32xf32>
    %73 = tpu.matmul %72, %43, %cst_38 {dimension_numbers = #tpu.dot_dimension_numbers<[1], [0], [0], [1], [0, 0, 1, 1], [], []>} : vector<16x16xbf16>, vector<16x32xbf16>, vector<16x32xf32> -> vector<16x32xf32>
    %74 = vector.broadcast %67 : vector<16x1xf32> to vector<16x32xf32>
    %75 = vector.broadcast %47 : vector<1x32xf32> to vector<16x32xf32>
    %76 = arith.mulf %74, %75 : vector<16x32xf32>
    %77 = arith.addf %73, %76 : vector<16x32xf32>
    %78 = vector.broadcast %71 : vector<16x1xf32> to vector<16x32xf32>
    %79 = arith.mulf %77, %78 : vector<16x32xf32>
    %80 = arith.truncf %79 : vector<16x32xf32> to vector<16x32xbf16>
    %c0_39 = arith.constant 0 : index
    %c0_40 = arith.constant 0 : index
    %81 = vector.load %arg20[%c0_39, %c0_40] : memref<16x128xbf16, #tpu.memory_space<vmem>>, vector<16x32xbf16>
    tpu.vector_store %arg20[%c0_39, %c0_40], %80 {strides = array<i32>} : memref<16x128xbf16, #tpu.memory_space<vmem>>, vector<16x32xbf16>,
    %c0_41 = arith.constant 0 : index
    %c32 = arith.constant 32 : index
    %82 = vector.load %arg19[%c0_41, %c32] : memref<16x384xbf16, #tpu.memory_space<vmem>>, vector<16x32xbf16>
    %c0_42 = arith.constant 0 : index
    %c160 = arith.constant 160 : index
    %83 = vector.load %arg19[%c0_42, %c160] : memref<16x384xbf16, #tpu.memory_space<vmem>>, vector<16x32xbf16>
    %c0_43 = arith.constant 0 : index
    %c288 = arith.constant 288 : index
    %84 = vector.load %arg19[%c0_43, %c288] : memref<16x384xbf16, #tpu.memory_space<vmem>>, vector<16x32xbf16>
    %c0_44 = arith.constant 0 : index
    %c0_45 = arith.constant 0 : index
    %c32_46 = arith.constant 32 : index
    %85 = vector.load %arg7[%c0_44, %c0_45, %c32_46] : memref<1x1x128xf32, #tpu.memory_space<vmem>>, vector<1x1x32xf32>
    %86 = vector.shape_cast %85 : vector<1x1x32xf32> to vector<1x32xf32>
    %c0_47 = arith.constant 0 : index
    %c0_48 = arith.constant 0 : index
    %c32_49 = arith.constant 32 : index
    %87 = vector.load %arg8[%c0_47, %c0_48, %c32_49] : memref<1x1x128xf32, #tpu.memory_space<vmem>>, vector<1x1x32xf32>
    %88 = vector.shape_cast %87 : vector<1x1x32xf32> to vector<1x32xf32>
    %cst_50 = arith.constant dense<0.000000e+00> : vector<16x16xf32>
    %89 = tpu.matmul %82, %83, %cst_50 {dimension_numbers = #tpu.dot_dimension_numbers<[1], [1], [0], [0], [0, 0, 1, 0], [], []>} : vector<16x32xbf16>, vector<16x32xbf16>, vector<16x16xf32> -> vector<16x16xf32>
    %cst_51 = arith.constant 0.176776692 : f32
    %90 = vector.broadcast %cst_51 : f32 to vector<16x16xf32>
    %91 = arith.mulf %89, %90 : vector<16x16xf32>
    %cst_52 = arith.constant -1.000000e+30 : f32
    %92 = vector.broadcast %cst_52 : f32 to vector<16x16xf32>
    %93 = arith.select %40, %91, %92 : vector<16x16xi1>, vector<16x16xf32>
    %94 = arith.extf %82 : vector<16x32xbf16> to vector<16x32xf32>
    %95 = vector.broadcast %86 : vector<1x32xf32> to vector<16x32xf32>
    %96 = arith.mulf %94, %95 : vector<16x32xf32>
    %cst_53 = arith.constant dense<0.000000e+00> : vector<16xf32>
    %97 = vector.multi_reduction <add>, %96, %cst_53 [1] : vector<16x32xf32> to vector<16xf32>
    %98 = vector.shape_cast %97 : vector<16xf32> to vector<16x1xf32>
    %cst_54 = arith.constant 0.176776692 : f32
    %99 = vector.broadcast %cst_54 : f32 to vector<16x1xf32>
    %100 = arith.mulf %98, %99 : vector<16x1xf32>
    %cst_55 = arith.constant dense<0xFF800000> : vector<16xf32>
    %101 = vector.multi_reduction <maximumf>, %93, %cst_55 [1] : vector<16x16xf32> to vector<16xf32>
    %102 = vector.shape_cast %101 : vector<16xf32> to vector<16x1xf32>
    %103 = arith.maximumf %102, %100 : vector<16x1xf32>
    %104 = vector.broadcast %103 : vector<16x1xf32> to vector<16x16xf32>
    %105 = arith.subf %93, %104 : vector<16x16xf32>
    %106 = math.exp %105 : vector<16x16xf32>
    %107 = arith.subf %100, %103 : vector<16x1xf32>
    %108 = math.exp %107 : vector<16x1xf32>
    %cst_56 = arith.constant dense<0.000000e+00> : vector<16xf32>
    %109 = vector.multi_reduction <add>, %106, %cst_56 [1] : vector<16x16xf32> to vector<16xf32>
    %110 = vector.shape_cast %109 : vector<16xf32> to vector<16x1xf32>
    %111 = arith.addf %110, %108 : vector<16x1xf32>
    %112 = tpu.reciprocal %111 {approx = true} : vector<16x1xf32> -> vector<16x1xf32>
    %113 = arith.truncf %106 : vector<16x16xf32> to vector<16x16xbf16>
    %cst_57 = arith.constant dense<0.000000e+00> : vector<16x32xf32>
    %114 = tpu.matmul %113, %84, %cst_57 {dimension_numbers = #tpu.dot_dimension_numbers<[1], [0], [0], [1], [0, 0, 1, 1], [], []>} : vector<16x16xbf16>, vector<16x32xbf16>, vector<16x32xf32> -> vector<16x32xf32>
    %115 = vector.broadcast %108 : vector<16x1xf32> to vector<16x32xf32>
    %116 = vector.broadcast %88 : vector<1x32xf32> to vector<16x32xf32>
    %117 = arith.mulf %115, %116 : vector<16x32xf32>
    %118 = arith.addf %114, %117 : vector<16x32xf32>
    %119 = vector.broadcast %112 : vector<16x1xf32> to vector<16x32xf32>
    %120 = arith.mulf %118, %119 : vector<16x32xf32>
    %121 = arith.truncf %120 : vector<16x32xf32> to vector<16x32xbf16>
    %c0_58 = arith.constant 0 : index
    %c32_59 = arith.constant 32 : index
    %122 = vector.load %arg20[%c0_58, %c32_59] : memref<16x128xbf16, #tpu.memory_space<vmem>>, vector<16x32xbf16>
    tpu.vector_store %arg20[%c0_58, %c32_59], %121 {strides = array<i32>} : memref<16x128xbf16, #tpu.memory_space<vmem>>, vector<16x32xbf16>,
    %c0_60 = arith.constant 0 : index
    %c64 = arith.constant 64 : index
    %123 = vector.load %arg19[%c0_60, %c64] : memref<16x384xbf16, #tpu.memory_space<vmem>>, vector<16x32xbf16>
    %c0_61 = arith.constant 0 : index
    %c192 = arith.constant 192 : index
    %124 = vector.load %arg19[%c0_61, %c192] : memref<16x384xbf16, #tpu.memory_space<vmem>>, vector<16x32xbf16>
    %c0_62 = arith.constant 0 : index
    %c320 = arith.constant 320 : index
    %125 = vector.load %arg19[%c0_62, %c320] : memref<16x384xbf16, #tpu.memory_space<vmem>>, vector<16x32xbf16>
    %c0_63 = arith.constant 0 : index
    %c0_64 = arith.constant 0 : index
    %c64_65 = arith.constant 64 : index
    %126 = vector.load %arg7[%c0_63, %c0_64, %c64_65] : memref<1x1x128xf32, #tpu.memory_space<vmem>>, vector<1x1x32xf32>
    %127 = vector.shape_cast %126 : vector<1x1x32xf32> to vector<1x32xf32>
    %c0_66 = arith.constant 0 : index
    %c0_67 = arith.constant 0 : index
    %c64_68 = arith.constant 64 : index
    %128 = vector.load %arg8[%c0_66, %c0_67, %c64_68] : memref<1x1x128xf32, #tpu.memory_space<vmem>>, vector<1x1x32xf32>
    %129 = vector.shape_cast %128 : vector<1x1x32xf32> to vector<1x32xf32>
    %cst_69 = arith.constant dense<0.000000e+00> : vector<16x16xf32>
    %130 = tpu.matmul %123, %124, %cst_69 {dimension_numbers = #tpu.dot_dimension_numbers<[1], [1], [0], [0], [0, 0, 1, 0], [], []>} : vector<16x32xbf16>, vector<16x32xbf16>, vector<16x16xf32> -> vector<16x16xf32>
    %cst_70 = arith.constant 0.176776692 : f32
    %131 = vector.broadcast %cst_70 : f32 to vector<16x16xf32>
    %132 = arith.mulf %130, %131 : vector<16x16xf32>
    %cst_71 = arith.constant -1.000000e+30 : f32
    %133 = vector.broadcast %cst_71 : f32 to vector<16x16xf32>
    %134 = arith.select %40, %132, %133 : vector<16x16xi1>, vector<16x16xf32>
    %135 = arith.extf %123 : vector<16x32xbf16> to vector<16x32xf32>
    %136 = vector.broadcast %127 : vector<1x32xf32> to vector<16x32xf32>
    %137 = arith.mulf %135, %136 : vector<16x32xf32>
    %cst_72 = arith.constant dense<0.000000e+00> : vector<16xf32>
    %138 = vector.multi_reduction <add>, %137, %cst_72 [1] : vector<16x32xf32> to vector<16xf32>
    %139 = vector.shape_cast %138 : vector<16xf32> to vector<16x1xf32>
    %cst_73 = arith.constant 0.176776692 : f32
    %140 = vector.broadcast %cst_73 : f32 to vector<16x1xf32>
    %141 = arith.mulf %139, %140 : vector<16x1xf32>
    %cst_74 = arith.constant dense<0xFF800000> : vector<16xf32>
    %142 = vector.multi_reduction <maximumf>, %134, %cst_74 [1] : vector<16x16xf32> to vector<16xf32>
    %143 = vector.shape_cast %142 : vector<16xf32> to vector<16x1xf32>
    %144 = arith.maximumf %143, %141 : vector<16x1xf32>
    %145 = vector.broadcast %144 : vector<16x1xf32> to vector<16x16xf32>
    %146 = arith.subf %134, %145 : vector<16x16xf32>
    %147 = math.exp %146 : vector<16x16xf32>
    %148 = arith.subf %141, %144 : vector<16x1xf32>
    %149 = math.exp %148 : vector<16x1xf32>
    %cst_75 = arith.constant dense<0.000000e+00> : vector<16xf32>
    %150 = vector.multi_reduction <add>, %147, %cst_75 [1] : vector<16x16xf32> to vector<16xf32>
    %151 = vector.shape_cast %150 : vector<16xf32> to vector<16x1xf32>
    %152 = arith.addf %151, %149 : vector<16x1xf32>
    %153 = tpu.reciprocal %152 {approx = true} : vector<16x1xf32> -> vector<16x1xf32>
    %154 = arith.truncf %147 : vector<16x16xf32> to vector<16x16xbf16>
    %cst_76 = arith.constant dense<0.000000e+00> : vector<16x32xf32>
    %155 = tpu.matmul %154, %125, %cst_76 {dimension_numbers = #tpu.dot_dimension_numbers<[1], [0], [0], [1], [0, 0, 1, 1], [], []>} : vector<16x16xbf16>, vector<16x32xbf16>, vector<16x32xf32> -> vector<16x32xf32>
    %156 = vector.broadcast %149 : vector<16x1xf32> to vector<16x32xf32>
    %157 = vector.broadcast %129 : vector<1x32xf32> to vector<16x32xf32>
    %158 = arith.mulf %156, %157 : vector<16x32xf32>
    %159 = arith.addf %155, %158 : vector<16x32xf32>
    %160 = vector.broadcast %153 : vector<16x1xf32> to vector<16x32xf32>
    %161 = arith.mulf %159, %160 : vector<16x32xf32>
    %162 = arith.truncf %161 : vector<16x32xf32> to vector<16x32xbf16>
    %c0_77 = arith.constant 0 : index
    %c64_78 = arith.constant 64 : index
    %163 = vector.load %arg20[%c0_77, %c64_78] : memref<16x128xbf16, #tpu.memory_space<vmem>>, vector<16x32xbf16>
    tpu.vector_store %arg20[%c0_77, %c64_78], %162 {strides = array<i32>} : memref<16x128xbf16, #tpu.memory_space<vmem>>, vector<16x32xbf16>,
    %c0_79 = arith.constant 0 : index
    %c96 = arith.constant 96 : index
    %164 = vector.load %arg19[%c0_79, %c96] : memref<16x384xbf16, #tpu.memory_space<vmem>>, vector<16x32xbf16>
    %c0_80 = arith.constant 0 : index
    %c224 = arith.constant 224 : index
    %165 = vector.load %arg19[%c0_80, %c224] : memref<16x384xbf16, #tpu.memory_space<vmem>>, vector<16x32xbf16>
    %c0_81 = arith.constant 0 : index
    %c352 = arith.constant 352 : index
    %166 = vector.load %arg19[%c0_81, %c352] : memref<16x384xbf16, #tpu.memory_space<vmem>>, vector<16x32xbf16>
    %c0_82 = arith.constant 0 : index
    %c0_83 = arith.constant 0 : index
    %c96_84 = arith.constant 96 : index
    %167 = vector.load %arg7[%c0_82, %c0_83, %c96_84] : memref<1x1x128xf32, #tpu.memory_space<vmem>>, vector<1x1x32xf32>
    %168 = vector.shape_cast %167 : vector<1x1x32xf32> to vector<1x32xf32>
    %c0_85 = arith.constant 0 : index
    %c0_86 = arith.constant 0 : index
    %c96_87 = arith.constant 96 : index
    %169 = vector.load %arg8[%c0_85, %c0_86, %c96_87] : memref<1x1x128xf32, #tpu.memory_space<vmem>>, vector<1x1x32xf32>
    %170 = vector.shape_cast %169 : vector<1x1x32xf32> to vector<1x32xf32>
    %cst_88 = arith.constant dense<0.000000e+00> : vector<16x16xf32>
    %171 = tpu.matmul %164, %165, %cst_88 {dimension_numbers = #tpu.dot_dimension_numbers<[1], [1], [0], [0], [0, 0, 1, 0], [], []>} : vector<16x32xbf16>, vector<16x32xbf16>, vector<16x16xf32> -> vector<16x16xf32>
    %cst_89 = arith.constant 0.176776692 : f32
    %172 = vector.broadcast %cst_89 : f32 to vector<16x16xf32>
    %173 = arith.mulf %171, %172 : vector<16x16xf32>
    %cst_90 = arith.constant -1.000000e+30 : f32
    %174 = vector.broadcast %cst_90 : f32 to vector<16x16xf32>
    %175 = arith.select %40, %173, %174 : vector<16x16xi1>, vector<16x16xf32>
    %176 = arith.extf %164 : vector<16x32xbf16> to vector<16x32xf32>
    %177 = vector.broadcast %168 : vector<1x32xf32> to vector<16x32xf32>
    %178 = arith.mulf %176, %177 : vector<16x32xf32>
    %cst_91 = arith.constant dense<0.000000e+00> : vector<16xf32>
    %179 = vector.multi_reduction <add>, %178, %cst_91 [1] : vector<16x32xf32> to vector<16xf32>
    %180 = vector.shape_cast %179 : vector<16xf32> to vector<16x1xf32>
    %cst_92 = arith.constant 0.176776692 : f32
    %181 = vector.broadcast %cst_92 : f32 to vector<16x1xf32>
    %182 = arith.mulf %180, %181 : vector<16x1xf32>
    %cst_93 = arith.constant dense<0xFF800000> : vector<16xf32>
    %183 = vector.multi_reduction <maximumf>, %175, %cst_93 [1] : vector<16x16xf32> to vector<16xf32>
    %184 = vector.shape_cast %183 : vector<16xf32> to vector<16x1xf32>
    %185 = arith.maximumf %184, %182 : vector<16x1xf32>
    %186 = vector.broadcast %185 : vector<16x1xf32> to vector<16x16xf32>
    %187 = arith.subf %175, %186 : vector<16x16xf32>
    %188 = math.exp %187 : vector<16x16xf32>
    %189 = arith.subf %182, %185 : vector<16x1xf32>
    %190 = math.exp %189 : vector<16x1xf32>
    %cst_94 = arith.constant dense<0.000000e+00> : vector<16xf32>
    %191 = vector.multi_reduction <add>, %188, %cst_94 [1] : vector<16x16xf32> to vector<16xf32>
    %192 = vector.shape_cast %191 : vector<16xf32> to vector<16x1xf32>
    %193 = arith.addf %192, %190 : vector<16x1xf32>
    %194 = tpu.reciprocal %193 {approx = true} : vector<16x1xf32> -> vector<16x1xf32>
    %195 = arith.truncf %188 : vector<16x16xf32> to vector<16x16xbf16>
    %cst_95 = arith.constant dense<0.000000e+00> : vector<16x32xf32>
    %196 = tpu.matmul %195, %166, %cst_95 {dimension_numbers = #tpu.dot_dimension_numbers<[1], [0], [0], [1], [0, 0, 1, 1], [], []>} : vector<16x16xbf16>, vector<16x32xbf16>, vector<16x32xf32> -> vector<16x32xf32>
    %197 = vector.broadcast %190 : vector<16x1xf32> to vector<16x32xf32>
    %198 = vector.broadcast %170 : vector<1x32xf32> to vector<16x32xf32>
    %199 = arith.mulf %197, %198 : vector<16x32xf32>
    %200 = arith.addf %196, %199 : vector<16x32xf32>
    %201 = vector.broadcast %194 : vector<16x1xf32> to vector<16x32xf32>
    %202 = arith.mulf %200, %201 : vector<16x32xf32>
    %203 = arith.truncf %202 : vector<16x32xf32> to vector<16x32xbf16>
    %c0_96 = arith.constant 0 : index
    %c96_97 = arith.constant 96 : index
    %204 = vector.load %arg20[%c0_96, %c96_97] : memref<16x128xbf16, #tpu.memory_space<vmem>>, vector<16x32xbf16>
    tpu.vector_store %arg20[%c0_96, %c96_97], %203 {strides = array<i32>} : memref<16x128xbf16, #tpu.memory_space<vmem>>, vector<16x32xbf16>,
    %c0_98 = arith.constant 0 : index
    %c0_99 = arith.constant 0 : index
    %205 = vector.load %arg20[%c0_98, %c0_99] : memref<16x128xbf16, #tpu.memory_space<vmem>>, vector<16x128xbf16>
    %c0_100 = arith.constant 0 : index
    %c0_101 = arith.constant 0 : index
    %c0_102 = arith.constant 0 : index
    %206 = vector.load %arg9[%c0_100, %c0_101, %c0_102] : memref<1x128x128xbf16, #tpu.memory_space<vmem>>, vector<1x128x128xbf16>
    %207 = vector.shape_cast %206 : vector<1x128x128xbf16> to vector<128x128xbf16>
    %cst_103 = arith.constant dense<0.000000e+00> : vector<16x128xf32>
    %208 = tpu.matmul %205, %207, %cst_103 {dimension_numbers = #tpu.dot_dimension_numbers<[1], [0], [0], [1], [0, 0, 1, 1], [], []>} : vector<16x128xbf16>, vector<128x128xbf16>, vector<16x128xf32> -> vector<16x128xf32>
    %c0_104 = arith.constant 0 : index
    %c0_105 = arith.constant 0 : index
    %c0_106 = arith.constant 0 : index
    %209 = vector.load %arg10[%c0_104, %c0_105, %c0_106] : memref<1x1x128xf32, #tpu.memory_space<vmem>>, vector<1x1x128xf32>
    %210 = vector.shape_cast %209 : vector<1x1x128xf32> to vector<1x128xf32>
    %211 = vector.broadcast %210 : vector<1x128xf32> to vector<16x128xf32>
    %212 = arith.addf %208, %211 : vector<16x128xf32>
    %213 = arith.addf %3, %212 : vector<16x128xf32>
    %c0_107 = arith.constant 0 : index
    %c0_108 = arith.constant 0 : index
    %c0_109 = arith.constant 0 : index
    %214 = vector.load %arg11[%c0_107, %c0_108, %c0_109] : memref<1x1x128xf32, #tpu.memory_space<vmem>>, vector<1x1x128xf32>
    %215 = vector.shape_cast %214 : vector<1x1x128xf32> to vector<1x128xf32>
    %c0_110 = arith.constant 0 : index
    %c0_111 = arith.constant 0 : index
    %c0_112 = arith.constant 0 : index
    %216 = vector.load %arg12[%c0_110, %c0_111, %c0_112] : memref<1x1x128xf32, #tpu.memory_space<vmem>>, vector<1x1x128xf32>
    %217 = vector.shape_cast %216 : vector<1x1x128xf32> to vector<1x128xf32>
    %cst_113 = arith.constant dense<0.000000e+00> : vector<16xf32>
    %218 = vector.multi_reduction <add>, %213, %cst_113 [1] : vector<16x128xf32> to vector<16xf32>
    %219 = vector.shape_cast %218 : vector<16xf32> to vector<16x1xf32>
    %cst_114 = arith.constant 1.280000e+02 : f32
    %220 = vector.broadcast %cst_114 : f32 to vector<16x1xf32>
    %221 = arith.divf %219, %220 : vector<16x1xf32>
    %222 = vector.broadcast %221 : vector<16x1xf32> to vector<16x128xf32>
    %223 = arith.subf %213, %222 : vector<16x128xf32>
    %224 = arith.mulf %223, %223 : vector<16x128xf32>
    %cst_115 = arith.constant dense<0.000000e+00> : vector<16xf32>
    %225 = vector.multi_reduction <add>, %224, %cst_115 [1] : vector<16x128xf32> to vector<16xf32>
    %226 = vector.shape_cast %225 : vector<16xf32> to vector<16x1xf32>
    %cst_116 = arith.constant 1.280000e+02 : f32
    %227 = vector.broadcast %cst_116 : f32 to vector<16x1xf32>
    %228 = arith.divf %226, %227 : vector<16x1xf32>
    %cst_117 = arith.constant 9.99999997E-7 : f32
    %229 = vector.broadcast %cst_117 : f32 to vector<16x1xf32>
    %230 = arith.addf %228, %229 : vector<16x1xf32>
    %231 = math.rsqrt %230 : vector<16x1xf32>
    %232 = vector.broadcast %231 : vector<16x1xf32> to vector<16x128xf32>
    %233 = arith.mulf %223, %232 : vector<16x128xf32>
    %234 = vector.broadcast %215 : vector<1x128xf32> to vector<16x128xf32>
    %235 = arith.mulf %233, %234 : vector<16x128xf32>
    %236 = vector.broadcast %217 : vector<1x128xf32> to vector<16x128xf32>
    %237 = arith.addf %235, %236 : vector<16x128xf32>
    %238 = arith.truncf %237 : vector<16x128xf32> to vector<16x128xbf16>
    %c0_118 = arith.constant 0 : index
    %c0_119 = arith.constant 0 : index
    %c0_120 = arith.constant 0 : index
    %239 = vector.load %arg13[%c0_118, %c0_119, %c0_120] : memref<1x128x512xbf16, #tpu.memory_space<vmem>>, vector<1x128x512xbf16>
    %240 = vector.shape_cast %239 : vector<1x128x512xbf16> to vector<128x512xbf16>
    %cst_121 = arith.constant dense<0.000000e+00> : vector<16x512xf32>
    %241 = tpu.matmul %238, %240, %cst_121 {dimension_numbers = #tpu.dot_dimension_numbers<[1], [0], [0], [1], [0, 0, 1, 1], [], []>} : vector<16x128xbf16>, vector<128x512xbf16>, vector<16x512xf32> -> vector<16x512xf32>
    %c0_122 = arith.constant 0 : index
    %c0_123 = arith.constant 0 : index
    %c0_124 = arith.constant 0 : index
    %242 = vector.load %arg14[%c0_122, %c0_123, %c0_124] : memref<1x1x512xf32, #tpu.memory_space<vmem>>, vector<1x1x512xf32>
    %243 = vector.shape_cast %242 : vector<1x1x512xf32> to vector<1x512xf32>
    %244 = vector.broadcast %243 : vector<1x512xf32> to vector<16x512xf32>
    %245 = arith.addf %241, %244 : vector<16x512xf32>
    %cst_125 = arith.constant 5.000000e-01 : f32
    %246 = vector.broadcast %cst_125 : f32 to vector<16x512xf32>
    %247 = arith.mulf %246, %245 : vector<16x512xf32>
    %cst_126 = arith.constant 0.707106769 : f32
    %248 = vector.broadcast %cst_126 : f32 to vector<16x512xf32>
    %249 = arith.mulf %245, %248 : vector<16x512xf32>
    %250 = math.erf %249 : vector<16x512xf32>
    %cst_127 = arith.constant 1.000000e+00 : f32
    %251 = vector.broadcast %cst_127 : f32 to vector<16x512xf32>
    %252 = arith.addf %251, %250 : vector<16x512xf32>
    %253 = arith.mulf %247, %252 : vector<16x512xf32>
    %254 = arith.truncf %253 : vector<16x512xf32> to vector<16x512xbf16>
    %c0_128 = arith.constant 0 : index
    %c0_129 = arith.constant 0 : index
    %c0_130 = arith.constant 0 : index
    %255 = vector.load %arg15[%c0_128, %c0_129, %c0_130] : memref<1x512x128xbf16, #tpu.memory_space<vmem>>, vector<1x512x128xbf16>
    %256 = vector.shape_cast %255 : vector<1x512x128xbf16> to vector<512x128xbf16>
    %cst_131 = arith.constant dense<0.000000e+00> : vector<16x128xf32>
    %257 = tpu.matmul %254, %256, %cst_131 {dimension_numbers = #tpu.dot_dimension_numbers<[1], [0], [0], [1], [0, 0, 1, 1], [], []>} : vector<16x512xbf16>, vector<512x128xbf16>, vector<16x128xf32> -> vector<16x128xf32>
    %258 = arith.addf %213, %257 : vector<16x128xf32>
    %c0_132 = arith.constant 0 : index
    %c0_133 = arith.constant 0 : index
    %c0_134 = arith.constant 0 : index
    %259 = vector.load %arg16[%c0_132, %c0_133, %c0_134] : memref<1x1x128xf32, #tpu.memory_space<vmem>>, vector<1x1x128xf32>
    %260 = vector.shape_cast %259 : vector<1x1x128xf32> to vector<1x128xf32>
    %261 = vector.broadcast %260 : vector<1x128xf32> to vector<16x128xf32>
    %262 = arith.addf %258, %261 : vector<16x128xf32>
    %c0_135 = arith.constant 0 : index
    %c0_136 = arith.constant 0 : index
    %263 = vector.load %arg18[%c0_135, %c0_136] : memref<16x128xf32, #tpu.memory_space<vmem>>, vector<16x128xf32>
    tpu.vector_store %arg18[%c0_135, %c0_136], %262 {strides = array<i32>} : memref<16x128xf32, #tpu.memory_space<vmem>>, vector<16x128xf32>,
    %c1_i32 = arith.constant 1 : i32
    %264 = arith.cmpi eq, %arg1, %c1_i32 : i32
    %265 = arith.extui %264 : i1 to i32
    %c0_i32_137 = arith.constant 0 : i32
    %266 = arith.cmpi ne, %265, %c0_i32_137 : i32
    scf.if %266 {
      %267 = vector.extract_strided_slice %262 {offsets = [0, 0], sizes = [1, 128], strides = [1, 1]} : vector<16x128xf32> to vector<1x128xf32>
      %268 = arith.truncf %267 : vector<1x128xf32> to vector<1x128xbf16>
      %c0_138 = arith.constant 0 : index
      %c0_139 = arith.constant 0 : index
      %c0_140 = arith.constant 0 : index
      %269 = vector.load %arg17[%c0_138, %c0_139, %c0_140] : memref<1x1x128xbf16, #tpu.memory_space<vmem>>, vector<1x1x128xbf16>
      %270 = vector.shape_cast %269 : vector<1x1x128xbf16> to vector<1x128xbf16>
      %271 = vector.shape_cast %268 : vector<1x128xbf16> to vector<1x1x128xbf16>
      tpu.vector_store %arg17[%c0_138, %c0_139, %c0_140], %271 {strides = array<i32>} : memref<1x1x128xbf16, #tpu.memory_space<vmem>>, vector<1x1x128xbf16>,
    } else {
    }
    return
  }
  func.func @transform_0(%arg0: i32, %arg1: i32) -> (i32, i32, i32) {
    %c0_i32 = arith.constant 0 : i32
    %c0_i32_0 = arith.constant 0 : i32
    %c0_i32_1 = arith.constant 0 : i32
    return %arg0, %c0_i32, %c0_i32_0 : i32, i32, i32
  }
  func.func @transform_1(%arg0: i32, %arg1: i32) -> (i32, i32, i32) {
    %c0_i32 = arith.constant 0 : i32
    %c0_i32_0 = arith.constant 0 : i32
    %c0_i32_1 = arith.constant 0 : i32
    return %arg1, %c0_i32, %c0_i32_0 : i32, i32, i32
  }
  func.func @transform_2(%arg0: i32, %arg1: i32) -> (i32, i32, i32) {
    %c0_i32 = arith.constant 0 : i32
    %c0_i32_0 = arith.constant 0 : i32
    %c0_i32_1 = arith.constant 0 : i32
    return %arg1, %c0_i32, %c0_i32_0 : i32, i32, i32
  }
  func.func @transform_3(%arg0: i32, %arg1: i32) -> (i32, i32, i32) {
    %c0_i32 = arith.constant 0 : i32
    %c0_i32_0 = arith.constant 0 : i32
    %c0_i32_1 = arith.constant 0 : i32
    return %arg1, %c0_i32, %c0_i32_0 : i32, i32, i32
  }
  func.func @transform_4(%arg0: i32, %arg1: i32) -> (i32, i32, i32) {
    %c0_i32 = arith.constant 0 : i32
    %c0_i32_0 = arith.constant 0 : i32
    %c0_i32_1 = arith.constant 0 : i32
    return %arg1, %c0_i32, %c0_i32_0 : i32, i32, i32
  }
  func.func @transform_5(%arg0: i32, %arg1: i32) -> (i32, i32, i32) {
    %c0_i32 = arith.constant 0 : i32
    %c0_i32_0 = arith.constant 0 : i32
    %c0_i32_1 = arith.constant 0 : i32
    return %arg1, %c0_i32, %c0_i32_0 : i32, i32, i32
  }
  func.func @transform_6(%arg0: i32, %arg1: i32) -> (i32, i32, i32) {
    %c0_i32 = arith.constant 0 : i32
    %c0_i32_0 = arith.constant 0 : i32
    %c0_i32_1 = arith.constant 0 : i32
    return %arg1, %c0_i32, %c0_i32_0 : i32, i32, i32
  }
  func.func @transform_7(%arg0: i32, %arg1: i32) -> (i32, i32, i32) {
    %c0_i32 = arith.constant 0 : i32
    %c0_i32_0 = arith.constant 0 : i32
    %c0_i32_1 = arith.constant 0 : i32
    return %arg1, %c0_i32, %c0_i32_0 : i32, i32, i32
  }
  func.func @transform_8(%arg0: i32, %arg1: i32) -> (i32, i32, i32) {
    %c0_i32 = arith.constant 0 : i32
    %c0_i32_0 = arith.constant 0 : i32
    %c0_i32_1 = arith.constant 0 : i32
    return %arg1, %c0_i32, %c0_i32_0 : i32, i32, i32
  }
  func.func @transform_9(%arg0: i32, %arg1: i32) -> (i32, i32, i32) {
    %c0_i32 = arith.constant 0 : i32
    %c0_i32_0 = arith.constant 0 : i32
    %c0_i32_1 = arith.constant 0 : i32
    return %arg1, %c0_i32, %c0_i32_0 : i32, i32, i32
  }
  func.func @transform_10(%arg0: i32, %arg1: i32) -> (i32, i32, i32) {
    %c0_i32 = arith.constant 0 : i32
    %c0_i32_0 = arith.constant 0 : i32
    %c0_i32_1 = arith.constant 0 : i32
    return %arg1, %c0_i32, %c0_i32_0 : i32, i32, i32
  }
  func.func @transform_11(%arg0: i32, %arg1: i32) -> (i32, i32, i32) {
    %c0_i32 = arith.constant 0 : i32
    %c0_i32_0 = arith.constant 0 : i32
    %c0_i32_1 = arith.constant 0 : i32
    return %arg1, %c0_i32, %c0_i32_0 : i32, i32, i32
  }
  func.func @transform_12(%arg0: i32, %arg1: i32) -> (i32, i32, i32) {
    %c0_i32 = arith.constant 0 : i32
    %c0_i32_0 = arith.constant 0 : i32
    %c0_i32_1 = arith.constant 0 : i32
    return %arg1, %c0_i32, %c0_i32_0 : i32, i32, i32
  }
  func.func @transform_13(%arg0: i32, %arg1: i32) -> (i32, i32, i32) {
    %c0_i32 = arith.constant 0 : i32
    %c0_i32_0 = arith.constant 0 : i32
    %c0_i32_1 = arith.constant 0 : i32
    return %arg1, %c0_i32, %c0_i32_0 : i32, i32, i32
  }
  func.func @transform_14(%arg0: i32, %arg1: i32) -> (i32, i32, i32) {
    %c0_i32 = arith.constant 0 : i32
    %c0_i32_0 = arith.constant 0 : i32
    %c0_i32_1 = arith.constant 0 : i32
    return %arg1, %c0_i32, %c0_i32_0 : i32, i32, i32
  }
  func.func @transform_15(%arg0: i32, %arg1: i32) -> (i32, i32, i32) {
    %c0_i32 = arith.constant 0 : i32
    %c0_i32_0 = arith.constant 0 : i32
    %c0_i32_1 = arith.constant 0 : i32
    return %arg0, %c0_i32, %c0_i32_0 : i32, i32, i32
  }
}

module attributes {stable_mosaic.version = 11 : i64} {
  func.func @_head_kernel(%arg0: i32, %arg1: memref<2x128xbf16, #tpu.memory_space<vmem>>, %arg2: memref<1x128xf32, #tpu.memory_space<vmem>>, %arg3: memref<1x128xf32, #tpu.memory_space<vmem>>, %arg4: memref<128x128xbf16, #tpu.memory_space<vmem>>, %arg5: memref<128x128xbf16, #tpu.memory_space<vmem>>, %arg6: memref<1x128xf32, #tpu.memory_space<vmem>>, %arg7: memref<1x128xf32, #tpu.memory_space<vmem>>, %arg8: memref<1x128xf32, #tpu.memory_space<vmem>>, %arg9: memref<128x10xbf16, #tpu.memory_space<vmem>>, %arg10: memref<1x10xf32, #tpu.memory_space<vmem>>, %arg11: memref<2x10xf32, #tpu.memory_space<vmem>>) attributes {dimension_semantics = [#tpu.dimension_semantics<arbitrary>], iteration_bounds = array<i64: 1>, scalar_prefetch = 0 : i64, scratch_operands = 0 : i64, tpu.core_type = #tpu.core_type<tc>, window_params = [{pipeline_mode = #tpu.pipeline_mode<synchronous>, transform_indices = @transform_0, window_bounds = array<i64: 2, 128>}, {pipeline_mode = #tpu.pipeline_mode<synchronous>, transform_indices = @transform_1, window_bounds = array<i64: 1, 128>}, {pipeline_mode = #tpu.pipeline_mode<synchronous>, transform_indices = @transform_2, window_bounds = array<i64: 1, 128>}, {pipeline_mode = #tpu.pipeline_mode<synchronous>, transform_indices = @transform_3, window_bounds = array<i64: 128, 128>}, {pipeline_mode = #tpu.pipeline_mode<synchronous>, transform_indices = @transform_4, window_bounds = array<i64: 128, 128>}, {pipeline_mode = #tpu.pipeline_mode<synchronous>, transform_indices = @transform_5, window_bounds = array<i64: 1, 128>}, {pipeline_mode = #tpu.pipeline_mode<synchronous>, transform_indices = @transform_6, window_bounds = array<i64: 1, 128>}, {pipeline_mode = #tpu.pipeline_mode<synchronous>, transform_indices = @transform_7, window_bounds = array<i64: 1, 128>}, {pipeline_mode = #tpu.pipeline_mode<synchronous>, transform_indices = @transform_8, window_bounds = array<i64: 128, 10>}, {pipeline_mode = #tpu.pipeline_mode<synchronous>, transform_indices = @transform_9, window_bounds = array<i64: 1, 10>}, {pipeline_mode = #tpu.pipeline_mode<synchronous>, transform_indices = @transform_10, window_bounds = array<i64: 2, 10>}]} {
    %c0 = arith.constant 0 : index
    %c0_0 = arith.constant 0 : index
    %0 = vector.load %arg1[%c0, %c0_0] : memref<2x128xbf16, #tpu.memory_space<vmem>>, vector<2x128xbf16>
    %1 = arith.extf %0 : vector<2x128xbf16> to vector<2x128xf32>
    %c0_1 = arith.constant 0 : index
    %c0_2 = arith.constant 0 : index
    %2 = vector.load %arg2[%c0_1, %c0_2] : memref<1x128xf32, #tpu.memory_space<vmem>>, vector<1x128xf32>
    %c0_3 = arith.constant 0 : index
    %c0_4 = arith.constant 0 : index
    %3 = vector.load %arg3[%c0_3, %c0_4] : memref<1x128xf32, #tpu.memory_space<vmem>>, vector<1x128xf32>
    %cst = arith.constant dense<0.000000e+00> : vector<2xf32>
    %4 = vector.multi_reduction <add>, %1, %cst [1] : vector<2x128xf32> to vector<2xf32>
    %5 = vector.shape_cast %4 : vector<2xf32> to vector<2x1xf32>
    %cst_5 = arith.constant 1.280000e+02 : f32
    %6 = vector.broadcast %cst_5 : f32 to vector<2x1xf32>
    %7 = arith.divf %5, %6 : vector<2x1xf32>
    %8 = vector.broadcast %7 : vector<2x1xf32> to vector<2x128xf32>
    %9 = arith.subf %1, %8 : vector<2x128xf32>
    %10 = arith.mulf %9, %9 : vector<2x128xf32>
    %cst_6 = arith.constant dense<0.000000e+00> : vector<2xf32>
    %11 = vector.multi_reduction <add>, %10, %cst_6 [1] : vector<2x128xf32> to vector<2xf32>
    %12 = vector.shape_cast %11 : vector<2xf32> to vector<2x1xf32>
    %cst_7 = arith.constant 1.280000e+02 : f32
    %13 = vector.broadcast %cst_7 : f32 to vector<2x1xf32>
    %14 = arith.divf %12, %13 : vector<2x1xf32>
    %cst_8 = arith.constant 9.99999997E-7 : f32
    %15 = vector.broadcast %cst_8 : f32 to vector<2x1xf32>
    %16 = arith.addf %14, %15 : vector<2x1xf32>
    %17 = math.rsqrt %16 : vector<2x1xf32>
    %18 = vector.broadcast %17 : vector<2x1xf32> to vector<2x128xf32>
    %19 = arith.mulf %9, %18 : vector<2x128xf32>
    %20 = vector.broadcast %2 : vector<1x128xf32> to vector<2x128xf32>
    %21 = arith.mulf %19, %20 : vector<2x128xf32>
    %22 = vector.broadcast %3 : vector<1x128xf32> to vector<2x128xf32>
    %23 = arith.addf %21, %22 : vector<2x128xf32>
    %24 = arith.truncf %23 : vector<2x128xf32> to vector<2x128xbf16>
    %c0_9 = arith.constant 0 : index
    %c0_10 = arith.constant 0 : index
    %25 = vector.load %arg4[%c0_9, %c0_10] : memref<128x128xbf16, #tpu.memory_space<vmem>>, vector<128x128xbf16>
    %cst_11 = arith.constant dense<0.000000e+00> : vector<2x128xf32>
    %26 = tpu.matmul %24, %25, %cst_11 {dimension_numbers = #tpu.dot_dimension_numbers<[1], [0], [0], [1], [0, 0, 1, 1], [], []>} : vector<2x128xbf16>, vector<128x128xbf16>, vector<2x128xf32> -> vector<2x128xf32>
    %27 = arith.mulf %26, %26 : vector<2x128xf32>
    %cst_12 = arith.constant dense<0.000000e+00> : vector<2xf32>
    %28 = vector.multi_reduction <add>, %27, %cst_12 [1] : vector<2x128xf32> to vector<2xf32>
    %29 = vector.shape_cast %28 : vector<2xf32> to vector<2x1xf32>
    %30 = math.sqrt %29 : vector<2x1xf32>
    %cst_13 = arith.constant 9.99999996E-13 : f32
    %31 = vector.broadcast %cst_13 : f32 to vector<2x1xf32>
    %32 = arith.maximumf %30, %31 : vector<2x1xf32>
    %33 = vector.broadcast %32 : vector<2x1xf32> to vector<2x128xf32>
    %34 = arith.divf %26, %33 : vector<2x128xf32>
    %cst_14 = arith.constant 2.000000e+01 : f32
    %35 = vector.broadcast %cst_14 : f32 to vector<2x128xf32>
    %36 = arith.mulf %34, %35 : vector<2x128xf32>
    %37 = arith.truncf %36 : vector<2x128xf32> to vector<2x128xbf16>
    %c0_15 = arith.constant 0 : index
    %c0_16 = arith.constant 0 : index
    %38 = vector.load %arg5[%c0_15, %c0_16] : memref<128x128xbf16, #tpu.memory_space<vmem>>, vector<128x128xbf16>
    %cst_17 = arith.constant dense<0.000000e+00> : vector<2x128xf32>
    %39 = tpu.matmul %37, %38, %cst_17 {dimension_numbers = #tpu.dot_dimension_numbers<[1], [0], [0], [1], [0, 0, 1, 1], [], []>} : vector<2x128xbf16>, vector<128x128xbf16>, vector<2x128xf32> -> vector<2x128xf32>
    %c0_18 = arith.constant 0 : index
    %c0_19 = arith.constant 0 : index
    %40 = vector.load %arg6[%c0_18, %c0_19] : memref<1x128xf32, #tpu.memory_space<vmem>>, vector<1x128xf32>
    %41 = vector.broadcast %40 : vector<1x128xf32> to vector<2x128xf32>
    %42 = arith.addf %39, %41 : vector<2x128xf32>
    %c0_20 = arith.constant 0 : index
    %c0_21 = arith.constant 0 : index
    %43 = vector.load %arg7[%c0_20, %c0_21] : memref<1x128xf32, #tpu.memory_space<vmem>>, vector<1x128xf32>
    %c0_22 = arith.constant 0 : index
    %c0_23 = arith.constant 0 : index
    %44 = vector.load %arg8[%c0_22, %c0_23] : memref<1x128xf32, #tpu.memory_space<vmem>>, vector<1x128xf32>
    %cst_24 = arith.constant dense<0.000000e+00> : vector<2xf32>
    %45 = vector.multi_reduction <add>, %42, %cst_24 [1] : vector<2x128xf32> to vector<2xf32>
    %46 = vector.shape_cast %45 : vector<2xf32> to vector<2x1xf32>
    %cst_25 = arith.constant 1.280000e+02 : f32
    %47 = vector.broadcast %cst_25 : f32 to vector<2x1xf32>
    %48 = arith.divf %46, %47 : vector<2x1xf32>
    %49 = vector.broadcast %48 : vector<2x1xf32> to vector<2x128xf32>
    %50 = arith.subf %42, %49 : vector<2x128xf32>
    %51 = arith.mulf %50, %50 : vector<2x128xf32>
    %cst_26 = arith.constant dense<0.000000e+00> : vector<2xf32>
    %52 = vector.multi_reduction <add>, %51, %cst_26 [1] : vector<2x128xf32> to vector<2xf32>
    %53 = vector.shape_cast %52 : vector<2xf32> to vector<2x1xf32>
    %cst_27 = arith.constant 1.280000e+02 : f32
    %54 = vector.broadcast %cst_27 : f32 to vector<2x1xf32>
    %55 = arith.divf %53, %54 : vector<2x1xf32>
    %cst_28 = arith.constant 9.99999974E-6 : f32
    %56 = vector.broadcast %cst_28 : f32 to vector<2x1xf32>
    %57 = arith.addf %55, %56 : vector<2x1xf32>
    %58 = math.rsqrt %57 : vector<2x1xf32>
    %59 = vector.broadcast %58 : vector<2x1xf32> to vector<2x128xf32>
    %60 = arith.mulf %50, %59 : vector<2x128xf32>
    %61 = vector.broadcast %43 : vector<1x128xf32> to vector<2x128xf32>
    %62 = arith.mulf %60, %61 : vector<2x128xf32>
    %63 = vector.broadcast %44 : vector<1x128xf32> to vector<2x128xf32>
    %64 = arith.addf %62, %63 : vector<2x128xf32>
    %cst_29 = arith.constant 5.000000e-01 : f32
    %65 = vector.broadcast %cst_29 : f32 to vector<2x128xf32>
    %66 = arith.mulf %65, %64 : vector<2x128xf32>
    %cst_30 = arith.constant 0.707106769 : f32
    %67 = vector.broadcast %cst_30 : f32 to vector<2x128xf32>
    %68 = arith.mulf %64, %67 : vector<2x128xf32>
    %69 = math.erf %68 : vector<2x128xf32>
    %cst_31 = arith.constant 1.000000e+00 : f32
    %70 = vector.broadcast %cst_31 : f32 to vector<2x128xf32>
    %71 = arith.addf %70, %69 : vector<2x128xf32>
    %72 = arith.mulf %66, %71 : vector<2x128xf32>
    %73 = arith.truncf %72 : vector<2x128xf32> to vector<2x128xbf16>
    %c0_32 = arith.constant 0 : index
    %c0_33 = arith.constant 0 : index
    %74 = vector.load %arg9[%c0_32, %c0_33] : memref<128x10xbf16, #tpu.memory_space<vmem>>, vector<128x10xbf16>
    %cst_34 = arith.constant dense<0.000000e+00> : vector<2x10xf32>
    %75 = tpu.matmul %73, %74, %cst_34 {dimension_numbers = #tpu.dot_dimension_numbers<[1], [0], [0], [1], [0, 0, 1, 1], [], []>} : vector<2x128xbf16>, vector<128x10xbf16>, vector<2x10xf32> -> vector<2x10xf32>
    %c0_35 = arith.constant 0 : index
    %c0_36 = arith.constant 0 : index
    %76 = vector.load %arg10[%c0_35, %c0_36] : memref<1x10xf32, #tpu.memory_space<vmem>>, vector<1x10xf32>
    %77 = vector.broadcast %76 : vector<1x10xf32> to vector<2x10xf32>
    %78 = arith.addf %75, %77 : vector<2x10xf32>
    %c0_37 = arith.constant 0 : index
    %c0_38 = arith.constant 0 : index
    %79 = vector.load %arg11[%c0_37, %c0_38] : memref<2x10xf32, #tpu.memory_space<vmem>>, vector<2x10xf32>
    tpu.vector_store %arg11[%c0_37, %c0_38], %78 {strides = array<i32>} : memref<2x10xf32, #tpu.memory_space<vmem>>, vector<2x10xf32>,
    return
  }
  func.func @transform_0(%arg0: i32) -> (i32, i32) {
    %c0_i32 = arith.constant 0 : i32
    %c0_i32_0 = arith.constant 0 : i32
    %c0_i32_1 = arith.constant 0 : i32
    return %c0_i32, %c0_i32_0 : i32, i32
  }
  func.func @transform_1(%arg0: i32) -> (i32, i32) {
    %c0_i32 = arith.constant 0 : i32
    %c0_i32_0 = arith.constant 0 : i32
    %c0_i32_1 = arith.constant 0 : i32
    return %c0_i32, %c0_i32_0 : i32, i32
  }
  func.func @transform_2(%arg0: i32) -> (i32, i32) {
    %c0_i32 = arith.constant 0 : i32
    %c0_i32_0 = arith.constant 0 : i32
    %c0_i32_1 = arith.constant 0 : i32
    return %c0_i32, %c0_i32_0 : i32, i32
  }
  func.func @transform_3(%arg0: i32) -> (i32, i32) {
    %c0_i32 = arith.constant 0 : i32
    %c0_i32_0 = arith.constant 0 : i32
    %c0_i32_1 = arith.constant 0 : i32
    return %c0_i32, %c0_i32_0 : i32, i32
  }
  func.func @transform_4(%arg0: i32) -> (i32, i32) {
    %c0_i32 = arith.constant 0 : i32
    %c0_i32_0 = arith.constant 0 : i32
    %c0_i32_1 = arith.constant 0 : i32
    return %c0_i32, %c0_i32_0 : i32, i32
  }
  func.func @transform_5(%arg0: i32) -> (i32, i32) {
    %c0_i32 = arith.constant 0 : i32
    %c0_i32_0 = arith.constant 0 : i32
    %c0_i32_1 = arith.constant 0 : i32
    return %c0_i32, %c0_i32_0 : i32, i32
  }
  func.func @transform_6(%arg0: i32) -> (i32, i32) {
    %c0_i32 = arith.constant 0 : i32
    %c0_i32_0 = arith.constant 0 : i32
    %c0_i32_1 = arith.constant 0 : i32
    return %c0_i32, %c0_i32_0 : i32, i32
  }
  func.func @transform_7(%arg0: i32) -> (i32, i32) {
    %c0_i32 = arith.constant 0 : i32
    %c0_i32_0 = arith.constant 0 : i32
    %c0_i32_1 = arith.constant 0 : i32
    return %c0_i32, %c0_i32_0 : i32, i32
  }
  func.func @transform_8(%arg0: i32) -> (i32, i32) {
    %c0_i32 = arith.constant 0 : i32
    %c0_i32_0 = arith.constant 0 : i32
    %c0_i32_1 = arith.constant 0 : i32
    return %c0_i32, %c0_i32_0 : i32, i32
  }
  func.func @transform_9(%arg0: i32) -> (i32, i32) {
    %c0_i32 = arith.constant 0 : i32
    %c0_i32_0 = arith.constant 0 : i32
    %c0_i32_1 = arith.constant 0 : i32
    return %c0_i32, %c0_i32_0 : i32, i32
  }
  func.func @transform_10(%arg0: i32) -> (i32, i32) {
    %c0_i32 = arith.constant 0 : i32
    %c0_i32_0 = arith.constant 0 : i32
    %c0_i32_1 = arith.constant 0 : i32
    return %c0_i32, %c0_i32_0 : i32, i32
  }
}

</mosaic_0001>

<bundles_post_ra>
// kernel: imagebind_audio_forward.3
= control target key start
LH: loop header
LB: loop body
LE: loop exit
PB: predicated region body
PF: predicated region fallthrough
CT: control target
= control target key end

     0   :  { %10 = vsyncpa [#allocation3], 0  ;;  %s760_s0 = inlined_call_operand.vmem [shape: bf16[2,16,36], index: 0, kind: input, shape index: {}]   ;;  %s761_s1 = inlined_call_operand.vmem [shape: bf16[36,128], index: 1, kind: input, shape index: {}]   ;;  %s762_s2 = inlined_call_operand.vmem [shape: f32[1,128], index: 2, kind: input, shape index: {}]   ;;  %s763_s3 = inlined_call_operand.vmem [shape: f32[1,128], index: 3, kind: input, shape index: {}]   ;;  %s764_s4 = inlined_call_operand.vmem [shape: f32[16,128], index: 4, kind: input, shape index: {}]   ;;  %s765_s5 = inlined_call_operand.hbm [shape: bf16[2,16,128], index: 5, kind: output, shape index: {}]  }
   0x1   :  { %12 = vsyncpa [#allocation3 + $0x1], 0  ;;  %s636_s18 = smov 0   ;;  %s638_s19 = smov 0  }
   0x2   :  { %s640_s20 = smov 0   ;;  %s642_s21 = smov 0  }
   0x3 LB: > { %s657_s22 = sadd.s32 4294967295, %s599_s21   ;;  %s442_s23 = sadd.s32 4294967294, %s599_s21   ;;  %s599_s21 = sphi %s642_s21, %s771_s21   ;;  %s595_s20 = sphi %s640_s20, %s770_s20   ;;  %s591_s19 = sphi %s638_s19, %s769_s19   ;;  %s587_s18 = sphi %s636_s18, %s768_s18  }
   0x4   : > { %s661_s24 = sadd.s32 1, %s599_s21   ;;  %s135_s25 = sadd.s32 1, %s595_s20 }
   0x5   : > { %s132_s26 = ssub.s32 %s599_s21, %s661_s24  ;;  %p145_p0 = scmp.ne.s32.totalorder %s595_s20, %s591_s19 }
   0x6   : > { %p133_p1 = scmp.eq.s32.totalorder %s132_s26, 0  ;;  %p146_p2 = scmp.eq.s32.totalorder %s657_s22, 1 }
   0x7   : > { %p151_p3 = scmp.ne.s32.totalorder %s591_s19, %s587_s18  ;;  %p152_p4 = scmp.eq.s32.totalorder %s442_s23, 1 }
   0x8   : > { %s672_s27 = scalar_select %p133_p1, %s595_s20, %s135_s25  }
   0x9   : > { %p674_p5 = por %p146_p2, %p145_p0  ;;  %p678_p6 = por %p152_p4, %p151_p3 }
   0xa   : > { %p445_p7 = scmp.ge.s32.totalorder %s599_s21, 1  ;;  %p190_p8 = scmp.lt.s32.totalorder %s599_s21, 3 }
   0xc   : > { %p191_p9 = pnand %p445_p7, %p190_p8 }
   0xd   : > { %v529_v0 = vld [vmem:[%s761_s1] sm:$0xff] (!%p191_p9)   ;;  %v601_v1 = vmov (!%p191_p9), 0.0   ;;  %v530_v2 = vld [vmem:[%s761_s1 + $0x8] sm:$0xff] (!%p191_p9)   ;;  %v531_v3 = vld [vmem:[%s761_s1 + $0x10] ss:$0 sps:$4 sm:$0x33] (!%p191_p9)   ;;  %v341_v24 = vlaneseq (!%p191_p9) }
   0xe   : > { %194 = sbr.rel (%p191_p9) target bundleno = 573 (0x23d), region = 40  ;;  %476 = vmatprep.subr.bf16.mxu0 (!%p191_p9), %v601_v1  ;;  %vm602_vm0 = vmmov (!%p191_p9), 0   ;;  %p218_p10 = scmp.lt.s32.totalorder (!%p191_p9), %s657_s22, 1  ;;  %vm255_vm1 = vcmask (!%p191_p9), 1041408   ;;  %vm251_vm2 = vcmask (!%p191_p9), 293888   ;;  %v352_v38 = vld [vmem:[%s764_s4] sm:$0xff] (!%p191_p9) }
   0xf   : > { %477 = vmatpush3.bf16.msra.mxu0 (!%p191_p9), %v529_v0  ;;  %482 = vmatprep.mubr.msk.bf16.mxu0 (!%p191_p9), %vm602_vm0, %v601_v1  ;;  %v257_v4 = vsel (!%p191_p9), %vm255_vm1, %v531_v3, 0  ;;  %v454_v26 = vld [vmem:[%s762_s2] ss:$0 sm:$0xff] (!%p191_p9)  ;;  %s215_s23 = sand.u32 (!%p191_p9), 1, %s591_s19   ;;  %v342_v29 = vshrl.u32 (!%p191_p9), %v341_v24, 7  ;;  %v353_v39 = vld [vmem:[%s764_s4 + $0x8] sm:$0xff] (!%p191_p9) }
  0x10   : > { %478 = vmatprep.subr.bf16.mxu0 (!%p191_p9), %v601_v1  ;;  %v455_v28 = vld [vmem:[%s763_s3] ss:$0 sm:$0xff] (!%p191_p9)  ;;  %s446_s30 = sshll.u32 (!%p191_p9), %s215_s23, 3  ;;  %s466_s10 = sshll.u32 (!%p191_p9), %s657_s22, 7 }
  0x11   : > { %v343_v32 = vadd.s32 (!%p191_p9), 8, %v342_v29  ;;  %vm344_vm3 = vcmp.gt.s32.totalorder (!%p191_p9), %v342_v29, 0  ;;  %s719_s16 = scalar_lea.sflag (!%p191_p9), [#allocation3], %s215_s23  ;;  %s603_s17 = smov (!%p191_p9), [#allocation2]  }
  0x12   : > { %s541_s25 = sshll.u32 (!%p191_p9), %s603_s17, 4  ;;  %s542_s25 = int_to_ptr.vmem [resolvable:$false] %s541_s25 }
  0x13   : > { %479 = vmatpush3.bf16.msra.mxu0 (!%p191_p9), %v530_v2  ;;  %vm347_vm4 = vcmp.lt.s32.totalorder (!%p191_p9), %v343_v32, 10  ;;  %s543_s26 = scalar_lea.vmem (!%p191_p9), %s542_s25, 256 }
  0x14   : > { %480 = vmatprep.subr.bf16.mxu0 (!%p191_p9), %v601_v1 }
  0x15   : > { %s219_s11 = scalar_select %p218_p10, %s657_s22, 1 }
  0x17   : > { %s463_s12 = sshll.u32 %s219_s11, 3  ;;  %481 = vmatpush3.bf16.msra.mxu0 %v257_v4  ;;  %s217_s11 = scalar_lea.vmem [#allocation2], %s446_s30 }
  0x18   : > { %s222_s15 = scalar_lea.vmem %s760_s0, %s463_s12  ;;  %s380_s12 = sshll.u32 %s217_s11, 4  ;;  %s717_s12 = int_to_ptr.vmem [resolvable:$true] %s380_s12 }
  0x19   : > { %v532_v5 = vld [vmem:[%s222_s15] sm:$0xff]   ;;  %s715_s15 = scalar_lea.hbm %s765_s5, %s466_s10  ;;  %s537_s22 = scalar_lea.vmem %s717_s12, 128 }
  0x1a   : > { %483 = vmatmul.mubr.msk.bf16.vlgmr.msra.gmra.mrb[0].mxu0 %vm251_vm2, %v532_v5  ;;  %p538_p11 = scmp.ne.s32.totalorder %s717_s12, %s537_s22  ;;  %p544_p0 = scmp.lt.s32.totalorder %s717_s12, %s542_s25 }
  0x1b   : > { %p545_p1 = scmp.lt.s32.totalorder %s543_s26, %s537_s22 }
  0x1c   : > { %p539_p12 = pnand %p538_p11, %p674_p5 }
  0x1d   : > { %p546_p2 = por %p545_p1, %p544_p0 }
  0x1e   : > { %p540_p13 = pneg %p539_p12 }
  0x20   : > { %p547_p3 = pnand %p546_p2, %p540_p13 }
  0xed   : > { %v293_v6 = vpop.f32.mrb[0].mxu0 }
  0xee   : > { %302 = vadd.xlane.f32.xlu0 %v293_v6  ;;  %v484_v7 = vpop.f32.mrb[1].mxu0 }
  0xef   : > { %v296_v8 = vpop.f32.mrb[2].mxu0 }
  0xf0   : > { %v485_v9 = vpop.f32.mrb[3].mxu0 }
  0xf2   : > { %304 = vadd.xlane.f32.xlu0 %v296_v8 }
 0x17b   : > { %v303_v10 = vpop.xlane.xlu0 %302 }
 0x17c   : > { %v307_v11 = vmul.f32 0.0078125, %v303_v10 }
 0x17e   : > { %v309_v12 = vsub.f32 %v293_v6, %v307_v11 }
 0x17f   : > { %v305_v13 = vpop.xlane.xlu0 %304 }
 0x180   : > { %v308_v14 = vmul.f32 0.0078125, %v305_v13  ;;  %v311_v15 = vmul.f32 %v309_v12, %v309_v12 }
 0x182   : > { %v310_v16 = vsub.f32 %v296_v8, %v308_v14  ;;  %313 = vadd.xlane.f32.xlu1 %v311_v15 }
 0x184   : > { %v312_v17 = vmul.f32 %v310_v16, %v310_v16 }
 0x186   : > { %315 = vadd.xlane.f32.xlu1 %v312_v17 }
 0x20f   : > { %v314_v18 = vpop.xlane.xlu1 %313 }
 0x210   : > { %v317_v19 = vmul.f32 0.0078125, %v314_v18 }
 0x212   : > { %v319_v20 = vadd.f32 1e-05, %v317_v19 }
 0x213   : > { %v316_v21 = vpop.xlane.xlu1 %315 }
 0x214   : > { %533 = vrsqrt.f32 %v319_v20  ;;  %v318_v22 = vmul.f32 0.0078125, %v316_v21 }
 0x216   : > { %v320_v23 = vadd.f32 1e-05, %v318_v22 }
 0x218   : > { %535 = vrsqrt.f32 %v320_v23 }
 0x21e   : > { %v534_v25 = vpop.eup %533 }
 0x21f   : > { %v323_v27 = vmul.f32 %v534_v25, %v309_v12 }
 0x221   : > { %v331_v30 = vmul.f32 %v454_v26, %v323_v27 }
 0x222   : > { %v536_v31 = vpop.eup %535 }
 0x223   : > { %v324_v33 = vmul.f32 %v536_v31, %v310_v16  ;;  %v339_v34 = vadd.f32 %v455_v28, %v331_v30 }
 0x225   : > { %v332_v35 = vmul.f32 %v454_v26, %v324_v33  ;;  %v350_v37 = vsel %vm344_vm3, %v339_v34, 0.0 }
 0x226   : > { %v354_v41 = vadd.f32 %v352_v38, %v350_v37 }
 0x227   : > { %v340_v36 = vadd.f32 %v455_v28, %v332_v35 }
 0x229   : > { %v351_v40 = vsel %vm347_vm4, %v340_v36, 0.0 }
 0x22a   : > { %v355_v42 = vadd.f32 %v353_v39, %v351_v40 }
 0x22c   : > { %v470_v43 = vpack.c.bf16 %v355_v42, %v354_v41 }
 0x22e   : > { %471 = vst [vmem:[%s217_s11] sm:$0xff] %v470_v43  }
 0x22f   : > { %550 = shalt.err (!%p547_p3)
}
 0x230   : > { %s551_s23 = scalar_lea.hbm %s715_s15, 128  ;;  %s555_s7 = scalar_lea.hbm %s765_s5, 256 }
 0x231   : > { %p552_p4 = scmp.ne.s32.totalorder %s715_s15, %s551_s23  ;;  %p556_p9 = scmp.lt.u32.totalorder %s715_s15, %s765_s5 }
 0x232   : > { %p557_p10 = scmp.lt.u32.totalorder %s555_s7, %s551_s23  ;;  %p559_p12 = scmp.lt.u32.totalorder %s551_s23, %s715_s15 }
 0x233   : > { %p553_p7 = pnand %p552_p4, %p674_p5 }
 0x234   : > { %p558_p11 = por %p557_p10, %p556_p9 }
 0x235   : > { %p554_p8 = pneg %p553_p7 }
 0x236   : > { %p560_p13 = por %p559_p12, %p558_p11 }
 0x238   : > { %p561_p0 = pnand %p560_p13, %p554_p8 }
 0x23a   : > { %564 = shalt.err (!%p561_p0)
}
 0x23b   : > { %s604_s10 = smov 64   ;;  %s605_s11 = smov 4  }
 0x23c   : > { %486 = dma.vmem_to_hbm [thread:$0]  (%p674_p5), %s717_s12, 128, %s715_s15, %s719_s16, %s604_s10, %s604_s10, %s605_s11  }
 0x23d PF: > { %p492_p1 = scmp.ge.s32.totalorder %s599_s21, 2  ;;  %s395_s13 = sand.u32 1, %s587_s18  }
 0x23e   : > { %s396_s14 = scalar_lea.sflag [#allocation3], %s395_s13 }
 0x23f   : > { %p489_p2 = pnand %p492_p1, %p678_p6 }
 0x241   : > { %582 = dma.done.wait (!%p489_p2), %s396_s14, 128  }
 0x242   : > { %584 = vsyncadd (!%p489_p2), %s396_s14, 4294967168  ;;  %p15_p3 = scmp.ge.s32.totalorder %s661_s24, 4   ;;  %s768_s18 = smov %s591_s19 }
 0x243   : > { %s769_s19 = smov %s595_s20  ;;  %s770_s20 = smov %s672_s27 }
 0x244   : > { %s771_s21 = smov %s661_s24  ;;  %17 = sbr.rel (!%p15_p3) target bundleno = 3 (0x3), region = 75 }
 0x24b   :  { %401 = vsyncpa [#allocation3], 1 }
 0x24c   :  { %403 = vsyncpa [#allocation3 + $0x1], 1 }

// kernel: imagebind_audio_forward.5
= control target key start
LH: loop header
LB: loop body
LE: loop exit
PB: predicated region body
PF: predicated region fallthrough
CT: control target
= control target key end

     0   :  { %15 = vsyncpa [#allocation3], 0  ;;  %s873_s0 = inlined_call_operand.vmem [shape: bf16[2,128], index: 0, kind: input, shape index: {}]   ;;  %s874_s1 = inlined_call_operand.vmem [shape: f32[1,128], index: 1, kind: input, shape index: {}]   ;;  %s875_s2 = inlined_call_operand.vmem [shape: f32[1,128], index: 2, kind: input, shape index: {}]   ;;  %s876_s3 = inlined_call_operand.vmem [shape: bf16[128,128], index: 3, kind: input, shape index: {}]   ;;  %s877_s4 = inlined_call_operand.hbm [shape: bf16[128,128], index: 4, kind: input, shape index: {}]   ;;  %s878_s5 = inlined_call_operand.vmem [shape: f32[1,128], index: 5, kind: input, shape index: {}]   ;;  %s879_s6 = inlined_call_operand.vmem [shape: f32[1,128], index: 6, kind: input, shape index: {}]   ;;  %s880_s7 = inlined_call_operand.vmem [shape: f32[1,128], index: 7, kind: input, shape index: {}]   ;;  %s881_s8 = inlined_call_operand.vmem [shape: bf16[128,10], index: 8, kind: input, shape index: {}]   ;;  %s882_s9 = inlined_call_operand.vmem [shape: f32[1,10], index: 9, kind: input, shape index: {}]   ;;  %s883_s10 = inlined_call_operand.hbm [shape: f32[2,10], index: 10, kind: output, shape index: {}]  }
   0x1   :  { %16 = vsyncpa [#allocation4], 0  ;;  %s684_s13 = smov [#allocation2]   ;;  %s636_s17 = scalar_lea.hbm %s877_s4, 1024 }
   0x2   :  { %s30_s14 = sshll.u32 %s684_s13, 4  ;;  %p637_p0 = scmp.ne.s32.totalorder %s877_s4, %s636_s17  ;;  %s31_s14 = int_to_ptr.vmem [resolvable:$true] %s30_s14 }
   0x3   :  { %p640_p1 = scmp.lt.u32.totalorder %s636_s17, %s877_s4 }
   0x5   :  { %p642_p2 = pnand %p640_p1, %p637_p0 }
   0x7   :  { %645 = shalt.err (!%p642_p2)
}
   0x8   :  { %s646_s22 = scalar_lea.vmem %s31_s14, 1024  ;;  %p651_p4 = scmp.lt.s32.totalorder %s31_s14, %s31_s14 }
   0x9   :  { %p647_p3 = scmp.ne.s32.totalorder %s31_s14, %s646_s22  ;;  %p652_p5 = scmp.lt.s32.totalorder %s646_s22, %s646_s22 }
   0xb   :  { %p653_p6 = por %p652_p5, %p651_p4 }
   0xd   :  { %p654_p7 = pnand %p653_p6, %p647_p3 }
   0xf   :  { %657 = shalt.err (!%p654_p7)
}
  0x10   :  { %s685_s23 = smov 64   ;;  %s686_s24 = smov 4  }
  0x11   :  { %36 = dma.hbm_to_vmem [thread:$0]  %s877_s4, 1024, %s31_s14, [#allocation3], %s685_s23, %s685_s23, %s686_s24  }
  0x12   :  { %680 = dma.done.wait [#allocation3], 1024  }
  0x13   :  { %681 = vsyncadd [#allocation3], 4294966272  ;;  %vm55_vm0 = vcmask 1041408   ;;  %v51_v0 = vld [vmem:[%s873_s0] sm:$0x1]  ;;  %v687_v4 = vmov 0.0  }
  0x14   :  { %v52_v1 = vunpack.c.l.bf16 %v51_v0  ;;  %v602_v3 = vld [vmem:[%s876_s3] sm:$0xff]   ;;  %536 = vmatprep.subr.bf16.mxu0 %v687_v4  ;;  %556 = vmatprep.subr.bf16.mxu1 %v687_v4  ;;  %v603_v5 = vld [vmem:[%s876_s3 + $0x8] sm:$0xff]   ;;  %v604_v11 = vld [vmem:[%s876_s3 + $0x10] sm:$0xff]   ;;  %vm688_vm1 = vmmov 0   ;;  %vm462_vm4 = vcmask 74752  }
  0x15   :  { %537 = vmatpush3.bf16.msra.mxu0 %v602_v3  ;;  %v605_v12 = vld [vmem:[%s876_s3 + $0x18] sm:$0xff]   ;;  %v606_v13 = vld [vmem:[%s876_s3 + $0x20] sm:$0xff]   ;;  %552 = vmatprep.mubr.msk.bf16.mxu0 %vm688_vm1, %v687_v4  ;;  %v607_v14 = vld [vmem:[%s876_s3 + $0x28] sm:$0xff]  }
  0x16   :  { %v56_v2 = vsel %vm55_vm0, %v52_v1, 0.0  ;;  %538 = vmatprep.subr.bf16.mxu0 %v687_v4  ;;  %572 = vmatprep.mubr.msk.bf16.mxu1 %vm688_vm1, %v687_v4  ;;  %v608_v15 = vld [vmem:[%s876_s3 + $0x30] sm:$0xff]   ;;  %v609_v16 = vld [vmem:[%s876_s3 + $0x38] sm:$0xff]   ;;  %v479_v21 = vld [vmem:[%s874_s1] ss:$0 sm:$0xff] }
  0x17   :  { %57 = vadd.xlane.f32.xlu0 %v56_v2  ;;  %v480_v23 = vld [vmem:[%s875_s2] ss:$0 sm:$0xff]  ;;  %v611_v34 = vld [vmem:[#allocation2 + $0x8] sm:$0xff]   ;;  %v612_v35 = vld [vmem:[#allocation2 + $0x10] sm:$0xff]  }
  0x18   :  { %v610_v33 = vld [vmem:[#allocation2] sm:$0xff]   ;;  %v613_v36 = vld [vmem:[#allocation2 + $0x18] sm:$0xff]   ;;  %v615_v38 = vld [vmem:[#allocation2 + $0x28] sm:$0xff]  }
  0x19   :  { %539 = vmatpush3.bf16.msra.mxu0 %v603_v5  ;;  %557 = vmatpush3.bf16.msra.mxu1 %v610_v33  ;;  %v614_v37 = vld [vmem:[#allocation2 + $0x20] sm:$0xff]   ;;  %v616_v39 = vld [vmem:[#allocation2 + $0x30] sm:$0xff]   ;;  %v617_v40 = vld [vmem:[#allocation2 + $0x38] sm:$0xff]  }
  0x1a   :  { %540 = vmatprep.subr.bf16.mxu0 %v687_v4  ;;  %558 = vmatprep.subr.bf16.mxu1 %v687_v4  ;;  %v489_v52 = vld [vmem:[%s878_s5] ss:$0 sm:$0xff]  ;;  %v620_v2 = vld [vmem:[%s881_s8 + $0x10] sm:$0xff]   ;;  %v621_v3 = vld [vmem:[%s881_s8 + $0x18] sm:$0xff]  }
  0x1b   :  { %v618_v0 = vld [vmem:[%s881_s8] sm:$0xff]  }
  0x1c   :  { %v622_v5 = vld [vmem:[%s881_s8 + $0x20] sm:$0xff]  }
  0x1d   :  { %541 = vmatpush3.bf16.msra.mxu0 %v604_v11  ;;  %559 = vmatpush3.bf16.msra.mxu1 %v611_v34 }
  0x1e   :  { %542 = vmatprep.subr.bf16.mxu0 %v687_v4  ;;  %560 = vmatprep.subr.bf16.mxu1 %v687_v4 }
  0x21   :  { %543 = vmatpush3.bf16.msra.mxu0 %v605_v12  ;;  %561 = vmatpush3.bf16.msra.mxu1 %v612_v35 }
  0x22   :  { %544 = vmatprep.subr.bf16.mxu0 %v687_v4  ;;  %562 = vmatprep.subr.bf16.mxu1 %v687_v4 }
  0x25   :  { %545 = vmatpush3.bf16.msra.mxu0 %v606_v13  ;;  %563 = vmatpush3.bf16.msra.mxu1 %v613_v36  ;;  %v498_v13 = vld [vmem:[%s879_s6] ss:$0 sm:$0xff]  ;;  %s689_s6 = smov [#allocation5]  }
  0x26   :  { %546 = vmatprep.subr.bf16.mxu0 %v687_v4  ;;  %564 = vmatprep.subr.bf16.mxu1 %v687_v4  ;;  %s470_s24 = sshll.u32 %s689_s6, 4  ;;  %s471_s24 = int_to_ptr.vmem [resolvable:$true] %s470_s24 }
  0x27   :  { %p663_p9 = scmp.lt.s32.totalorder %s471_s24, %s471_s24 }
  0x29   :  { %547 = vmatpush3.bf16.msra.mxu0 %v607_v14  ;;  %565 = vmatpush3.bf16.msra.mxu1 %v614_v37 }
  0x2a   :  { %548 = vmatprep.subr.bf16.mxu0 %v687_v4  ;;  %566 = vmatprep.subr.bf16.mxu1 %v687_v4 }
  0x2d   :  { %549 = vmatpush3.bf16.msra.mxu0 %v608_v15  ;;  %567 = vmatpush3.bf16.msra.mxu1 %v615_v38  ;;  %v499_v15 = vld [vmem:[%s880_s7] ss:$0 sm:$0xff]  ;;  %s658_s7 = scalar_lea.vmem %s471_s24, 32 }
  0x2e   :  { %550 = vmatprep.subr.bf16.mxu0 %v687_v4  ;;  %568 = vmatprep.subr.bf16.mxu1 %v687_v4  ;;  %p659_p8 = scmp.ne.s32.totalorder %s471_s24, %s658_s7  ;;  %p664_p10 = scmp.lt.s32.totalorder %s658_s7, %s658_s7 }
  0x30   :  { %p665_p11 = por %p664_p10, %p663_p9 }
  0x31   :  { %551 = vmatpush3.bf16.msra.mxu0 %v609_v16  ;;  %569 = vmatpush3.bf16.msra.mxu1 %v616_v39 }
  0x32   :  { %576 = vmatprep.subr.bf16.mxu0 %v687_v4  ;;  %570 = vmatprep.subr.bf16.mxu1 %v687_v4  ;;  %p666_p12 = pnand %p665_p11, %p659_p8 }
  0x35   :  { %571 = vmatpush3.bf16.msra.mxu1 %v617_v40 }
  0xa4   :  { %v58_v6 = vpop.xlane.xlu0 %57 }
  0xa5   :  { %v60_v7 = vmul.f32 0.0078125, %v58_v6  ;;  %v623_v6 = vld [vmem:[%s881_s8 + $0x28] sm:$0xff]  }
  0xa7   :  { %v61_v8 = vsub.f32 %v52_v1, %v60_v7  ;;  %v619_v1 = vld [vmem:[%s881_s8 + $0x8] sm:$0xff]   ;;  %v624_v7 = vld [vmem:[%s881_s8 + $0x30] sm:$0xff]  }
  0xa9   :  { %v62_v9 = vmul.f32 %v61_v8, %v61_v8 }
  0xab   :  { %v63_v10 = vsel %vm55_vm0, %v62_v9, 0.0 }
  0xac   :  { %64 = vadd.xlane.f32.xlu0 %v63_v10 }
 0x139   :  { %v65_v17 = vpop.xlane.xlu0 %64 }
 0x13a   :  { %v66_v18 = vmul.f32 0.0078125, %v65_v17 }
 0x13c   :  { %v67_v19 = vadd.f32 1e-06, %v66_v18 }
 0x13e   :  { %626 = vrsqrt.f32 %v67_v19 }
 0x148   :  { %v627_v20 = vpop.eup %626 }
 0x149   :  { %v69_v22 = vmul.f32 %v627_v20, %v61_v8  ;;  %v625_v8 = vld [vmem:[%s881_s8 + $0x38] sm:$0xff]  }
 0x14b   :  { %v76_v24 = vmul.f32 %v479_v21, %v69_v22 }
 0x14d   :  { %v83_v25 = vadd.f32 %v480_v23, %v76_v24  ;;  %v500_v23 = vld [vmem:[%s882_s9] ss:$0 sm:$0xff] }
 0x14f   :  { %v84_v26 = vpack.c.bf16 %v83_v25, %v83_v25 }
 0x151   :  { %553 = vmatmul.mubr.bf16.vlgmr.msra.gmra.mrb[0].mxu0 %v84_v26 }
 0x152   :  { %592 = vmatprep.mubr.msk.bf16.mxu0 %vm688_vm1, %v687_v4  ;;  %577 = vmatpush3.bf16.msra.mxu0 %v618_v0 }
 0x153   :  { %578 = vmatprep.subr.bf16.mxu0 %v687_v4 }
 0x156   :  { %579 = vmatpush3.bf16.msra.mxu0 %v619_v1 }
 0x157   :  { %580 = vmatprep.subr.bf16.mxu0 %v687_v4 }
 0x15a   :  { %581 = vmatpush3.bf16.msra.mxu0 %v620_v2 }
 0x15b   :  { %582 = vmatprep.subr.bf16.mxu0 %v687_v4 }
 0x15e   :  { %583 = vmatpush3.bf16.msra.mxu0 %v621_v3 }
 0x15f   :  { %584 = vmatprep.subr.bf16.mxu0 %v687_v4 }
 0x162   :  { %585 = vmatpush3.bf16.msra.mxu0 %v622_v5 }
 0x163   :  { %586 = vmatprep.subr.bf16.mxu0 %v687_v4 }
 0x166   :  { %587 = vmatpush3.bf16.msra.mxu0 %v623_v6 }
 0x167   :  { %588 = vmatprep.subr.bf16.mxu0 %v687_v4 }
 0x16a   :  { %589 = vmatpush3.bf16.msra.mxu0 %v624_v7 }
 0x16b   :  { %590 = vmatprep.subr.bf16.mxu0 %v687_v4 }
 0x16e   :  { %591 = vmatpush3.bf16.msra.mxu0 %v625_v8 }
 0x224   :  { %v183_v27 = vpop.f32.mrb[0].mxu0 }
 0x225   :  { %v554_v28 = vpop.f32.mrb[1].mxu0  ;;  %v189_v29 = vmul.f32 %v183_v27, %v183_v27 }
 0x226   :  { %v186_v30 = vpop.f32.mrb[2].mxu0 }
 0x227   :  { %v555_v31 = vpop.f32.mrb[3].mxu0  ;;  %v190_v32 = vsel %vm55_vm0, %v189_v29, 0.0 }
 0x228   :  { %191 = vadd.xlane.f32.xlu1 %v190_v32 }
 0x2b5   :  { %v192_v41 = vpop.xlane.xlu1 %191 }
 0x2b6   :  { %628 = vrsqrt.f32 %v192_v41  ;;  %vm195_vm2 = vcmp.eq.f32.partialorder %v192_v41, inf  ;;  %v198_v44 = vand.u32 2147483648, %v192_v41  ;;  %vm197_vm3 = vcmp.eq.f32.partialorder %v192_v41, 0.0 }
 0x2c0   :  { %v629_v42 = vpop.eup %628 }
 0x2c1   :  { %v194_v43 = vmul.f32 %v629_v42, %v192_v41 }
 0x2c3   :  { %v196_v45 = vsel %vm195_vm2, %v192_v41, %v194_v43 }
 0x2c4   :  { %v199_v46 = vsel %vm197_vm3, %v198_v44, %v196_v45 }
 0x2c5   :  { %v200_v47 = vmax.f32 %v199_v46, 1e-12 }
 0x2c7   :  { %630 = vrcp.f32 %v200_v47 }
 0x2d1   :  { %v631_v48 = vpop.eup %630 }
 0x2d2   :  { %v202_v49 = vmul.f32 %v631_v48, %v183_v27 }
 0x2d4   :  { %v203_v50 = vmul.f32 20.0, %v202_v49 }
 0x2d6   :  { %v204_v51 = vpack.c.bf16 %v203_v50, %v203_v50 }
 0x2d8   :  { %573 = vmatmul.mubr.bf16.vlgmr.msra.gmra.mrb[0].mxu1 %v204_v51 }
 0x3ab   :  { %v310_v53 = vpop.f32.mrb[0].mxu1 }
 0x3ac   :  { %v311_v54 = vadd.f32 %v489_v52, %v310_v53  ;;  %v574_v55 = vpop.f32.mrb[1].mxu1 }
 0x3ad   :  { %v313_v56 = vpop.f32.mrb[2].mxu1 }
 0x3ae   :  { %v575_v57 = vpop.f32.mrb[3].mxu1  ;;  %v318_v58 = vsel %vm55_vm0, %v311_v54, 0.0 }
 0x3af   :  { %319 = vadd.xlane.f32.xlu1 %v318_v58 }
 0x43c   :  { %v320_v59 = vpop.xlane.xlu1 %319 }
 0x43d   :  { %v321_v60 = vmul.f32 0.0078125, %v320_v59 }
 0x43f   :  { %v322_v61 = vsub.f32 %v311_v54, %v321_v60 }
 0x441   :  { %v323_v62 = vmul.f32 %v322_v61, %v322_v61 }
 0x443   :  { %v324_v63 = vsel %vm55_vm0, %v323_v62, 0.0 }
 0x444   :  { %325 = vadd.xlane.f32.xlu0 %v324_v63 }
 0x4d1   :  { %v326_v9 = vpop.xlane.xlu0 %325 }
 0x4d2   :  { %v327_v10 = vmul.f32 0.0078125, %v326_v9 }
 0x4d4   :  { %v328_v11 = vadd.f32 1e-05, %v327_v10 }
 0x4d6   :  { %632 = vrsqrt.f32 %v328_v11 }
 0x4e0   :  { %v633_v12 = vpop.eup %632 }
 0x4e1   :  { %v330_v14 = vmul.f32 %v633_v12, %v322_v61 }
 0x4e3   :  { %v337_v16 = vmul.f32 %v498_v13, %v330_v14 }
 0x4e5   :  { %v344_v17 = vadd.f32 %v499_v15, %v337_v16 }
 0x4e7   :  { %v346_v18 = vmul.f32 0.70710677, %v344_v17  ;;  %v345_v19 = vmul.f32 0.5, %v344_v17 }
 0x4e9   :  { %634 = verf.f32 %v346_v18 }
 0x4f3   :  { %v635_v4 = vpop.eup %634 }
 0x4f4   :  { %v348_v20 = vadd.f32 1.0, %v635_v4 }
 0x4f6   :  { %v349_v21 = vmul.f32 %v348_v20, %v345_v19 }
 0x4f8   :  { %v350_v22 = vpack.c.bf16 %v349_v21, %v349_v21 }
 0x4fa   :  { %593 = vmatmul.mubr.bf16.vlgmr.msra.gmra.mrb[4].mxu0 %v350_v22 }
 0x5cd   :  { %v456_v24 = vpop.f32.mrb[4].mxu0 }
 0x5ce   :  { %v457_v25 = vadd.f32 %v500_v23, %v456_v24  ;;  %v594_v26 = vpop.f32.mrb[5].mxu0 }
 0x5cf   :  { %v459_v27 = vpop.f32.mrb[6].mxu0 }
 0x5d0   :  { %v595_v28 = vpop.f32.mrb[7].mxu0  ;;  %463 = vst.msk [vmem:[#allocation5] sm:$0x3] %vm462_vm4, %v457_v25 }
 0x5d1   :  { %669 = shalt.err (!%p666_p12)
}
 0x5d2   :  { %s670_s9 = scalar_lea.hbm %s883_s10, 32 }
 0x5d3   :  { %p671_p13 = scmp.ne.s32.totalorder %s883_s10, %s670_s9  ;;  %p674_p0 = scmp.lt.u32.totalorder %s670_s9, %s883_s10 }
 0x5d5   :  { %p676_p1 = pnand %p674_p0, %p671_p13 }
 0x5d7   :  { %679 = shalt.err (!%p676_p1)
}
 0x5d8   :  { %473 = dma.vmem_to_hbm [thread:$0]  %s471_s24, 32, %s883_s10, [#allocation4]  }
 0x5d9   :  { %682 = dma.done.wait [#allocation4], 32  }
 0x5da   :  { %683 = vsyncadd [#allocation4], 4294967264 }
 0x5db   :  { %477 = vsyncpa [#allocation3], 1 }
 0x5dc   :  { %478 = vsyncpa [#allocation4], 1 }

// kernel: imagebind_audio_forward.4
= control target key start
LH: loop header
LB: loop body
LE: loop exit
PB: predicated region body
PF: predicated region fallthrough
CT: control target
= control target key end

     0   :  { %s5759_s0 = inlined_call_operand.hbm [shape: bf16[2,16,128], index: 0, kind: input, shape index: {}]   ;;  %s5760_s1 = inlined_call_operand.hbm [shape: f32[2,1,128], index: 1, kind: input, shape index: {}]   ;;  %s5761_s2 = inlined_call_operand.hbm [shape: f32[2,1,128], index: 2, kind: input, shape index: {}]   ;;  %s5762_s3 = inlined_call_operand.hbm [shape: bf16[2,128,384], index: 3, kind: input, shape index: {}]   ;;  %s5763_s4 = inlined_call_operand.hbm [shape: f32[2,1,384], index: 4, kind: input, shape index: {}]   ;;  %s5764_s5 = inlined_call_operand.hbm [shape: f32[2,1,128], index: 5, kind: input, shape index: {}]   ;;  %s5765_s6 = inlined_call_operand.hbm [shape: f32[2,1,128], index: 6, kind: input, shape index: {}]   ;;  %s5766_s7 = inlined_call_operand.hbm [shape: bf16[2,128,128], index: 7, kind: input, shape index: {}]   ;;  %s5767_s8 = inlined_call_operand.hbm [shape: f32[2,1,128], index: 8, kind: input, shape index: {}]   ;;  %s5768_s9 = inlined_call_operand.hbm [shape: f32[2,1,128], index: 9, kind: input, shape index: {}]   ;;  %s5769_s10 = inlined_call_operand.hbm [shape: f32[2,1,128], index: 10, kind: input, shape index: {}]   ;;  %s5770_s11 = inlined_call_operand.hbm [shape: bf16[2,128,512], index: 11, kind: input, shape index: {}]   ;;  %s5771_s12 = inlined_call_operand.hbm [shape: f32[2,1,512], index: 12, kind: input, shape index: {}]   ;;  %s5772_s13 = inlined_call_operand.hbm [shape: bf16[2,512,128], index: 13, kind: input, shape index: {}]   ;;  %s5773_s14 = inlined_call_operand.hbm [shape: f32[2,1,128], index: 14, kind: input, shape index: {}]   ;;  %s5774_s15 = inlined_call_operand.hbm [shape: bf16[2,1,128], index: 15, kind: output, shape index: {}]  }
   0x1   :  { %5810 = sst [smem:[#allocation52_spill]] %s5759_s0 }
   0x2   :  { %5811 = sst [smem:[#allocation53_spill]] %s5760_s1 }
   0x3   :  { %5812 = sst [smem:[#allocation54_spill]] %s5761_s2 }
   0x4   :  { %5813 = sst [smem:[#allocation55_spill]] %s5762_s3 }
   0x5   :  { %5814 = sst [smem:[#allocation56_spill]] %s5763_s4 }
   0x6   :  { %5815 = sst [smem:[#allocation57_spill]] %s5764_s5 }
   0x7   :  { %5816 = sst [smem:[#allocation58_spill]] %s5765_s6 }
   0x8   :  { %5817 = sst [smem:[#allocation59_spill]] %s5766_s7 }
   0x9   :  { %5818 = sst [smem:[#allocation60_spill]] %s5767_s8 }
   0xa   :  { %5819 = sst [smem:[#allocation61_spill]] %s5769_s10 }
   0xb   :  { %5820 = sst [smem:[#allocation62_spill]] %s5771_s12 }
   0xc   :  { %5821 = sst [smem:[#allocation63_spill]] %s5773_s14 }
   0xd   :  { %5822 = sst [smem:[#allocation64_spill]] %s5774_s15 }
   0xe   :  { %20 = vsyncpa [#allocation6], 0 }
   0xf   :  { %22 = vsyncpa [#allocation6 + $0x1], 0 }
  0x10   :  { %23 = vsyncpa [#allocation9], 0 }
  0x11   :  { %25 = vsyncpa [#allocation9 + $0x1], 0 }
  0x12   :  { %26 = vsyncpa [#allocation12], 0 }
  0x13   :  { %28 = vsyncpa [#allocation12 + $0x1], 0 }
  0x14   :  { %29 = vsyncpa [#allocation15], 0 }
  0x15   :  { %31 = vsyncpa [#allocation15 + $0x1], 0 }
  0x16   :  { %32 = vsyncpa [#allocation18], 0 }
  0x17   :  { %34 = vsyncpa [#allocation18 + $0x1], 0 }
  0x18   :  { %35 = vsyncpa [#allocation21], 0 }
  0x19   :  { %37 = vsyncpa [#allocation21 + $0x1], 0 }
  0x1a   :  { %38 = vsyncpa [#allocation24], 0 }
  0x1b   :  { %40 = vsyncpa [#allocation24 + $0x1], 0 }
  0x1c   :  { %41 = vsyncpa [#allocation27], 0 }
  0x1d   :  { %43 = vsyncpa [#allocation27 + $0x1], 0 }
  0x1e   :  { %44 = vsyncpa [#allocation7], 0 }
  0x1f   :  { %46 = vsyncpa [#allocation7 + $0x1], 0  ;;  %s4654_s18 = smov 0   ;;  %s4656_s19 = smov 0  }
  0x20   :  { %s4658_s20 = smov 0   ;;  %s4660_s21 = smov 0  }
  0x21   :  { %s4662_s22 = smov 0   ;;  %s4664_s23 = smov 0  }
  0x22   :  { %s4666_s24 = smov 0   ;;  %s4668_s25 = smov 0  }
  0x23   :  { %s4670_s26 = smov 0   ;;  %s4672_s27 = smov 0  }
  0x24   :  { %s4674_s28 = smov 0  }
  0x25 LB: > { %5823 = sst [smem:[#allocation39_spill]] %s4508_s19  ;;  %s4710_s29 = sadd.s32 4294967295, %s4544_s28   ;;  %s4544_s28 = sphi %s4674_s28, %s52_s28   ;;  %s4540_s27 = sphi %s4672_s27, %s5899_s27   ;;  %s4536_s26 = sphi %s4670_s26, %s5898_s26   ;;  %s4532_s25 = sphi %s4668_s25, %s5897_s25   ;;  %s4528_s24 = sphi %s4666_s24, %s5896_s24   ;;  %s4524_s23 = sphi %s4664_s23, %s5895_s23   ;;  %s4520_s22 = sphi %s4662_s22, %s5894_s22   ;;  %s4516_s21 = sphi %s4660_s21, %s5893_s21   ;;  %s4512_s20 = sphi %s4658_s20, %s5889_s20   ;;  %s4508_s19 = sphi %s4656_s19, %s5888_s19   ;;  %s4504_s18 = sphi %s4654_s18, %s5887_s18  }
  0x26   : > { %5824 = sst [smem:[#allocation40_spill]] %s4512_s20  ;;  %s3305_s30 = sadd.s32 4294967294, %s4544_s28  }
  0x27   : > { %5825 = sst [smem:[#allocation41_spill]] %s4516_s21  ;;  %s61_s16 = sadd.s32 1, %s4536_s26 }
  0x28   : > { %5826 = sst [smem:[#allocation42_spill]] %s4528_s24  ;;  %s64_s17 = sadd.s32 1, %s4540_s27 }
  0x29   : > { %5827 = sst [smem:[#allocation43_spill]] %s4532_s25  ;;  %p62_p0 = scmp.ge.s32.totalorder %s61_s16, 2 }
  0x2a   : > { %5828 = sst [smem:[#allocation44_spill]] %s4710_s29  ;;  %s71_s15 = sadd.s32 1, %s4524_s23 }
  0x2b   : > { %p78_p1 = scmp.ne.s32.totalorder %s4524_s23, %s4520_s22  ;;  %p79_p2 = scmp.eq.s32.totalorder %s4544_s28, 0 }
  0x2c   : > { %s5901_s16 = smov (%p62_p0, %s61_s16), 0  ;;  %s5903_s17 = smov (!%p62_p0, %s64_s17), %s4540_s27 }
  0x2d   : > { %5829 = sst [smem:[#allocation45_spill]] %s5901_s16  ;;  %p4727_p3 = por %p79_p2, %p78_p1 }
  0x2e   : > { %p5783_p4 = scmp.ne.s32.totalorder %s4520_s22, %s4516_s21  ;;  %p66_p5 = scmp.ge.s32.totalorder %s5903_s17, 2 }
  0x2f   : > { %s5830_s25 = scalar_select %p4727_p3, 1, 0 }
  0x30   : > { %p85_p6 = scmp.eq.s32.totalorder %s4710_s29, 0  ;;  %s94_s24 = ssub.s32 %s4536_s26, %s5901_s16 }
  0x31   : > { %s97_s14 = sadd.s32 1, %s4512_s20  ;;  %s5905_s17 = smov (%p66_p5, %s5903_s17), 0 }
  0x32   : > { %5831 = sst [smem:[#allocation46_spill]] %s5905_s17  ;;  %p4744_p7 = por %p85_p6, %p5783_p4 }
  0x33   : > { %p95_p8 = scmp.eq.s32.totalorder %s94_s24, 0  ;;  %s68_s10 = ssub.s32 %s4540_s27, %s5905_s17 }
  0x34   : > { %s5832_s12 = scalar_select %p4744_p7, 1, 0 }
  0x35   : > { %p104_p9 = scmp.ne.s32.totalorder %s4512_s20, %s4508_s19  ;;  %p69_p10 = scmp.eq.s32.totalorder %s68_s10, 0 }
  0x36   : > { %p110_p11 = scmp.ne.s32.totalorder %s4508_s19, %s4504_s18  ;;  %p472_p0 = scmp.eq.s32.totalorder %s4710_s29, 3 }
  0x37   : > { %s4755_s8 = scalar_select %p95_p8, %s4512_s20, %s97_s14  }
  0x38   : > { %s4758_s16 = scalar_select %p69_p10, %s4524_s23, %s71_s15  }
  0x39   : > { %5833 = sst [smem:[#allocation47_spill]] %s4755_s8  ;;  %p4762_p12 = por %p104_p9, %p79_p2 }
  0x3a   : > { %5834 = sst [smem:[#allocation48_spill]] %s4758_s16  ;;  %p4768_p13 = por %p110_p11, %p85_p6 }
  0x3b   : > { %p478_p5 = scmp.eq.s32.totalorder %s3305_s30, 3  ;;  %p4776_p4 = por %p472_p0, %p78_p1 }
  0x3c   : > { %s5836_s4 = scalar_select %p4768_p13, 1, 0 }
  0x3d   : > { %s5838_s10 = scalar_select %p4776_p4, 1, 0 }
  0x3e   : > { %5837 = sst [smem:[#allocation49_spill]] %s5836_s4  ;;  %p5840_p8 = scmp.ne.s32.totalorder %s4520_s22, %s4516_s21 }
  0x3f   : > { %5839 = sst [smem:[#allocation50_spill]] %s5838_s10  ;;  %p3307_p2 = scmp.ge.s32.totalorder %s4544_s28, 4 }
  0x40   : > { %p4783_p10 = por %p478_p5, %p5840_p8  ;;  %s4789_s15 = sand.u32 (!%p3307_p2), 1, %s4544_s28  }
  0x41   : > { %494 = sbr.rel (%p3307_p2) target bundleno = 470 (0x1d6), region = 16  ;;  %s4792_s18 = sand.u32 (!%p3307_p2), 1, %s4512_s20  }
  0x42   : > { %s5841_s14 = scalar_select %p4783_p10, 1, 0 }
  0x43   : > { %s4795_s24 = sshll.u32 (!%p3307_p2), %s4536_s26, 4  ;;  %s522_s30 = scalar_lea.vmem (!%p3307_p2), [#allocation8], %s4792_s18 }
  0x44   : > { %5842 = sst [smem:[#allocation51_spill]] %s5841_s14  ;;  %s529_s17 = sshll.u32 (!%p3307_p2), %s522_s30, 4  ;;  %s530_s17 = int_to_ptr.vmem [resolvable:$true] %s529_s17 }
  0x45   : > { %s5843_s1 = sld [smem:[#allocation53_spill]] (!%p3307_p2) }
  0x4b   : > { %s4802_s14 = scalar_lea.hbm %s5843_s1, %s4795_s24  ;;  %s3978_s30 = scalar_lea.hbm %s5843_s1, 32 }
  0x4c   : > { %s3974_s10 = scalar_lea.hbm %s4802_s14, 16  ;;  %p3979_p11 = scmp.lt.u32.totalorder %s4802_s14, %s5843_s1 }
  0x4d   : > { %p3975_p1 = scmp.ne.s32.totalorder %s4802_s14, %s3974_s10  ;;  %p3980_p0 = scmp.lt.u32.totalorder %s3978_s30, %s3974_s10 }
  0x4e   : > { %p3982_p8 = scmp.lt.u32.totalorder %s3974_s10, %s4802_s14 }
  0x4f   : > { %p3976_p6 = pnand %p3975_p1, %p4762_p12  ;;  %p3981_p5 = por %p3980_p0, %p3979_p11 }
  0x51   : > { %p3977_p9 = pneg %p3976_p6  ;;  %p3983_p2 = por %p3982_p8, %p3981_p5 }
  0x53   : > { %p3984_p10 = pnand %p3983_p2, %p3977_p9 }
  0x55   : > { %3987 = shalt.err (!%p3984_p10)
}
  0x56   : > { %s3988_s8 = scalar_lea.vmem %s530_s17, 16  ;;  %s4546_s16 = smov [#allocation8]  }
  0x57   : > { %p3989_p4 = scmp.ne.s32.totalorder %s530_s17, %s3988_s8  ;;  %s3992_s21 = sshll.u32 %s4546_s16, 4  ;;  %s3993_s21 = int_to_ptr.vmem [resolvable:$false] %s3992_s21 }
  0x58   : > { %s3994_s4 = scalar_lea.vmem %s3993_s21, 32  ;;  %p3995_p13 = scmp.lt.s32.totalorder %s530_s17, %s3993_s21 }
  0x59   : > { %p3990_p1 = pnand %p3989_p4, %p4762_p12  ;;  %p3996_p7 = scmp.lt.s32.totalorder %s3994_s4, %s3988_s8 }
  0x5b   : > { %p3991_p6 = pneg %p3990_p1  ;;  %p3997_p3 = por %p3996_p7, %p3995_p13 }
  0x5d   : > { %p3998_p0 = pnand %p3997_p3, %p3991_p6 }
  0x5f   : > { %4001 = shalt.err (!%p3998_p0)
}
  0x60   : > { %s5844_s19 = scalar_lea.sflag [#allocation9], %s4789_s15  ;;  %s3637_s20 = smul.u32 192, %s4792_s18 }
  0x61   : > { %3644 = dma.hbm_to_vmem [thread:$0]  (%p4762_p12), %s4802_s14, 16, %s530_s17, %s5844_s19  }
  0x62   : > { %s3638_s29 = smul.u32 3072, %s4536_s26  ;;  %s5845_s3 = sld [smem:[#allocation55_spill]] }
  0x63   : > { %s557_s8 = scalar_lea.vmem [#allocation11], %s3637_s20  ;;  %s5799_s4 = scalar_lea.sflag [#allocation12], %s4789_s15 }
  0x64   : > { %s564_s16 = sshll.u32 %s557_s8, 4  ;;  %s4831_s16 = int_to_ptr.vmem [resolvable:$true] %s564_s16 }
  0x68   : > { %s4829_s21 = scalar_lea.hbm %s5845_s3, %s3638_s29  ;;  %s4006_s19 = scalar_lea.hbm %s5845_s3, 6144 }
  0x69   : > { %s4002_s1 = scalar_lea.hbm %s4829_s21, 3072  ;;  %p4007_p13 = scmp.lt.u32.totalorder %s4829_s21, %s5845_s3 }
  0x6a   : > { %p4003_p3 = scmp.ne.s32.totalorder %s4829_s21, %s4002_s1  ;;  %p4008_p10 = scmp.lt.u32.totalorder %s4006_s19, %s4002_s1 }
  0x6b   : > { %p4010_p11 = scmp.lt.u32.totalorder %s4002_s1, %s4829_s21 }
  0x6c   : > { %p4004_p4 = pnand %p4003_p3, %p4762_p12  ;;  %p4009_p9 = por %p4008_p10, %p4007_p13 }
  0x6e   : > { %p4005_p7 = pneg %p4004_p4  ;;  %p4011_p5 = por %p4010_p11, %p4009_p9 }
  0x70   : > { %p4012_p8 = pnand %p4011_p5, %p4005_p7 }
  0x72   : > { %4015 = shalt.err (!%p4012_p8)
}
  0x73   : > { %s4016_s20 = scalar_lea.vmem %s4831_s16, 3072  ;;  %s4547_s30 = smov [#allocation11]  }
  0x74   : > { %p4017_p2 = scmp.ne.s32.totalorder %s4831_s16, %s4016_s20  ;;  %s4020_s8 = sshll.u32 %s4547_s30, 4  ;;  %s4021_s8 = int_to_ptr.vmem [resolvable:$false] %s4020_s8 }
  0x75   : > { %s4022_s17 = scalar_lea.vmem %s4021_s8, 6144  ;;  %p4023_p0 = scmp.lt.s32.totalorder %s4831_s16, %s4021_s8 }
  0x76   : > { %p4018_p1 = pnand %p4017_p2, %p4762_p12  ;;  %p4024_p3 = scmp.lt.s32.totalorder %s4022_s17, %s4016_s20 }
  0x78   : > { %p4019_p6 = pneg %p4018_p1  ;;  %p4025_p4 = por %p4024_p3, %p4023_p0 }
  0x7a   : > { %p4026_p13 = pnand %p4025_p4, %p4019_p6 }
  0x7c   : > { %4029 = shalt.err (!%p4026_p13)
}
  0x7d   : > { %s4548_s1 = smov 192   ;;  %s4549_s14 = smov 12  }
  0x7e   : > { %3646 = dma.hbm_to_vmem [thread:$0]  (%p4762_p12), %s4829_s21, 3072, %s4831_s16, %s5799_s4, %s4548_s1, %s4548_s1, %s4549_s14  }
  0x7f   : > { %s5846_s5 = sld [smem:[#allocation57_spill]]  ;;  %s596_s20 = scalar_lea.vmem [#allocation14], %s4792_s18 }
  0x80   : > { %s603_s30 = sshll.u32 %s596_s20, 4  ;;  %s5798_s8 = scalar_lea.sflag [#allocation15], %s4789_s15  ;;  %s604_s30 = int_to_ptr.vmem [resolvable:$true] %s603_s30 }
  0x85   : > { %s4861_s10 = scalar_lea.hbm %s5846_s5, %s4795_s24  ;;  %s4034_s16 = scalar_lea.hbm %s5846_s5, 32 }
  0x86   : > { %s4030_s17 = scalar_lea.hbm %s4861_s10, 16  ;;  %p4035_p11 = scmp.lt.u32.totalorder %s4861_s10, %s5846_s5 }
  0x87   : > { %p4031_p7 = scmp.ne.s32.totalorder %s4861_s10, %s4030_s17  ;;  %p4036_p5 = scmp.lt.u32.totalorder %s4034_s16, %s4030_s17 }
  0x88   : > { %p4038_p2 = scmp.lt.u32.totalorder %s4030_s17, %s4861_s10 }
  0x89   : > { %p4032_p10 = pnand %p4031_p7, %p4762_p12  ;;  %p4037_p8 = por %p4036_p5, %p4035_p11 }
  0x8b   : > { %p4033_p9 = pneg %p4032_p10  ;;  %p4039_p1 = por %p4038_p2, %p4037_p8 }
  0x8d   : > { %p4040_p6 = pnand %p4039_p1, %p4033_p9 }
  0x8f   : > { %4043 = shalt.err (!%p4040_p6)
}
  0x90   : > { %s4044_s19 = scalar_lea.vmem %s604_s30, 16  ;;  %s4550_s29 = smov [#allocation14]  }
  0x91   : > { %p4045_p0 = scmp.ne.s32.totalorder %s604_s30, %s4044_s19  ;;  %s4048_s20 = sshll.u32 %s4550_s29, 4  ;;  %s4049_s20 = int_to_ptr.vmem [resolvable:$false] %s4048_s20 }
  0x92   : > { %s4050_s3 = scalar_lea.vmem %s4049_s20, 32  ;;  %p4051_p13 = scmp.lt.s32.totalorder %s604_s30, %s4049_s20 }
  0x93   : > { %p4046_p3 = pnand %p4045_p0, %p4762_p12  ;;  %p4052_p7 = scmp.lt.s32.totalorder %s4050_s3, %s4044_s19 }
  0x95   : > { %p4047_p4 = pneg %p4046_p3  ;;  %p4053_p10 = por %p4052_p7, %p4051_p13 }
  0x97   : > { %p4054_p5 = pnand %p4053_p10, %p4047_p4 }
  0x99   : > { %4057 = shalt.err (!%p4054_p5)
}
  0x9a   : > { %3648 = dma.hbm_to_vmem [thread:$0]  (%p4762_p12), %s4861_s10, 16, %s604_s30, %s5798_s8  }
  0x9b   : > { %s3317_s17 = sshll.u32 %s4792_s18, 6  ;;  %s3463_s21 = sshll.u32 %s4536_s26, 10 }
  0x9c   : > { %s5847_s7 = sld [smem:[#allocation59_spill]]  ;;  %s631_s19 = scalar_lea.vmem [#allocation17], %s3317_s17 }
  0x9d   : > { %s638_s29 = sshll.u32 %s631_s19, 4  ;;  %s5800_s20 = scalar_lea.sflag [#allocation18], %s4789_s15  ;;  %s4891_s29 = int_to_ptr.vmem [resolvable:$true] %s638_s29 }
  0xa2   : > { %s4889_s14 = scalar_lea.hbm %s5847_s7, %s3463_s21  ;;  %s4062_s16 = scalar_lea.hbm %s5847_s7, 2048 }
  0xa3   : > { %s4058_s3 = scalar_lea.hbm %s4889_s14, 1024  ;;  %p4063_p2 = scmp.lt.u32.totalorder %s4889_s14, %s5847_s7 }
  0xa4   : > { %p4059_p9 = scmp.ne.s32.totalorder %s4889_s14, %s4058_s3  ;;  %p4064_p1 = scmp.lt.u32.totalorder %s4062_s16, %s4058_s3 }
  0xa5   : > { %p4066_p0 = scmp.lt.u32.totalorder %s4058_s3, %s4889_s14 }
  0xa6   : > { %p4060_p11 = pnand %p4059_p9, %p4762_p12  ;;  %p4065_p6 = por %p4064_p1, %p4063_p2 }
  0xa8   : > { %p4061_p8 = pneg %p4060_p11  ;;  %p4067_p3 = por %p4066_p0, %p4065_p6 }
  0xaa   : > { %p4068_p4 = pnand %p4067_p3, %p4061_p8 }
  0xac   : > { %4071 = shalt.err (!%p4068_p4)
}
  0xad   : > { %s4072_s17 = scalar_lea.vmem %s4891_s29, 1024  ;;  %s4551_s19 = smov [#allocation17]  }
  0xae   : > { %p4073_p13 = scmp.ne.s32.totalorder %s4891_s29, %s4072_s17  ;;  %s4076_s10 = sshll.u32 %s4551_s19, 4  ;;  %s4077_s10 = int_to_ptr.vmem [resolvable:$false] %s4076_s10 }
  0xaf   : > { %s4078_s30 = scalar_lea.vmem %s4077_s10, 2048  ;;  %p4079_p5 = scmp.lt.s32.totalorder %s4891_s29, %s4077_s10 }
  0xb0   : > { %p4074_p7 = pnand %p4073_p13, %p4762_p12  ;;  %p4080_p9 = scmp.lt.s32.totalorder %s4078_s30, %s4072_s17 }
  0xb2   : > { %p4075_p10 = pneg %p4074_p7  ;;  %p4081_p11 = por %p4080_p9, %p4079_p5 }
  0xb4   : > { %p4082_p2 = pnand %p4081_p11, %p4075_p10 }
  0xb6   : > { %4085 = shalt.err (!%p4082_p2)
}
  0xb7   : > { %s5801_s3 = smov 64   ;;  %s5804_s16 = smov 4  }
  0xb8   : > { %3650 = dma.hbm_to_vmem [thread:$0]  (%p4762_p12), %s4889_s14, 1024, %s4891_s29, %s5800_s20, %s5801_s3, %s5801_s3, %s5804_s16  }
  0xb9   : > { %s4924_s17 = scalar_lea.hbm %s5768_s9, %s4795_s24  ;;  %s668_s19 = scalar_lea.vmem [#allocation20], %s4792_s18 }
  0xba   : > { %s675_s10 = sshll.u32 %s668_s19, 4  ;;  %s3323_s30 = sshll.u32 %s4792_s18, 8  ;;  %s4927_s10 = int_to_ptr.vmem [resolvable:$true] %s675_s10 }
  0xbb   : > { %s5803_s8 = scalar_lea.sflag [#allocation21], %s4789_s15  ;;  %s4086_s4 = scalar_lea.hbm %s4924_s17, 16 }
  0xbc   : > { %p4087_p8 = scmp.ne.s32.totalorder %s4924_s17, %s4086_s4  ;;  %s4090_s21 = scalar_lea.hbm %s5768_s9, 32 }
  0xbd   : > { %p4091_p0 = scmp.lt.u32.totalorder %s4924_s17, %s5768_s9  ;;  %p4092_p3 = scmp.lt.u32.totalorder %s4090_s21, %s4086_s4 }
  0xbe   : > { %p4088_p1 = pnand %p4087_p8, %p4762_p12  ;;  %p4094_p13 = scmp.lt.u32.totalorder %s4086_s4, %s4924_s17 }
  0xbf   : > { %p4093_p4 = por %p4092_p3, %p4091_p0 }
  0xc0   : > { %p4089_p6 = pneg %p4088_p1 }
  0xc1   : > { %p4095_p7 = por %p4094_p13, %p4093_p4 }
  0xc3   : > { %p4096_p10 = pnand %p4095_p7, %p4089_p6 }
  0xc5   : > { %4099 = shalt.err (!%p4096_p10)
}
  0xc6   : > { %s4100_s19 = scalar_lea.vmem %s4927_s10, 16  ;;  %s4554_s14 = smov [#allocation20]  }
  0xc7   : > { %p4101_p5 = scmp.ne.s32.totalorder %s4927_s10, %s4100_s19  ;;  %s4104_s29 = sshll.u32 %s4554_s14, 4  ;;  %s4105_s29 = int_to_ptr.vmem [resolvable:$false] %s4104_s29 }
  0xc8   : > { %s4106_s20 = scalar_lea.vmem %s4105_s29, 32  ;;  %p4107_p2 = scmp.lt.s32.totalorder %s4927_s10, %s4105_s29 }
  0xc9   : > { %p4102_p9 = pnand %p4101_p5, %p4762_p12  ;;  %p4108_p8 = scmp.lt.s32.totalorder %s4106_s20, %s4100_s19 }
  0xcb   : > { %p4103_p11 = pneg %p4102_p9  ;;  %p4109_p1 = por %p4108_p8, %p4107_p2 }
  0xcd   : > { %p4110_p0 = pnand %p4109_p1, %p4103_p11 }
  0xcf   : > { %4113 = shalt.err (!%p4110_p0)
}
  0xd0   : > { %3652 = dma.hbm_to_vmem [thread:$0]  (%p4762_p12), %s4924_s17, 16, %s4927_s10, %s5803_s8  }
  0xd1   : > { %s3464_s4 = sshll.u32 %s4536_s26, 12  ;;  %s703_s14 = scalar_lea.vmem [#allocation23], %s3323_s30 }
  0xd2   : > { %s4960_s19 = scalar_lea.hbm %s5770_s11, %s3464_s4  ;;  %s710_s29 = sshll.u32 %s703_s14, 4  ;;  %s4964_s29 = int_to_ptr.vmem [resolvable:$true] %s710_s29 }
  0xd3   : > { %s5806_s20 = scalar_lea.sflag [#allocation24], %s4789_s15  ;;  %s4114_s3 = scalar_lea.hbm %s4960_s19, 4096 }
  0xd4   : > { %p4115_p6 = scmp.ne.s32.totalorder %s4960_s19, %s4114_s3  ;;  %s4118_s21 = scalar_lea.hbm %s5770_s11, 8192 }
  0xd5   : > { %p4119_p13 = scmp.lt.u32.totalorder %s4960_s19, %s5770_s11  ;;  %p4120_p7 = scmp.lt.u32.totalorder %s4118_s21, %s4114_s3 }
  0xd6   : > { %p4116_p3 = pnand %p4115_p6, %p4762_p12  ;;  %p4122_p5 = scmp.lt.u32.totalorder %s4114_s3, %s4960_s19 }
  0xd7   : > { %p4121_p10 = por %p4120_p7, %p4119_p13 }
  0xd8   : > { %p4117_p4 = pneg %p4116_p3 }
  0xd9   : > { %p4123_p9 = por %p4122_p5, %p4121_p10 }
  0xdb   : > { %p4124_p11 = pnand %p4123_p9, %p4117_p4 }
  0xdd   : > { %4127 = shalt.err (!%p4124_p11)
}
  0xde   : > { %s4128_s14 = scalar_lea.vmem %s4964_s29, 4096  ;;  %s4555_s17 = smov [#allocation23]  }
  0xdf   : > { %p4129_p2 = scmp.ne.s32.totalorder %s4964_s29, %s4128_s14  ;;  %s4132_s10 = sshll.u32 %s4555_s17, 4  ;;  %s4133_s10 = int_to_ptr.vmem [resolvable:$false] %s4132_s10 }
  0xe0   : > { %s4134_s8 = scalar_lea.vmem %s4133_s10, 8192  ;;  %p4135_p0 = scmp.lt.s32.totalorder %s4964_s29, %s4133_s10 }
  0xe1   : > { %p4130_p8 = pnand %p4129_p2, %p4762_p12  ;;  %p4136_p6 = scmp.lt.s32.totalorder %s4134_s8, %s4128_s14 }
  0xe3   : > { %p4131_p1 = pneg %p4130_p8  ;;  %p4137_p3 = por %p4136_p6, %p4135_p0 }
  0xe5   : > { %p4138_p13 = pnand %p4137_p3, %p4131_p1 }
  0xe7   : > { %4141 = shalt.err (!%p4138_p13)
}
  0xe8   : > { %s4556_s3 = smov 256   ;;  %s4557_s21 = smov 16  }
  0xe9   : > { %3654 = dma.hbm_to_vmem [thread:$0]  (%p4762_p12), %s4960_s19, 4096, %s4964_s29, %s5806_s20, %s4556_s3, %s4556_s3, %s4557_s21  }
  0xea   : > { %s4995_s17 = scalar_lea.hbm %s5772_s13, %s3464_s4  ;;  %s743_s10 = scalar_lea.vmem [#allocation26], %s3323_s30 }
  0xeb   : > { %s750_s8 = sshll.u32 %s743_s10, 4  ;;  %s498_s16 = sand.u32 1, %s4524_s23   ;;  %s5000_s8 = int_to_ptr.vmem [resolvable:$true] %s750_s8 }
  0xec   : > { %s5807_s5 = scalar_lea.sflag [#allocation27], %s4789_s15  ;;  %s4142_s7 = scalar_lea.hbm %s4995_s17, 4096 }
  0xed   : > { %p4143_p4 = scmp.ne.s32.totalorder %s4995_s17, %s4142_s7  ;;  %s4146_s4 = scalar_lea.hbm %s5772_s13, 8192 }
  0xee   : > { %p4147_p5 = scmp.lt.u32.totalorder %s4995_s17, %s5772_s13  ;;  %p4148_p9 = scmp.lt.u32.totalorder %s4146_s4, %s4142_s7 }
  0xef   : > { %p4144_p7 = pnand %p4143_p4, %p4762_p12  ;;  %p4150_p2 = scmp.lt.u32.totalorder %s4142_s7, %s4995_s17 }
  0xf0   : > { %p4149_p11 = por %p4148_p9, %p4147_p5 }
  0xf1   : > { %p4145_p10 = pneg %p4144_p7 }
  0xf2   : > { %p4151_p8 = por %p4150_p2, %p4149_p11 }
  0xf4   : > { %p4152_p1 = pnand %p4151_p8, %p4145_p10 }
  0xf6   : > { %4155 = shalt.err (!%p4152_p1)
}
  0xf7   : > { %s4156_s30 = scalar_lea.vmem %s5000_s8, 4096  ;;  %s4558_s1 = smov [#allocation26]  }
  0xf8   : > { %p4157_p0 = scmp.ne.s32.totalorder %s5000_s8, %s4156_s30  ;;  %s4160_s14 = sshll.u32 %s4558_s1, 4  ;;  %s4161_s14 = int_to_ptr.vmem [resolvable:$false] %s4160_s14 }
  0xf9   : > { %s4162_s10 = scalar_lea.vmem %s4161_s14, 8192  ;;  %p4163_p13 = scmp.lt.s32.totalorder %s5000_s8, %s4161_s14 }
  0xfa   : > { %p4158_p6 = pnand %p4157_p0, %p4762_p12  ;;  %p4164_p4 = scmp.lt.s32.totalorder %s4162_s10, %s4156_s30 }
  0xfc   : > { %p4159_p3 = pneg %p4158_p6  ;;  %p4165_p7 = por %p4164_p4, %p4163_p13 }
  0xfe   : > { %p4166_p5 = pnand %p4165_p7, %p4159_p3 }
 0x100   : > { %4169 = shalt.err (!%p4166_p5)
}
 0x101   : > { %s5848_s7 = smov 4   ;;  %s5849_s19 = smov 64  }
 0x102   : > { %3656 = dma.hbm_to_vmem [thread:$0]  (%p4762_p12), %s4995_s17, 4096, %s5000_s8, %s5807_s5, %s5849_s19, %s5849_s19, %s5848_s7  }
 0x103   : > { %s3308_s29 = sshll.u32 %s498_s16, 3  ;;  %s3462_s4 = sshll.u32 %s4540_s27, 7 }
 0x104   : > { %s5850_s0 = sld [smem:[#allocation52_spill]]  ;;  %s502_s1 = scalar_lea.vmem [#allocation5], %s3308_s29 }
 0x105   : > { %s509_s14 = sshll.u32 %s502_s1, 4  ;;  %s5851_s2 = sld [smem:[#allocation54_spill]]  ;;  %s5037_s14 = int_to_ptr.vmem [resolvable:$true] %s509_s14 }
 0x106   : > { %s5047_s8 = scalar_lea.sflag [#allocation6], %s498_s16  ;;  %p5852_p9 = scmp.ne.s32.totalorder %s5830_s25, 0 }
 0x10a   : > { %s5035_s30 = scalar_lea.hbm %s5850_s0, %s3462_s4  ;;  %s4174_s29 = scalar_lea.hbm %s5850_s0, 256 }
 0x10b   : > { %s5043_s17 = scalar_lea.hbm %s5851_s2, %s4795_s24  ;;  %s4170_s5 = scalar_lea.hbm %s5035_s30, 128 }
 0x10c   : > { %p4171_p10 = scmp.ne.s32.totalorder %s5035_s30, %s4170_s5  ;;  %p4175_p8 = scmp.lt.u32.totalorder %s5035_s30, %s5850_s0 }
 0x10d   : > { %p4176_p1 = scmp.lt.u32.totalorder %s4174_s29, %s4170_s5  ;;  %p4178_p6 = scmp.lt.u32.totalorder %s4170_s5, %s5035_s30 }
 0x10e   : > { %p4172_p11 = pnand %p4171_p10, %p5852_p9 }
 0x10f   : > { %p4177_p0 = por %p4176_p1, %p4175_p8 }
 0x110   : > { %p4173_p2 = pneg %p4172_p11 }
 0x111   : > { %p4179_p3 = por %p4178_p6, %p4177_p0 }
 0x113   : > { %p4180_p13 = pnand %p4179_p3, %p4173_p2 }
 0x115   : > { %4183 = shalt.err (!%p4180_p13)
}
 0x116   : > { %s4184_s16 = scalar_lea.vmem %s5037_s14, 128  ;;  %s4559_s20 = smov [#allocation5]  }
 0x117   : > { %p4185_p4 = scmp.ne.s32.totalorder %s5037_s14, %s4184_s16  ;;  %s4188_s10 = sshll.u32 %s4559_s20, 4  ;;  %s4189_s10 = int_to_ptr.vmem [resolvable:$false] %s4188_s10 }
 0x118   : > { %s4190_s4 = scalar_lea.vmem %s4189_s10, 256  ;;  %p4191_p10 = scmp.lt.s32.totalorder %s5037_s14, %s4189_s10 }
 0x119   : > { %p4186_p7 = pnand %p4185_p4, %p5852_p9  ;;  %p4192_p11 = scmp.lt.s32.totalorder %s4190_s4, %s4184_s16 }
 0x11b   : > { %p4187_p5 = pneg %p4186_p7  ;;  %p4193_p8 = por %p4192_p11, %p4191_p10 }
 0x11d   : > { %p4194_p1 = pnand %p4193_p8, %p4187_p5 }
 0x11f   : > { %4197 = shalt.err (!%p4194_p1)
}
 0x120   : > { %3643 = dma.hbm_to_vmem [thread:$0]  (%p5852_p9), %s5035_s30, 128, %s5037_s14, %s5047_s8, %s5849_s19, %s5849_s19, %s5848_s7  }
 0x121   : > { %s539_s5 = scalar_lea.vmem [#allocation10], %s4792_s18  ;;  %s3639_s29 = smul.u32 3, %s4792_s18 }
 0x122   : > { %s546_s3 = sshll.u32 %s539_s5, 4  ;;  %s3640_s25 = smul.u32 48, %s4536_s26  ;;  %s547_s3 = int_to_ptr.vmem [resolvable:$true] %s546_s3 }
 0x123   : > { %s4198_s21 = scalar_lea.hbm %s5043_s17, 16  ;;  %s4202_s20 = scalar_lea.hbm %s5851_s2, 32 }
 0x124   : > { %p4199_p2 = scmp.ne.s32.totalorder %s5043_s17, %s4198_s21  ;;  %p4203_p3 = scmp.lt.u32.totalorder %s5043_s17, %s5851_s2 }
 0x125   : > { %p4204_p13 = scmp.lt.u32.totalorder %s4202_s20, %s4198_s21  ;;  %p4206_p4 = scmp.lt.u32.totalorder %s4198_s21, %s5043_s17 }
 0x126   : > { %p4200_p0 = pnand %p4199_p2, %p4762_p12 }
 0x127   : > { %p4205_p9 = por %p4204_p13, %p4203_p3 }
 0x128   : > { %p4201_p6 = pneg %p4200_p0 }
 0x129   : > { %p4207_p7 = por %p4206_p4, %p4205_p9 }
 0x12b   : > { %p4208_p5 = pnand %p4207_p7, %p4201_p6 }
 0x12d   : > { %4211 = shalt.err (!%p4208_p5)
}
 0x12e   : > { %s4212_s7 = scalar_lea.vmem %s547_s3, 16  ;;  %s4560_s19 = smov [#allocation10]  }
 0x12f   : > { %p4213_p10 = scmp.ne.s32.totalorder %s547_s3, %s4212_s7  ;;  %s4216_s30 = sshll.u32 %s4560_s19, 4  ;;  %s4217_s30 = int_to_ptr.vmem [resolvable:$false] %s4216_s30 }
 0x130   : > { %s4218_s14 = scalar_lea.vmem %s4217_s30, 32  ;;  %p4219_p1 = scmp.lt.s32.totalorder %s547_s3, %s4217_s30 }
 0x131   : > { %p4214_p11 = pnand %p4213_p10, %p4762_p12  ;;  %p4220_p2 = scmp.lt.s32.totalorder %s4218_s14, %s4212_s7 }
 0x133   : > { %p4215_p8 = pneg %p4214_p11  ;;  %p4221_p0 = por %p4220_p2, %p4219_p1 }
 0x135   : > { %p4222_p3 = pnand %p4221_p0, %p4215_p8 }
 0x137   : > { %4225 = shalt.err (!%p4222_p3)
}
 0x138   : > { %s5853_s8 = scalar_lea.sflag [#allocation9], %s4789_s15  ;;  %s5854_s1 = sld [smem:[#allocation56_spill]] }
 0x139   : > { %3645 = dma.hbm_to_vmem [thread:$0]  (%p4762_p12), %s5043_s17, 16, %s547_s3, %s5853_s8  }
 0x13a   : > { %s578_s20 = scalar_lea.vmem [#allocation13], %s3639_s29  ;;  %s5855_s19 = sld [smem:[#allocation58_spill]] }
 0x13b   : > { %s586_s10 = sshll.u32 %s578_s20, 4  ;;  %s587_s10 = int_to_ptr.vmem [resolvable:$true] %s586_s10 }
 0x13e   : > { %s5099_s16 = scalar_lea.hbm %s5854_s1, %s3640_s25  ;;  %s4230_s25 = scalar_lea.hbm %s5854_s1, 96 }
 0x13f   : > { %s4226_s0 = scalar_lea.hbm %s5099_s16, 48  ;;  %p4231_p4 = scmp.lt.u32.totalorder %s5099_s16, %s5854_s1 }
 0x140   : > { %s5856_s30 = smov %s5855_s19  ;;  %s5107_s14 = scalar_lea.hbm %s5855_s19, %s4795_s24 }
 0x141   : > { %p4227_p6 = scmp.ne.s32.totalorder %s5099_s16, %s4226_s0  ;;  %p4232_p7 = scmp.lt.u32.totalorder %s4230_s25, %s4226_s0 }
 0x142   : > { %p4234_p10 = scmp.lt.u32.totalorder %s4226_s0, %s5099_s16 }
 0x143   : > { %p4228_p13 = pnand %p4227_p6, %p4762_p12  ;;  %p4233_p5 = por %p4232_p7, %p4231_p4 }
 0x145   : > { %p4229_p9 = pneg %p4228_p13  ;;  %p4235_p11 = por %p4234_p10, %p4233_p5 }
 0x147   : > { %p4236_p8 = pnand %p4235_p11, %p4229_p9 }
 0x149   : > { %4239 = shalt.err (!%p4236_p8)
}
 0x14a   : > { %s4240_s29 = scalar_lea.vmem %s587_s10, 48  ;;  %s4561_s21 = smov [#allocation13]  }
 0x14b   : > { %p4241_p1 = scmp.ne.s32.totalorder %s587_s10, %s4240_s29  ;;  %s4244_s20 = sshll.u32 %s4561_s21, 4  ;;  %s4245_s20 = int_to_ptr.vmem [resolvable:$false] %s4244_s20 }
 0x14c   : > { %s4246_s4 = scalar_lea.vmem %s4245_s20, 96  ;;  %p4247_p3 = scmp.lt.s32.totalorder %s587_s10, %s4245_s20 }
 0x14d   : > { %p4242_p2 = pnand %p4241_p1, %p4762_p12  ;;  %p4248_p6 = scmp.lt.s32.totalorder %s4246_s4, %s4240_s29 }
 0x14f   : > { %p4243_p0 = pneg %p4242_p2  ;;  %p4249_p13 = por %p4248_p6, %p4247_p3 }
 0x151   : > { %p4250_p4 = pnand %p4249_p13, %p4243_p0 }
 0x153   : > { %4253 = shalt.err (!%p4250_p4)
}
 0x154   : > { %s5857_s0 = scalar_lea.sflag [#allocation12], %s4789_s15  ;;  %s613_s7 = scalar_lea.vmem [#allocation16], %s4792_s18 }
 0x155   : > { %3647 = dma.hbm_to_vmem [thread:$0]  (%p4762_p12), %s5099_s16, 48, %s587_s10, %s5857_s0  }
 0x156   : > { %s620_s19 = sshll.u32 %s613_s7, 4  ;;  %s5858_s25 = sld [smem:[#allocation60_spill]]  ;;  %s621_s19 = int_to_ptr.vmem [resolvable:$true] %s620_s19 }
 0x157   : > { %s4254_s29 = scalar_lea.hbm %s5107_s14, 16  ;;  %s4258_s4 = scalar_lea.hbm %s5856_s30, 32 }
 0x158   : > { %p4255_p9 = scmp.ne.s32.totalorder %s5107_s14, %s4254_s29  ;;  %p4259_p10 = scmp.lt.u32.totalorder %s5107_s14, %s5856_s30 }
 0x159   : > { %p4260_p11 = scmp.lt.u32.totalorder %s4258_s4, %s4254_s29  ;;  %p4262_p1 = scmp.lt.u32.totalorder %s4254_s29, %s5107_s14 }
 0x15a   : > { %p4256_p7 = pnand %p4255_p9, %p4762_p12 }
 0x15b   : > { %p4261_p8 = por %p4260_p11, %p4259_p10 }
 0x15c   : > { %s5859_s8 = smov %s5858_s25  ;;  %s5133_s5 = scalar_lea.hbm %s5858_s25, %s4795_s24 }
 0x15d   : > { %p4257_p5 = pneg %p4256_p7  ;;  %p4263_p2 = por %p4262_p1, %p4261_p8 }
 0x15f   : > { %p4264_p0 = pnand %p4263_p2, %p4257_p5 }
 0x161   : > { %4267 = shalt.err (!%p4264_p0)
}
 0x162   : > { %s4268_s16 = scalar_lea.vmem %s621_s19, 16  ;;  %s4562_s10 = smov [#allocation16]  }
 0x163   : > { %p4269_p3 = scmp.ne.s32.totalorder %s621_s19, %s4268_s16  ;;  %s4272_s0 = sshll.u32 %s4562_s10, 4  ;;  %s4273_s0 = int_to_ptr.vmem [resolvable:$false] %s4272_s0 }
 0x164   : > { %s4274_s7 = scalar_lea.vmem %s4273_s0, 32  ;;  %p4275_p4 = scmp.lt.s32.totalorder %s621_s19, %s4273_s0 }
 0x165   : > { %p4270_p6 = pnand %p4269_p3, %p4762_p12  ;;  %p4276_p9 = scmp.lt.s32.totalorder %s4274_s7, %s4268_s16 }
 0x167   : > { %p4271_p13 = pneg %p4270_p6  ;;  %p4277_p7 = por %p4276_p9, %p4275_p4 }
 0x169   : > { %p4278_p10 = pnand %p4277_p7, %p4271_p13 }
 0x16b   : > { %4281 = shalt.err (!%p4278_p10)
}
 0x16c   : > { %s5860_s2 = scalar_lea.sflag [#allocation15], %s4789_s15  ;;  %s651_s1 = scalar_lea.vmem [#allocation19], %s4792_s18 }
 0x16d   : > { %3649 = dma.hbm_to_vmem [thread:$0]  (%p4762_p12), %s5107_s14, 16, %s621_s19, %s5860_s2  }
 0x16e   : > { %s658_s17 = sshll.u32 %s651_s1, 4  ;;  %s5861_s29 = sld [smem:[#allocation61_spill]]  ;;  %s659_s17 = int_to_ptr.vmem [resolvable:$true] %s658_s17 }
 0x16f   : > { %s4282_s20 = scalar_lea.hbm %s5133_s5, 16  ;;  %s4286_s10 = scalar_lea.hbm %s5859_s8, 32 }
 0x170   : > { %p4283_p5 = scmp.ne.s32.totalorder %s5133_s5, %s4282_s20  ;;  %p4287_p1 = scmp.lt.u32.totalorder %s5133_s5, %s5859_s8 }
 0x171   : > { %p4288_p2 = scmp.lt.u32.totalorder %s4286_s10, %s4282_s20  ;;  %p4290_p3 = scmp.lt.u32.totalorder %s4282_s20, %s5133_s5 }
 0x172   : > { %p4284_p11 = pnand %p4283_p5, %p4762_p12 }
 0x173   : > { %p4289_p0 = por %p4288_p2, %p4287_p1 }
 0x174   : > { %s5159_s21 = scalar_lea.hbm %s5861_s29, %s4795_s24  ;;  %p4285_p8 = pneg %p4284_p11 }
 0x175   : > { %p4291_p6 = por %p4290_p3, %p4289_p0 }
 0x177   : > { %p4292_p13 = pnand %p4291_p6, %p4285_p8 }
 0x179   : > { %4295 = shalt.err (!%p4292_p13)
}
 0x17a   : > { %s4296_s14 = scalar_lea.vmem %s659_s17, 16  ;;  %s4563_s19 = smov [#allocation19]  }
 0x17b   : > { %p4297_p4 = scmp.ne.s32.totalorder %s659_s17, %s4296_s14  ;;  %s4300_s2 = sshll.u32 %s4563_s19, 4  ;;  %s4301_s2 = int_to_ptr.vmem [resolvable:$false] %s4300_s2 }
 0x17c   : > { %s4302_s1 = scalar_lea.vmem %s4301_s2, 32  ;;  %p4303_p10 = scmp.lt.s32.totalorder %s659_s17, %s4301_s2 }
 0x17d   : > { %p4298_p9 = pnand %p4297_p4, %p4762_p12  ;;  %p4304_p5 = scmp.lt.s32.totalorder %s4302_s1, %s4296_s14 }
 0x17f   : > { %p4299_p7 = pneg %p4298_p9  ;;  %p4305_p11 = por %p4304_p5, %p4303_p10 }
 0x181   : > { %p4306_p1 = pnand %p4305_p11, %p4299_p7 }
 0x183   : > { %4309 = shalt.err (!%p4306_p1)
}
 0x184   : > { %s5862_s3 = scalar_lea.sflag [#allocation18], %s4789_s15  ;;  %s685_s25 = scalar_lea.vmem [#allocation22], %s4792_s18 }
 0x185   : > { %3651 = dma.hbm_to_vmem [thread:$0]  (%p4762_p12), %s5133_s5, 16, %s659_s17, %s5862_s3  }
 0x186   : > { %s692_s20 = sshll.u32 %s685_s25, 4  ;;  %s3326_s4 = sshll.u32 %s4792_s18, 2  ;;  %s693_s20 = int_to_ptr.vmem [resolvable:$true] %s692_s20 }
 0x187   : > { %s4310_s16 = scalar_lea.hbm %s5159_s21, 16  ;;  %s4314_s7 = scalar_lea.hbm %s5861_s29, 32 }
 0x188   : > { %p4311_p8 = scmp.ne.s32.totalorder %s5159_s21, %s4310_s16  ;;  %p4315_p3 = scmp.lt.u32.totalorder %s5159_s21, %s5861_s29 }
 0x189   : > { %p4316_p6 = scmp.lt.u32.totalorder %s4314_s7, %s4310_s16  ;;  %p4318_p4 = scmp.lt.u32.totalorder %s4310_s16, %s5159_s21 }
 0x18a   : > { %p4312_p2 = pnand %p4311_p8, %p4762_p12 }
 0x18b   : > { %p4317_p13 = por %p4316_p6, %p4315_p3 }
 0x18c   : > { %p4313_p0 = pneg %p4312_p2 }
 0x18d   : > { %p4319_p9 = por %p4318_p4, %p4317_p13 }
 0x18f   : > { %p4320_p7 = pnand %p4319_p9, %p4313_p0 }
 0x191   : > { %4323 = shalt.err (!%p4320_p7)
}
 0x192   : > { %s4324_s5 = scalar_lea.vmem %s693_s20, 16  ;;  %s4564_s17 = smov [#allocation22]  }
 0x193   : > { %p4325_p10 = scmp.ne.s32.totalorder %s693_s20, %s4324_s5  ;;  %s4328_s2 = sshll.u32 %s4564_s17, 4  ;;  %s4329_s2 = int_to_ptr.vmem [resolvable:$false] %s4328_s2 }
 0x194   : > { %s4330_s1 = scalar_lea.vmem %s4329_s2, 32  ;;  %p4331_p1 = scmp.lt.s32.totalorder %s693_s20, %s4329_s2 }
 0x195   : > { %p4326_p5 = pnand %p4325_p10, %p4762_p12  ;;  %p4332_p8 = scmp.lt.s32.totalorder %s4330_s1, %s4324_s5 }
 0x197   : > { %p4327_p11 = pneg %p4326_p5  ;;  %p4333_p2 = por %p4332_p8, %p4331_p1 }
 0x199   : > { %p4334_p3 = pnand %p4333_p2, %p4327_p11 }
 0x19b   : > { %4337 = shalt.err (!%p4334_p3)
}
 0x19c   : > { %s5863_s3 = scalar_lea.sflag [#allocation21], %s4789_s15  ;;  %s3465_s25 = sshll.u32 %s4536_s26, 6 }
 0x19d   : > { %3653 = dma.hbm_to_vmem [thread:$0]  (%p4762_p12), %s5159_s21, 16, %s693_s20, %s5863_s3  }
 0x19e   : > { %s724_s16 = scalar_lea.vmem [#allocation25], %s3326_s4  ;;  %s5864_s14 = sld [smem:[#allocation62_spill]] }
 0x19f   : > { %s732_s10 = sshll.u32 %s724_s16, 4  ;;  %s733_s10 = int_to_ptr.vmem [resolvable:$true] %s732_s10 }
 0x1a4   : > { %s730_s19 = scalar_lea.hbm %s5864_s14, %s3465_s25  ;;  %s4342_s1 = scalar_lea.hbm %s5864_s14, 128 }
 0x1a5   : > { %s4338_s5 = scalar_lea.hbm %s730_s19, 64  ;;  %p4343_p4 = scmp.lt.u32.totalorder %s730_s19, %s5864_s14 }
 0x1a6   : > { %p4339_p0 = scmp.ne.s32.totalorder %s730_s19, %s4338_s5  ;;  %p4344_p9 = scmp.lt.u32.totalorder %s4342_s1, %s4338_s5 }
 0x1a7   : > { %p4346_p10 = scmp.lt.u32.totalorder %s4338_s5, %s730_s19 }
 0x1a8   : > { %p4340_p6 = pnand %p4339_p0, %p4762_p12  ;;  %p4345_p7 = por %p4344_p9, %p4343_p4 }
 0x1aa   : > { %p4341_p13 = pneg %p4340_p6  ;;  %p4347_p5 = por %p4346_p10, %p4345_p7 }
 0x1ac   : > { %p4348_p11 = pnand %p4347_p5, %p4341_p13 }
 0x1ae   : > { %4351 = shalt.err (!%p4348_p11)
}
 0x1af   : > { %s4352_s20 = scalar_lea.vmem %s733_s10, 64  ;;  %s4565_s4 = smov [#allocation25]  }
 0x1b0   : > { %p4353_p1 = scmp.ne.s32.totalorder %s733_s10, %s4352_s20  ;;  %s4356_s3 = sshll.u32 %s4565_s4, 4  ;;  %s4357_s3 = int_to_ptr.vmem [resolvable:$false] %s4356_s3 }
 0x1b1   : > { %s4358_s25 = scalar_lea.vmem %s4357_s3, 128  ;;  %p4359_p3 = scmp.lt.s32.totalorder %s733_s10, %s4357_s3 }
 0x1b2   : > { %p4354_p8 = pnand %p4353_p1, %p4762_p12  ;;  %p4360_p0 = scmp.lt.s32.totalorder %s4358_s25, %s4352_s20 }
 0x1b4   : > { %p4355_p2 = pneg %p4354_p8  ;;  %p4361_p6 = por %p4360_p0, %p4359_p3 }
 0x1b6   : > { %p4362_p4 = pnand %p4361_p6, %p4355_p2 }
 0x1b8   : > { %4365 = shalt.err (!%p4362_p4)
}
 0x1b9   : > { %s5865_s8 = scalar_lea.sflag [#allocation24], %s4789_s15  ;;  %s5866_s7 = sld [smem:[#allocation63_spill]] }
 0x1ba   : > { %3655 = dma.hbm_to_vmem [thread:$0]  (%p4762_p12), %s730_s19, 64, %s733_s10, %s5865_s8  }
 0x1bb   : > { %s763_s17 = scalar_lea.vmem [#allocation28], %s4792_s18 }
 0x1bc   : > { %s770_s2 = sshll.u32 %s763_s17, 4  ;;  %s771_s2 = int_to_ptr.vmem [resolvable:$true] %s770_s2 }
 0x1bf   : > { %s5225_s5 = scalar_lea.hbm %s5866_s7, %s4795_s24  ;;  %s4370_s10 = scalar_lea.hbm %s5866_s7, 32 }
 0x1c0   : > { %s4366_s1 = scalar_lea.hbm %s5225_s5, 16  ;;  %p4371_p10 = scmp.lt.u32.totalorder %s5225_s5, %s5866_s7 }
 0x1c1   : > { %p4367_p13 = scmp.ne.s32.totalorder %s5225_s5, %s4366_s1  ;;  %p4372_p5 = scmp.lt.u32.totalorder %s4370_s10, %s4366_s1 }
 0x1c2   : > { %p4374_p1 = scmp.lt.u32.totalorder %s4366_s1, %s5225_s5 }
 0x1c3   : > { %p4368_p9 = pnand %p4367_p13, %p4762_p12  ;;  %p4373_p11 = por %p4372_p5, %p4371_p10 }
 0x1c5   : > { %p4369_p7 = pneg %p4368_p9  ;;  %p4375_p8 = por %p4374_p1, %p4373_p11 }
 0x1c7   : > { %p4376_p2 = pnand %p4375_p8, %p4369_p7 }
 0x1c9   : > { %4379 = shalt.err (!%p4376_p2)
}
 0x1ca   : > { %s4380_s18 = scalar_lea.vmem %s771_s2, 16  ;;  %s4566_s24 = smov [#allocation28]  }
 0x1cb   : > { %p4381_p3 = scmp.ne.s32.totalorder %s771_s2, %s4380_s18  ;;  %s4384_s3 = sshll.u32 %s4566_s24, 4  ;;  %s4385_s3 = int_to_ptr.vmem [resolvable:$false] %s4384_s3 }
 0x1cc   : > { %s4386_s25 = scalar_lea.vmem %s4385_s3, 32  ;;  %p4387_p4 = scmp.lt.s32.totalorder %s771_s2, %s4385_s3 }
 0x1cd   : > { %p4382_p0 = pnand %p4381_p3, %p4762_p12  ;;  %p4388_p13 = scmp.lt.s32.totalorder %s4386_s25, %s4380_s18 }
 0x1cf   : > { %p4383_p6 = pneg %p4382_p0  ;;  %p4389_p9 = por %p4388_p13, %p4387_p4 }
 0x1d1   : > { %p4390_p5 = pnand %p4389_p9, %p4383_p6 }
 0x1d3   : > { %4393 = shalt.err (!%p4390_p5)
}
 0x1d4   : > { %s5867_s8 = scalar_lea.sflag [#allocation27], %s4789_s15 }
 0x1d5   : > { %3657 = dma.hbm_to_vmem [thread:$0]  (%p4762_p12), %s5225_s5, 16, %s771_s2, %s5867_s8  }
 0x1d6 PF: > { %p3333_p7 = scmp.ge.s32.totalorder %s4544_s28, 1  ;;  %p775_p10 = scmp.lt.s32.totalorder %s4544_s28, 5 }
 0x1d8   : > { %p776_p11 = pnand %p3333_p7, %p775_p10 }
 0x1d9   : > { %s5250_s16 = sand.u32 (!%p776_p11), 1, %s4520_s22   ;;  %p5868_p1 = scmp.ne.s32.totalorder (!%p776_p11), %s5832_s12, 0 }
 0x1da   : > { %779 = sbr.rel (%p776_p11) target bundleno = 3229 (0xc9d), region = 80  ;;  %s3334_s0 = sshll.u32 (!%p776_p11), %s5250_s16, 3 }
 0x1db   : > { %s782_s17 = scalar_lea.sflag (!%p776_p11), [#allocation6], %s5250_s16  ;;  %s5254_s6 = scalar_lea.vmem (!%p776_p11), [#allocation5], %s3334_s0 }
 0x1e1   : > { %4467 = dma.done.wait (%p5868_p1), %s782_s17, 128  }
 0x1e2   : > { %4469 = vsyncadd (%p5868_p1), %s782_s17, 4294967168  ;;  %s5869_s15 = sld [smem:[#allocation44_spill]]  ;;  %s5870_s5 = sld [smem:[#allocation39_spill]] }
 0x1e3   : > { %s5871_s2 = sld [smem:[#allocation49_spill]] }
 0x1e8   : > { %s5261_s1 = sand.u32 1, %s5869_s15   ;;  %s5264_s21 = sand.u32 1, %s5870_s5  }
 0x1e9   : > { %s791_s20 = scalar_lea.sflag [#allocation9], %s5261_s1  ;;  %s793_s10 = scalar_lea.vmem [#allocation8], %s5264_s21 }
 0x1ea   : > { %p5872_p12 = scmp.ne.s32.totalorder %s5871_s2, 0 }
 0x1ec   : > { %4471 = dma.done.wait (%p5872_p12), %s791_s20, 32  }
 0x1ed   : > { %4473 = vsyncadd (%p5872_p12), %s791_s20, 4294967264  ;;  %s3641_s12 = smul.u32 192, %s5264_s21  ;;  %s801_s19 = scalar_lea.vmem [#allocation10], %s5264_s21 }
 0x1ee   : > { %s807_s4 = scalar_lea.sflag [#allocation12], %s5261_s1 }
 0x1ef   : > { %s5275_s18 = scalar_lea.vmem [#allocation11], %s3641_s12 }
 0x1f0   : > { %4475 = dma.done.wait (%p5872_p12), %s807_s4, 3120  }
 0x1f1   : > { %4477 = vsyncadd (%p5872_p12), %s807_s4, 4294964176  ;;  %s3642_s24 = smul.u32 3, %s5264_s21  ;;  %s825_s25 = scalar_lea.sflag [#allocation15], %s5261_s1 }
 0x1f3   : > { %s5282_s3 = scalar_lea.vmem [#allocation13], %s3642_s24 }
 0x1f4   : > { %4479 = dma.done.wait (%p5872_p12), %s825_s25, 32  }
 0x1f5   : > { %4481 = vsyncadd (%p5872_p12), %s825_s25, 4294967264  ;;  %s3335_s0 = sshll.u32 %s5264_s21, 6  ;;  %s841_s15 = scalar_lea.sflag [#allocation18], %s5261_s1 }
 0x1f6   : > { %s5293_s5 = scalar_lea.vmem [#allocation17], %s3335_s0 }
 0x1f7   : > { %4483 = dma.done.wait (%p5872_p12), %s841_s15, 1040  }
 0x1f8   : > { %4485 = vsyncadd (%p5872_p12), %s841_s15, 4294966256  ;;  %s858_s12 = scalar_lea.sflag [#allocation21], %s5261_s1 }
 0x1f9   : > { %4487 = dma.done.wait (%p5872_p12), %s858_s12, 32  }
 0x1fa   : > { %4489 = vsyncadd (%p5872_p12), %s858_s12, 4294967264  ;;  %s3336_s24 = sshll.u32 %s5264_s21, 8  ;;  %s874_s0 = scalar_lea.sflag [#allocation24], %s5261_s1 }
 0x1fb   : > { %s5309_s15 = scalar_lea.vmem [#allocation23], %s3336_s24 }
 0x1fc   : > { %4491 = dma.done.wait (%p5872_p12), %s874_s0, 4160  }
 0x1fd   : > { %4493 = vsyncadd (%p5872_p12), %s874_s0, 4294963136  ;;  %s3337_s4 = sshll.u32 %s5264_s21, 2  ;;  %s892_s12 = scalar_lea.sflag [#allocation27], %s5261_s1 }
 0x1fe   : > { %s5316_s20 = scalar_lea.vmem [#allocation25], %s3337_s4  ;;  %s5319_s17 = scalar_lea.vmem [#allocation26], %s3336_s24 }
 0x1ff   : > { %4495 = dma.done.wait (%p5872_p12), %s892_s12, 4112  }
 0x200   : > { %4497 = vsyncadd (%p5872_p12), %s892_s12, 4294963184  ;;  %s903_s25 = scalar_lea.vmem [#allocation28], %s5264_s21  ;;  %s5327_s8 = scalar_lea.vmem [#allocation29], %s5250_s16 }
 0x201   : > { %s5873_s0 = sld [smem:[#allocation42_spill]] }
 0x207   : > { %p3339_p8 = scmp.ne.s32.totalorder %s5873_s0, 0 }
 0x208   : > { %v3468_v0 = vld [vmem:[%s5254_s6] sm:$0xff] (!%p3339_p8)  }
 0x209   : > { %1015 = sbr.rel (%p3339_p8) target bundleno = 528 (0x210), region = 144  ;;  %v3469_v1 = vunpack.c.l.bf16 (!%p3339_p8), %v3468_v0  ;;  %v3470_v2 = vunpack.c.h.bf16 (!%p3339_p8), %v3468_v0 }
 0x20b   : > { %1020 = vst [vmem:[#allocation2] sm:$0xff] (!%p3339_p8), %v3469_v1  ;;  %1021 = vst [vmem:[#allocation2 + $0x8] sm:$0xff] (!%p3339_p8), %v3470_v2 }
 0x210 PF: > { %v3780_v5 = vld [vmem:[%s5275_s18 + $0x4] ss:$12 sps:$4 sm:$0xff]   ;;  %v3782_v6 = vld [vmem:[%s5275_s18] ss:$12 sps:$4 sm:$0xff]   ;;  %v4567_v7 = vmov 0.0   ;;  %v4568_v33 = vmov 0   ;;  %v1100_v56 = vlaneseq }
 0x211   : > { %3549 = vmatprep.subr.bf16.mxu1 %v4567_v7  ;;  %v3783_v8 = vld [vmem:[%s5275_s18 + $0x8] ss:$12 sps:$4 sm:$0xff]   ;;  %1243 = vmatprep.subr.bf16.mxu0 %v3780_v5  ;;  %v3786_v18 = vld [vmem:[%s5275_s18 + $0x18] ss:$12 sps:$4 sm:$0xff]   ;;  %v3787_v19 = vld [vmem:[%s5275_s18 + $0x20] ss:$12 sps:$4 sm:$0xff]  }
 0x212   : > { %v1022_v3 = vld [vmem:[#allocation2] sm:$0xff]  ;;  %v1023_v4 = vld [vmem:[#allocation2 + $0x8] sm:$0xff]  ;;  %1244 = vmatpush1.bf16.msra.mxu0 %v3782_v6  ;;  %3550 = vmatpush3.bf16.msra.mxu1 %v3783_v8  ;;  %v3796_v26 = vld [vmem:[%s5275_s18 + $0x64] ss:$12 sps:$4 sm:$0xff]   ;;  %vm4569_vm0 = vmmov 0   ;;  %v5386_v57 = vshrl.u32 %v1100_v56, 7 }
 0x213   : > { %1026 = vadd.xlane.f32.xlu0 %v1022_v3  ;;  %v3784_v9 = vld [vmem:[%s5275_s18 + $0x1c] ss:$12 sps:$4 sm:$0xff]   ;;  %3551 = vmatprep.subr.bf16.mxu1 %v4567_v7  ;;  %v3788_v20 = vld [vmem:[%s5275_s18 + $0x34] ss:$12 sps:$4 sm:$0xff]   ;;  %v3791_v22 = vld [vmem:[%s5275_s18 + $0x38] ss:$12 sps:$4 sm:$0xff]  }
 0x214   : > { %1245 = vmatprep.subr.bf16.mxu0 %v3784_v9  ;;  %v3790_v21 = vld [vmem:[%s5275_s18 + $0x30] ss:$12 sps:$4 sm:$0xff]   ;;  %v3792_v23 = vld [vmem:[%s5275_s18 + $0x4c] ss:$12 sps:$4 sm:$0xff]   ;;  %v3794_v24 = vld [vmem:[%s5275_s18 + $0x48] ss:$12 sps:$4 sm:$0xff]   ;;  %1275 = vmatprep.mubr.bf16.mxu0 %v4568_v33 }
 0x215   : > { %v3795_v25 = vld [vmem:[%s5275_s18 + $0x50] ss:$12 sps:$4 sm:$0xff]   ;;  %v3798_v27 = vld [vmem:[%s5275_s18 + $0x60] ss:$12 sps:$4 sm:$0xff]   ;;  %v3799_v28 = vld [vmem:[%s5275_s18 + $0x68] ss:$12 sps:$4 sm:$0xff]   ;;  %3565 = vmatprep.mubr.msk.bf16.mxu1 %vm4569_vm0, %v4567_v7 }
 0x216   : > { %1246 = vmatpush1.bf16.msra.mxu0 %v3786_v18  ;;  %3552 = vmatpush3.bf16.msra.mxu1 %v3787_v19  ;;  %v3800_v29 = vld [vmem:[%s5275_s18 + $0x7c] ss:$12 sps:$4 sm:$0xff]   ;;  %v3802_v30 = vld [vmem:[%s5275_s18 + $0x78] ss:$12 sps:$4 sm:$0xff]   ;;  %v3803_v31 = vld [vmem:[%s5275_s18 + $0x80] ss:$12 sps:$4 sm:$0xff]  }
 0x217   : > { %1028 = vadd.xlane.f32.xlu0 %v1023_v4  ;;  %3553 = vmatprep.subr.bf16.mxu1 %v4567_v7  ;;  %v3804_v32 = vld [vmem:[%s5275_s18 + $0x94] ss:$12 sps:$4 sm:$0xff]   ;;  %v3806_v34 = vld [vmem:[%s5275_s18 + $0x90] ss:$12 sps:$4 sm:$0xff]   ;;  %v3807_v35 = vld [vmem:[%s5275_s18 + $0x98] ss:$12 sps:$4 sm:$0xff]  }
 0x218   : > { %1247 = vmatprep.subr.bf16.mxu0 %v3788_v20  ;;  %v3808_v36 = vld [vmem:[%s5275_s18 + $0xac] ss:$12 sps:$4 sm:$0xff]   ;;  %v3810_v37 = vld [vmem:[%s5275_s18 + $0xa8] ss:$12 sps:$4 sm:$0xff]   ;;  %v3811_v38 = vld [vmem:[%s5275_s18 + $0xb0] ss:$12 sps:$4 sm:$0xff]  }
 0x219   : > { %v3340_v47 = vld [vmem:[%s793_s10] ss:$0 sm:$0xff]  ;;  %v1102_v58 = vsub.s32 0, %v5386_v57  ;;  %v1110_v59 = vsub.s32 2, %v5386_v57  ;;  %v1098_v60 = vld [vmem:[%s5282_s3] sm:$0x7] }
 0x21a   : > { %1248 = vmatpush1.bf16.msra.mxu0 %v3790_v21  ;;  %3554 = vmatpush3.bf16.msra.mxu1 %v3791_v22  ;;  %v3341_v51 = vld [vmem:[%s801_s19] ss:$0 sm:$0xff]  ;;  %v1106_v61 = vsub.s32 1, %v5386_v57  ;;  %vm1341_vm1 = vcmask 261120   ;;  %s5874_s6 = scalar_lea.vmem [#allocation14], %s5264_s21  ;;  %vm1411_vm3 = vcmask 130048  }
 0x21b   : > { %3555 = vmatprep.subr.bf16.mxu1 %v4567_v7  ;;  %1249 = vmatprep.subr.bf16.mxu0 %v3792_v23  ;;  %v1103_v62 = vrot.slane %v1098_v60, %v1102_v58  ;;  %v1111_v63 = vrot.slane %v1098_v60, %v1110_v59  ;;  %v3367_v19 = vld [vmem:[%s5874_s6] ss:$0 sm:$0xff]  ;;  %s4570_s2 = smov 96   ;;  %s4571_s1 = smov 64   ;;  %vm1689_vm4 = vcmask 523520   ;;  %vm1881_vm5 = vcmask 785920  }
 0x21c   : > { %v1107_v2 = vrot.slane %v1098_v60, %v1106_v61  ;;  %s4572_s10 = smov 32   ;;  %s5875_s19 = scalar_lea.vmem [#allocation16], %s5264_s21  ;;  %vm2073_vm6 = vcmask 1048320  }
 0x21d   : > { %s5876_s18 = scalar_lea.vmem [#allocation19], %s5264_s21  ;;  %s5877_s3 = scalar_lea.vmem [#allocation20], %s5264_s21 }
 0x21e   : > { %1250 = vmatpush1.bf16.msra.mxu0 %v3794_v24  ;;  %3556 = vmatpush3.bf16.msra.mxu1 %v3795_v25 }
 0x21f   : > { %3557 = vmatprep.subr.bf16.mxu1 %v4567_v7  ;;  %1251 = vmatprep.subr.bf16.mxu0 %v3796_v26 }
 0x222   : > { %1252 = vmatpush1.bf16.msra.mxu0 %v3798_v27  ;;  %3558 = vmatpush3.bf16.msra.mxu1 %v3799_v28  ;;  %v5411_v27 = vand.u32 127, %v1100_v56 }
 0x223   : > { %1253 = vmatprep.subr.bf16.mxu0 %v3800_v29  ;;  %3559 = vmatprep.subr.bf16.mxu1 %v4567_v7 }
 0x224   : > { %vm1335_vm2 = vcmp.lt.s32.totalorder %v5411_v27, 10 }
 0x226   : > { %1254 = vmatpush1.bf16.msra.mxu0 %v3802_v30  ;;  %3560 = vmatpush3.bf16.msra.mxu1 %v3803_v31 }
 0x227   : > { %1255 = vmatprep.subr.bf16.mxu0 %v3804_v32  ;;  %3561 = vmatprep.subr.bf16.mxu1 %v4567_v7 }
 0x22a   : > { %1256 = vmatpush1.bf16.msra.mxu0 %v3806_v34  ;;  %3562 = vmatpush3.bf16.msra.mxu1 %v3807_v35 }
 0x22b   : > { %1257 = vmatprep.subr.bf16.mxu0 %v3808_v36  ;;  %3563 = vmatprep.subr.bf16.mxu1 %v4567_v7 }
 0x22e   : > { %1258 = vmatpush1.bf16.msra.mxu0 %v3810_v37  ;;  %3564 = vmatpush3.bf16.msra.mxu1 %v3811_v38 }
 0x22f   : > { %3569 = vmatprep.subr.bf16.mxu1 %v4567_v7  ;;  %3593 = vmatprep.subr.bf16.mxu0 %v4567_v7 }
 0x2a0   : > { %v1027_v10 = vpop.xlane.xlu0 %1026 }
 0x2a1   : > { %v1031_v11 = vmul.f32 0.0078125, %v1027_v10 }
 0x2a3   : > { %v5337_v12 = vsub.f32 %v1022_v3, %v1031_v11 }
 0x2a4   : > { %v1029_v13 = vpop.xlane.xlu0 %1028 }
 0x2a5   : > { %v1032_v14 = vmul.f32 0.0078125, %v1029_v13  ;;  %v1035_v15 = vmul.f32 %v5337_v12, %v5337_v12 }
 0x2a7   : > { %v5341_v16 = vsub.f32 %v1023_v4, %v1032_v14  ;;  %1037 = vadd.xlane.f32.xlu1 %v1035_v15 }
 0x2a9   : > { %v1036_v17 = vmul.f32 %v5341_v16, %v5341_v16 }
 0x2ab   : > { %1039 = vadd.xlane.f32.xlu1 %v1036_v17 }
 0x334   : > { %v1038_v39 = vpop.xlane.xlu1 %1037 }
 0x335   : > { %v1041_v40 = vmul.f32 0.0078125, %v1038_v39 }
 0x337   : > { %v1043_v41 = vadd.f32 1e-06, %v1041_v40 }
 0x338   : > { %v1040_v42 = vpop.xlane.xlu1 %1039 }
 0x339   : > { %3900 = vrsqrt.f32 %v1043_v41  ;;  %v1042_v43 = vmul.f32 0.0078125, %v1040_v42 }
 0x33b   : > { %v1044_v44 = vadd.f32 1e-06, %v1042_v43 }
 0x33d   : > { %3902 = vrsqrt.f32 %v1044_v44 }
 0x343   : > { %v3901_v45 = vpop.eup %3900 }
 0x344   : > { %v1047_v46 = vmul.f32 %v3901_v45, %v5337_v12 }
 0x346   : > { %v1055_v50 = vmul.f32 %v3340_v47, %v1047_v46 }
 0x347   : > { %v3903_v48 = vpop.eup %3902 }
 0x348   : > { %v1048_v49 = vmul.f32 %v3903_v48, %v5341_v16  ;;  %v1063_v53 = vadd.f32 %v3341_v51, %v1055_v50 }
 0x34a   : > { %v1056_v52 = vmul.f32 %v3340_v47, %v1048_v49 }
 0x34c   : > { %v1064_v54 = vadd.f32 %v3341_v51, %v1056_v52 }
 0x34e   : > { %v1065_v55 = vpack.c.bf16 %v1064_v54, %v1063_v53 }
 0x350   : > { %1276 = vmatmul.mubr.bf16.vlgmr.msra.gmra.mrb[0].mxu0 %v1065_v55  ;;  %3566 = vmatmul.mubr.bf16.vlgmr.msra.gmra.mrb[0].mxu1 %v1065_v55 }
 0x351   : > { %3571 = vmatprep.mubr.msk.bf16.mxu1 %vm4569_vm0, %v4567_v7  ;;  %3595 = vmatprep.mubr.msk.bf16.mxu0 %vm4569_vm0, %v4567_v7 }
 0x423   : > { %v1277_v0 = vpop.f32.mrb[0].mxu0  ;;  %v1320_v1 = vpop.f32.mrb[0].mxu1 }
 0x424   : > { %v1279_v3 = vpop.f32.mrb[1].mxu0  ;;  %v3567_v4 = vpop.f32.mrb[1].mxu1  ;;  %v1278_v8 = vadd.f32 %v1277_v0, %v1103_v62  ;;  %v1321_v9 = vadd.f32 %v1320_v1, %v1111_v63 }
 0x425   : > { %v1281_v5 = vpop.f32.mrb[2].mxu0  ;;  %v1323_v6 = vpop.f32.mrb[2].mxu1  ;;  %v1280_v14 = vadd.f32 %v1279_v3, %v1107_v2 }
 0x426   : > { %v1282_v10 = vadd.f32 %v1281_v5, %v1103_v62  ;;  %v1324_v11 = vadd.f32 %v1323_v6, %v1111_v63  ;;  %v1283_v12 = vpop.f32.mrb[3].mxu0  ;;  %v3568_v13 = vpop.f32.mrb[3].mxu1 }
 0x427   : > { %v1284_v15 = vadd.f32 %v1283_v12, %v1107_v2 }
 0x428   : > { %v1327_v16 = vpack.c.bf16 %v1282_v10, %v1278_v8  ;;  %v5398_v17 = vpack.c.bf16 %v1324_v11, %v1321_v9 }
 0x429   : > { %v1328_v18 = vpack.c.bf16 %v1284_v15, %v1280_v14 }
 0x42a   : > { %v1394_v20 = vunpack.c.h.bf16 %v1327_v16  ;;  %v1393_v21 = vunpack.c.l.bf16 %v1327_v16 }
 0x42b   : > { %v1346_v22 = vsel %vm1341_vm1, %v1328_v18, 0 }
 0x42c   : > { %3570 = vmatpush3.bf16.xpose.msra.mxu1 %v1346_v22  ;;  %v1402_v23 = vmul.f32 %v3367_v19, %v1394_v20  ;;  %v1401_v24 = vmul.f32 %v3367_v19, %v1393_v21  ;;  %v5466_v22 = vld [vmem:[%s5875_s19] ss:$0 sm:$0xff] }
 0x42d   : > { %3575 = vmatprep.subr.bf16.mxu1 %v4567_v7 }
 0x42e   : > { %v1406_v25 = vsel %vm1341_vm1, %v1402_v23, 0.0  ;;  %v1403_v26 = vsel %vm1341_vm1, %v1401_v24, 0.0 }
 0x42f   : > { %1407 = vadd.xlane.f32.xlu1 %v1406_v25  ;;  %1404 = vadd.xlane.f32.xlu0 %v1403_v26 }
 0x433   : > { %3572 = vmatmul.mubr.msk.bf16.vlgmr.msra.gmra.mrb[4].mxu1 %vm1341_vm1, %v1327_v16 }
 0x434   : > { %3576 = vmatpush3.bf16.msra.mxu1 %v5398_v17  ;;  %3577 = vmatprep.mubr.msk.bf16.mxu1 %vm4569_vm0, %v4567_v7 }
 0x435   : > { %3581 = vmatprep.subr.bf16.mxu1 %v4567_v7 }
 0x4bc   : > { %v1405_v39 = vpop.xlane.xlu0 %1404  ;;  %v1408_v40 = vpop.xlane.xlu1 %1407 }
 0x4bd   : > { %v1409_v41 = vmul.f32 0.17677669, %v1405_v39  ;;  %v1410_v43 = vmul.f32 0.17677669, %v1408_v40 }
 0x506   : > { %v1382_v28 = vpop.f32.mrb[4].mxu1 }
 0x507   : > { %v1389_v29 = vmul.f32 0.17677669, %v1382_v28  ;;  %v3573_v30 = vpop.f32.mrb[5].mxu1 }
 0x508   : > { %v1385_v31 = vpop.f32.mrb[6].mxu1 }
 0x509   : > { %v1390_v32 = vmul.f32 0.17677669, %v1385_v31  ;;  %v3574_v34 = vpop.f32.mrb[7].mxu1  ;;  %v1391_v35 = vsel %vm1335_vm2, %v1389_v29, -1e+30 }
 0x50a   : > { %v1412_v36 = vsel %vm1411_vm3, %v1391_v35, -inf }
 0x50b   : > { %1413 = vmax.xlane.f32.xlu0 %v1412_v36  ;;  %v1392_v37 = vsel %vm1335_vm2, %v1390_v32, -1e+30 }
 0x50c   : > { %v1415_v38 = vsel %vm1411_vm3, %v1392_v37, -inf }
 0x50d   : > { %1416 = vmax.xlane.f32.xlu1 %v1415_v38 }
 0x51e   : > { %1505 = vrot.lane.b32.xlu1 %v1327_v16, %s4570_s2 }
 0x521   : > { %1508 = vrot.lane.b32.xlu0 %v1328_v18, %s4570_s2 }
 0x522   : > { %1700 = vrot.lane.b32.xlu1 %v1328_v18, %s4571_s1 }
 0x525   : > { %1892 = vrot.lane.b32.xlu0 %v1328_v18, %s4572_s10 }
 0x526   : > { %1697 = vrot.lane.b32.xlu1 %v1327_v16, %s4571_s1 }
 0x529   : > { %1573 = vrot.lane.b32.xlu0 %v1401_v24, %s4570_s2 }
 0x52a   : > { %1889 = vrot.lane.b32.xlu1 %v1327_v16, %s4572_s10 }
 0x52d   : > { %1765 = vrot.lane.b32.xlu0 %v1401_v24, %s4571_s1 }
 0x52e   : > { %1575 = vrot.lane.b32.xlu1 %v1402_v23, %s4570_s2 }
 0x531   : > { %1957 = vrot.lane.b32.xlu0 %v1401_v24, %s4572_s10 }
 0x532   : > { %1767 = vrot.lane.b32.xlu1 %v1402_v23, %s4571_s1 }
 0x536   : > { %1959 = vrot.lane.b32.xlu1 %v1402_v23, %s4572_s10 }
 0x598   : > { %v1414_v42 = vpop.xlane.xlu0 %1413 }
 0x599   : > { %v1418_v44 = vmax.f32 %v1414_v42, %v1409_v41 }
 0x59a   : > { %v1417_v45 = vpop.xlane.xlu1 %1416 }
 0x59b   : > { %v1420_v46 = vsub.f32 %v1391_v35, %v1418_v44  ;;  %v1426_v47 = vsub.f32 %v1409_v41, %v1418_v44  ;;  %v1419_v48 = vmax.f32 %v1417_v45, %v1410_v43 }
 0x59c   : > { %v1509_v49 = vpop.permute.xlu0 %1508 }
 0x59d   : > { %v1422_v50 = vmul.f32 1.442695, %v1420_v46  ;;  %v1421_v51 = vsub.f32 %v1392_v37, %v1419_v48  ;;  %v1427_v52 = vsub.f32 %v1410_v43, %v1419_v48  ;;  %v1514_v11 = vsel %vm1341_vm1, %v1509_v49, 0 }
 0x59e   : > { %v1506_v53 = vpop.permute.xlu1 %1505  ;;  %v1428_v19 = vmul.f32 1.442695, %v1426_v47 }
 0x59f   : > { %v1424_v54 = vmul.f32 1.442695, %v1421_v51  ;;  %3904 = vpow2.f32 %v1422_v50  ;;  %v1430_v20 = vmul.f32 1.442695, %v1427_v52 }
 0x5a0   : > { %v1893_v55 = vpop.permute.xlu0 %1892 }
 0x5a1   : > { %3906 = vpow2.f32 %v1424_v54  ;;  %v1898_v6 = vsel %vm1341_vm1, %v1893_v55, 0 }
 0x5a2   : > { %v1701_v56 = vpop.permute.xlu1 %1700  ;;  %3908 = vpow2.f32 %v1428_v19 }
 0x5a3   : > { %v1706_v60 = vsel %vm1341_vm1, %v1701_v56, 0  ;;  %3910 = vpow2.f32 %v1430_v20 }
 0x5a4   : > { %v1574_v62 = vpop.permute.xlu0 %1573  ;;  %3594 = vmatpush3.bf16.xpose.msra.mxu0 %v1706_v60 }
 0x5a5   : > { %v1579_v63 = vsel %vm1341_vm1, %v1574_v62, 0.0  ;;  %3605 = vmatprep.subr.bf16.mxu0 %v4567_v7 }
 0x5a6   : > { %1580 = vadd.xlane.f32.xlu0 %v1579_v63  ;;  %v1698_v0 = vpop.permute.xlu1 %1697 }
 0x5a8   : > { %v1766_v1 = vpop.permute.xlu0 %1765 }
 0x5a9   : > { %v1771_v2 = vsel %vm1341_vm1, %v1766_v1, 0.0  ;;  %v5436_v3 = vpop.eup %3904 }
 0x5aa   : > { %1772 = vadd.xlane.f32.xlu0 %v1771_v2  ;;  %v1890_v4 = vpop.permute.xlu1 %1889 }
 0x5ab   : > { %v5438_v5 = vpop.eup %3906  ;;  %3596 = vmatmul.mubr.msk.bf16.vlgmr.msra.gmra.mrb[4].mxu0 %vm1341_vm1, %v1698_v0 }
 0x5ac   : > { %v1958_v8 = vpop.permute.xlu0 %1957  ;;  %3606 = vmatpush3.bf16.xpose.msra.mxu0 %v1898_v6  ;;  %v1442_v9 = vpack.c.bf16 %v5438_v5, %v5436_v3  ;;  %3607 = vmatprep.mubr.msk.bf16.mxu0 %vm4569_vm0, %v4567_v7  ;;  %v5462_v21 = vpop.eup %3908 }
 0x5ad   : > { %v1963_v10 = vsel %vm1341_vm1, %v1958_v8, 0.0  ;;  %3617 = vmatprep.subr.bf16.mxu0 %v4567_v7  ;;  %v5468_v24 = vpop.eup %3910  ;;  %v1449_v29 = vmul.f32 %v5462_v21, %v5466_v22 }
 0x5ae   : > { %1964 = vadd.xlane.f32.xlu0 %v1963_v10  ;;  %3578 = vmatmul.mubr.msk.bf16.vlgmr.msra.gmra.mrb[8].mxu1 %vm1411_vm3, %v1442_v9  ;;  %v1576_v12 = vpop.permute.xlu1 %1575  ;;  %v1450_v38 = vmul.f32 %v5468_v24, %v5466_v22 }
 0x5af   : > { %3582 = vmatpush3.bf16.xpose.msra.mxu1 %v1514_v11  ;;  %v1582_v13 = vsel %vm1341_vm1, %v1576_v12, 0.0  ;;  %3583 = vmatprep.mubr.msk.bf16.mxu1 %vm4569_vm0, %v4567_v7 }
 0x5b0   : > { %1583 = vadd.xlane.f32.xlu1 %v1582_v13  ;;  %3587 = vmatprep.subr.bf16.mxu1 %v4567_v7 }
 0x5b2   : > { %v1768_v14 = vpop.permute.xlu1 %1767 }
 0x5b3   : > { %3608 = vmatmul.mubr.msk.bf16.vlgmr.msra.gmra.mrb[8].mxu0 %vm1341_vm1, %v1890_v4  ;;  %v1774_v15 = vsel %vm1341_vm1, %v1768_v14, 0.0 }
 0x5b4   : > { %1775 = vadd.xlane.f32.xlu1 %v1774_v15  ;;  %3633 = vmatprep.mubr.msk.bf16.mxu0 %vm4569_vm0, %v4567_v7 }
 0x5b6   : > { %3584 = vmatmul.mubr.msk.bf16.vlgmr.msra.gmra.mrb[12].mxu1 %vm1341_vm1, %v1506_v53  ;;  %v1960_v16 = vpop.permute.xlu1 %1959 }
 0x5b7   : > { %v1966_v18 = vsel %vm1341_vm1, %v1960_v16, 0.0  ;;  %3589 = vmatprep.mubr.msk.bf16.mxu1 %vm4569_vm0, %v4567_v7 }
 0x5b8   : > { %1967 = vadd.xlane.f32.xlu1 %v1966_v18 }
 0x633   : > { %v1581_v6 = vpop.xlane.xlu0 %1580 }
 0x637   : > { %v1773_v9 = vpop.xlane.xlu0 %1772 }
 0x638   : > { %v1777_v27 = vmul.f32 0.17677669, %v1773_v9 }
 0x63b   : > { %v1965_v11 = vpop.xlane.xlu0 %1964 }
 0x63d   : > { %v1584_v8 = vpop.xlane.xlu1 %1583 }
 0x641   : > { %v1776_v10 = vpop.xlane.xlu1 %1775 }
 0x642   : > { %v1778_v14 = vmul.f32 0.17677669, %v1776_v10 }
 0x645   : > { %v1968_v12 = vpop.xlane.xlu1 %1967 }
 0x67e   : > { %v1742_v23 = vpop.f32.mrb[4].mxu0 }
 0x67f   : > { %v1749_v25 = vmul.f32 0.17677669, %v1742_v23  ;;  %v3597_v26 = vpop.f32.mrb[5].mxu0 }
 0x680   : > { %v1745_v28 = vpop.f32.mrb[6].mxu0 }
 0x681   : > { %v1750_v30 = vmul.f32 0.17677669, %v1745_v28  ;;  %v1488_v31 = vpop.f32.mrb[8].mxu1  ;;  %v3598_v32 = vpop.f32.mrb[7].mxu0  ;;  %v1751_v34 = vsel %vm1335_vm2, %v1749_v25, -1e+30 }
 0x682   : > { %v5474_v35 = vadd.f32 %v1488_v31, %v1449_v29  ;;  %v3579_v36 = vpop.f32.mrb[9].mxu1  ;;  %v1779_v37 = vsel %vm1411_vm3, %v1751_v34, -inf  ;;  %v5502_v25 = vmul.f32 0.17677669, %v1965_v11  ;;  %v1970_v28 = vmul.f32 0.17677669, %v1968_v12 }
 0x683   : > { %1780 = vmax.xlane.f32.xlu0 %v1779_v37  ;;  %v1491_v39 = vpop.f32.mrb[10].mxu1  ;;  %v1752_v40 = vsel %vm1335_vm2, %v1750_v30, -1e+30  ;;  %v5510_v36 = vmul.f32 0.17677669, %v1581_v6 }
 0x684   : > { %v5481_v41 = vadd.f32 %v1491_v39, %v1450_v38  ;;  %v3580_v42 = vpop.f32.mrb[11].mxu1  ;;  %v1782_v43 = vsel %vm1411_vm3, %v1752_v40, -inf }
 0x685   : > { %1783 = vmax.xlane.f32.xlu1 %v1782_v43  ;;  %v1586_v42 = vmul.f32 0.17677669, %v1584_v8 }
 0x686   : > { %v1934_v44 = vpop.f32.mrb[8].mxu0 }
 0x687   : > { %v1941_v45 = vmul.f32 0.17677669, %v1934_v44  ;;  %v3609_v46 = vpop.f32.mrb[9].mxu0 }
 0x688   : > { %v1937_v47 = vpop.f32.mrb[10].mxu0 }
 0x689   : > { %v1942_v48 = vmul.f32 0.17677669, %v1937_v47  ;;  %v1550_v49 = vpop.f32.mrb[12].mxu1  ;;  %v3610_v50 = vpop.f32.mrb[11].mxu0  ;;  %v1943_v51 = vsel %vm1335_vm2, %v1941_v45, -1e+30 }
 0x68a   : > { %v1557_v52 = vmul.f32 0.17677669, %v1550_v49  ;;  %v3585_v53 = vpop.f32.mrb[13].mxu1  ;;  %v1971_v54 = vsel %vm1411_vm3, %v1943_v51, -inf }
 0x68b   : > { %1972 = vmax.xlane.f32.xlu0 %v1971_v54  ;;  %v1553_v55 = vpop.f32.mrb[14].mxu1  ;;  %v1944_v56 = vsel %vm1335_vm2, %v1942_v48, -1e+30 }
 0x68c   : > { %v1558_v60 = vmul.f32 0.17677669, %v1553_v55  ;;  %v3586_v62 = vpop.f32.mrb[15].mxu1  ;;  %v1974_v63 = vsel %vm1411_vm3, %v1944_v56, -inf  ;;  %v1559_v0 = vsel %vm1335_vm2, %v1557_v52, -1e+30 }
 0x68d   : > { %1975 = vmax.xlane.f32.xlu1 %v1974_v63  ;;  %v1587_v1 = vsel %vm1411_vm3, %v1559_v0, -inf }
 0x68e   : > { %v1560_v2 = vsel %vm1335_vm2, %v1558_v60, -1e+30 }
 0x68f   : > { %1588 = vmax.xlane.f32.xlu0 %v1587_v1  ;;  %v1590_v4 = vsel %vm1411_vm3, %v1560_v2, -inf }
 0x693   : > { %1591 = vmax.xlane.f32.xlu0 %v1590_v4 }
 0x69e   : > { %1819 = vrot.lane.b32.xlu1 %v5398_v17, %s4571_s1 }
 0x6a2   : > { %2011 = vrot.lane.b32.xlu1 %v5398_v17, %s4572_s10 }
 0x6a9   : > { %1627 = vrot.lane.b32.xlu0 %v5398_v17, %s4570_s2 }
 0x710   : > { %v1781_v13 = vpop.xlane.xlu0 %1780 }
 0x711   : > { %v1785_v15 = vmax.f32 %v1781_v13, %v1777_v27 }
 0x712   : > { %v1784_v16 = vpop.xlane.xlu1 %1783 }
 0x713   : > { %v1787_v18 = vsub.f32 %v1751_v34, %v1785_v15  ;;  %v1786_v19 = vmax.f32 %v1784_v16, %v1778_v14  ;;  %v1793_v54 = vsub.f32 %v1777_v27, %v1785_v15 }
 0x715   : > { %v1789_v20 = vmul.f32 1.442695, %v1787_v18  ;;  %v1788_v23 = vsub.f32 %v1752_v40, %v1786_v19  ;;  %v1795_v62 = vmul.f32 1.442695, %v1793_v54  ;;  %v1794_v63 = vsub.f32 %v1778_v14, %v1786_v19 }
 0x717   : > { %3912 = vpow2.f32 %v1789_v20  ;;  %v1791_v26 = vmul.f32 1.442695, %v1788_v23  ;;  %v1797_v4 = vmul.f32 1.442695, %v1794_v63 }
 0x718   : > { %v1973_v17 = vpop.xlane.xlu0 %1972 }
 0x719   : > { %3914 = vpow2.f32 %v1791_v26  ;;  %v5505_v29 = vmax.f32 %v1973_v17, %v5502_v25 }
 0x71a   : > { %v1976_v30 = vpop.xlane.xlu1 %1975 }
 0x71b   : > { %v1979_v31 = vsub.f32 %v1943_v51, %v5505_v29  ;;  %v1985_v32 = vsub.f32 %v5502_v25, %v5505_v29  ;;  %v1978_v34 = vmax.f32 %v1976_v30, %v1970_v28  ;;  %v1432_v25 = vsel %vm1411_vm3, %v5436_v3, 0.0  ;;  %v3812_v29 = vld [vmem:[%s5293_s5] sm:$0xff]  }
 0x71c   : > { %v1589_v37 = vpop.xlane.xlu0 %1588  ;;  %3618 = vmatpush3.bf16.msra.mxu0 %v3812_v29 }
 0x71d   : > { %v1981_v38 = vmul.f32 1.442695, %v1979_v31  ;;  %v1980_v39 = vsub.f32 %v1944_v56, %v1978_v34  ;;  %v5513_v40 = vmax.f32 %v1589_v37, %v5510_v36  ;;  %v1986_v27 = vsub.f32 %v1970_v28, %v1978_v34  ;;  %3619 = vmatprep.subr.bf16.mxu0 %v4567_v7 }
 0x71e   : > { %v1820_v12 = vpop.permute.xlu1 %1819 }
 0x71f   : > { %3916 = vpow2.f32 %v1981_v38  ;;  %v1983_v43 = vmul.f32 1.442695, %v1980_v39  ;;  %v1595_v44 = vsub.f32 %v1559_v0, %v5513_v40  ;;  %v1601_v45 = vsub.f32 %v5510_v36, %v5513_v40 }
 0x720   : > { %v1592_v46 = vpop.xlane.xlu0 %1591  ;;  %v1989_v15 = vmul.f32 1.442695, %v1986_v27  ;;  %v1987_v38 = vmul.f32 1.442695, %v1985_v32  ;;  %v1435_v39 = vsel %vm1411_vm3, %v5438_v5, 0.0  ;;  %v3813_v32 = vld [vmem:[%s5293_s5 + $0x8] sm:$0xff]  }
 0x721   : > { %v3913_v47 = vpop.eup %3912  ;;  %3918 = vpow2.f32 %v1983_v43  ;;  %v1594_v48 = vmax.f32 %v1592_v46, %v1586_v42  ;;  %v1597_v49 = vmul.f32 1.442695, %v1595_v44  ;;  %v1603_v34 = vmul.f32 1.442695, %v1601_v45  ;;  %3620 = vmatpush3.bf16.msra.mxu0 %v3813_v32 }
 0x722   : > { %v1799_v50 = vsel %vm1411_vm3, %v3913_v47, 0.0  ;;  %v2012_v20 = vpop.permute.xlu1 %2011  ;;  %3621 = vmatprep.subr.bf16.mxu0 %v4567_v7 }
 0x723   : > { %v3915_v51 = vpop.eup %3914  ;;  %v1596_v52 = vsub.f32 %v1560_v2, %v1594_v48  ;;  %1800 = vadd.xlane.f32.xlu0 %v1799_v50  ;;  %3920 = vpow2.f32 %v1597_v49  ;;  %v1602_v9 = vsub.f32 %v1586_v42, %v1594_v48 }
 0x724   : > { %v1628_v53 = vpop.permute.xlu0 %1627  ;;  %v1802_v56 = vsel %vm1411_vm3, %v3915_v51, 0.0  ;;  %v1809_v18 = vpack.c.bf16 %v3915_v51, %v3913_v47 }
 0x725   : > { %v1599_v55 = vmul.f32 1.442695, %v1596_v52  ;;  %3588 = vmatpush3.bf16.msra.mxu1 %v1628_v53  ;;  %v1605_v13 = vmul.f32 1.442695, %v1602_v9 }
 0x726   : > { %3599 = vmatprep.subr.bf16.mxu1 %v4567_v7 }
 0x727   : > { %3922 = vpow2.f32 %v1599_v55  ;;  %1803 = vadd.xlane.f32.xlu0 %v1802_v56  ;;  %v3814_v55 = vld [vmem:[%s5293_s5 + $0x10] sm:$0xff]  }
 0x728   : > { %3924 = vpow2.f32 %v1795_v62  ;;  %3622 = vmatpush3.bf16.msra.mxu0 %v3814_v55  ;;  %v3815_v62 = vld [vmem:[%s5293_s5 + $0x18] sm:$0xff]  }
 0x729   : > { %v3917_v60 = vpop.eup %3916  ;;  %3926 = vpow2.f32 %v1797_v4  ;;  %3623 = vmatprep.subr.bf16.mxu0 %v4567_v7 }
 0x72a   : > { %v1991_v0 = vsel %vm1411_vm3, %v3917_v60, 0.0  ;;  %3928 = vpow2.f32 %v1605_v13 }
 0x72b   : > { %v3919_v1 = vpop.eup %3918  ;;  %1992 = vadd.xlane.f32.xlu1 %v1991_v0  ;;  %3930 = vpow2.f32 %v1989_v15  ;;  %v3817_v15 = vld [vmem:[%s5293_s5 + $0x28] sm:$0xff]  }
 0x72c   : > { %v1994_v2 = vsel %vm1411_vm3, %v3919_v1, 0.0  ;;  %v2001_v26 = vpack.c.bf16 %v3919_v1, %v3917_v60  ;;  %3932 = vpow2.f32 %v1603_v34  ;;  %3624 = vmatpush3.bf16.msra.mxu0 %v3815_v62 }
 0x72d   : > { %1995 = vadd.xlane.f32.xlu0 %v1994_v2  ;;  %v3921_v6 = vpop.eup %3920  ;;  %3934 = vpow2.f32 %v1987_v38  ;;  %3625 = vmatprep.subr.bf16.mxu0 %v4567_v7  ;;  %v3819_v38 = vld [vmem:[%s5293_s5 + $0x38] sm:$0xff]  }
 0x72e   : > { %v1607_v37 = vsel %vm1411_vm3, %v3921_v6, 0.0 }
 0x731   : > { %v3923_v8 = vpop.eup %3922 }
 0x732   : > { %v1610_v10 = vsel %vm1411_vm3, %v3923_v8, 0.0  ;;  %v1617_v11 = vpack.c.bf16 %v3923_v8, %v3921_v6  ;;  %v5528_v14 = vpop.eup %3924 }
 0x733   : > { %1611 = vadd.xlane.f32.xlu0 %v1610_v10  ;;  %v1816_v16 = vmul.f32 %v5528_v14, %v5466_v22  ;;  %v3927_v19 = vpop.eup %3926 }
 0x734   : > { %3590 = vmatmul.mubr.msk.bf16.vlgmr.msra.gmra.mrb[16].mxu1 %vm1411_vm3, %v1617_v11  ;;  %v1817_v23 = vmul.f32 %v3927_v19, %v5466_v22  ;;  %v3929_v17 = vpop.eup %3928 }
 0x735   : > { %3600 = vmatpush3.bf16.msra.mxu1 %v1820_v12  ;;  %3601 = vmatprep.mubr.msk.bf16.mxu1 %vm4569_vm0, %v4567_v7  ;;  %v1625_v28 = vmul.f32 %v3929_v17, %v5466_v22  ;;  %v5541_v30 = vpop.eup %3930  ;;  %v3816_v12 = vld [vmem:[%s5293_s5 + $0x20] sm:$0xff]  }
 0x736   : > { %3611 = vmatprep.subr.bf16.mxu1 %v4567_v7  ;;  %v2009_v31 = vmul.f32 %v5541_v30, %v5466_v22  ;;  %v3933_v42 = vpop.eup %3932  ;;  %3626 = vmatpush3.bf16.msra.mxu0 %v3816_v12 }
 0x737   : > { %v1624_v43 = vmul.f32 %v3933_v42, %v5466_v22  ;;  %v3935_v36 = vpop.eup %3934  ;;  %3627 = vmatprep.subr.bf16.mxu0 %v4567_v7 }
 0x738   : > { %v2008_v40 = vmul.f32 %v3935_v36, %v5466_v22 }
 0x73a   : > { %3628 = vmatpush3.bf16.msra.mxu0 %v3817_v15 }
 0x73b   : > { %3629 = vmatprep.subr.bf16.mxu0 %v4567_v7 }
 0x73c   : > { %1824 = vrot.lane.b32.xlu1 %v1816_v16, %s4571_s1  ;;  %3602 = vmatmul.mubr.msk.bf16.vlgmr.msra.gmra.mrb[20].mxu1 %vm1411_vm3, %v1809_v18 }
 0x73d   : > { %3612 = vmatpush3.bf16.msra.mxu1 %v2012_v20  ;;  %3613 = vmatprep.mubr.msk.bf16.mxu1 %vm4569_vm0, %v4567_v7 }
 0x740   : > { %1826 = vrot.lane.b32.xlu1 %v1817_v23, %s4571_s1 }
 0x744   : > { %3614 = vmatmul.mubr.msk.bf16.vlgmr.msra.gmra.mrb[24].mxu1 %vm1411_vm3, %v2001_v26 }
 0x745   : > { %2477 = vmatprep.mubr.bf16.mxu1 %v4568_v33 }
 0x749   : > { %1634 = vrot.lane.b32.xlu0 %v1625_v28, %s4570_s2 }
 0x74d   : > { %2018 = vrot.lane.b32.xlu0 %v2009_v31, %s4572_s10  ;;  %v3818_v31 = vld [vmem:[%s5293_s5 + $0x30] sm:$0xff]   ;;  %s5878_s5 = scalar_lea.vmem [#allocation22], %s5264_s21 }
 0x74e   : > { %3630 = vmatpush3.bf16.msra.mxu0 %v3818_v31  ;;  %v3841_v31 = vld [vmem:[%s5309_s15 + $0x68] ss:$16 sps:$4 sm:$0xff]  }
 0x74f   : > { %3631 = vmatprep.subr.bf16.mxu0 %v4567_v7 }
 0x752   : > { %3632 = vmatpush3.bf16.msra.mxu0 %v3819_v38  ;;  %v3844_v38 = vld [vmem:[%s5309_s15 + $0x80] ss:$16 sps:$4 sm:$0xff]  }
 0x764   : > { %1608 = vadd.xlane.f32.xlu1 %v1607_v37 }
 0x76c   : > { %1436 = vadd.xlane.f32.xlu0 %v1435_v39 }
 0x775   : > { %1632 = vrot.lane.b32.xlu1 %v1624_v43, %s4570_s2 }
 0x779   : > { %2016 = vrot.lane.b32.xlu1 %v2008_v40, %s4572_s10 }
 0x79d   : > { %1433 = vadd.xlane.f32.xlu1 %v1432_v25 }
 0x7b0   : > { %v1801_v5 = vpop.xlane.xlu0 %1800 }
 0x7b1   : > { %v1805_v56 = vadd.f32 %v5528_v14, %v1801_v5 }
 0x7b4   : > { %v1804_v44 = vpop.xlane.xlu0 %1803 }
 0x7b5   : > { %v1806_v60 = vadd.f32 %v3927_v19, %v1804_v44 }
 0x7b8   : > { %v1993_v22 = vpop.xlane.xlu1 %1992 }
 0x7b9   : > { %v1997_v27 = vadd.f32 %v3935_v36, %v1993_v22 }
 0x7ba   : > { %v1996_v45 = vpop.xlane.xlu0 %1995 }
 0x7bc   : > { %v1825_v48 = vpop.permute.xlu1 %1824 }
 0x7c0   : > { %v1612_v46 = vpop.xlane.xlu0 %1611  ;;  %v1827_v3 = vpop.permute.xlu1 %1826 }
 0x7c1   : > { %v1614_v53 = vadd.f32 %v3929_v17, %v1612_v46 }
 0x7c4   : > { %v1635_v47 = vpop.permute.xlu0 %1634 }
 0x7c8   : > { %v5566_v49 = vpop.permute.xlu0 %2018 }
 0x7f1   : > { %v1609_v51 = vpop.xlane.xlu1 %1608 }
 0x7f2   : > { %v1613_v54 = vadd.f32 %v3933_v42, %v1609_v51 }
 0x7f5   : > { %v1633_v0 = vpop.permute.xlu1 %1632 }
 0x7f9   : > { %v1437_v50 = vpop.xlane.xlu0 %1436  ;;  %v2017_v42 = vpop.permute.xlu1 %2016 }
 0x7fa   : > { %v1439_v52 = vadd.f32 %v5468_v24, %v1437_v50 }
 0x7fc   : > { %3936 = vrcp.f32 %v1439_v52 }
 0x7fd   : > { %3938 = vrcp.f32 %v1614_v53 }
 0x7fe   : > { %3940 = vrcp.f32 %v1613_v54 }
 0x7ff   : > { %3942 = vrcp.f32 %v1805_v56 }
 0x800   : > { %3944 = vrcp.f32 %v1806_v60  ;;  %v3972_v60 = vld [vmem:[#allocation2] sm:$0xff] }
 0x801   : > { %3946 = vrcp.f32 %v1997_v27 }
 0x806   : > { %v3937_v63 = vpop.eup %3936 }
 0x807   : > { %v1675_v1 = vpop.f32.mrb[16].mxu1  ;;  %v5574_v2 = vmul.f32 %v3937_v63, %v5481_v41  ;;  %v3939_v8 = vpop.eup %3938  ;;  %v1998_v41 = vadd.f32 %v5541_v30, %v1996_v45 }
 0x808   : > { %v1676_v24 = vadd.f32 %v1675_v1, %v1633_v0  ;;  %v3591_v4 = vpop.f32.mrb[17].mxu1  ;;  %v3941_v11 = vpop.eup %3940  ;;  %v3973_v1 = vld [vmem:[#allocation2 + $0x8] sm:$0xff] }
 0x809   : > { %v1678_v6 = vpop.f32.mrb[18].mxu1  ;;  %3948 = vrcp.f32 %v1998_v41  ;;  %v3943_v26 = vpop.eup %3942  ;;  %v3823_v4 = vld [vmem:[%s5309_s15 + $0x8] ss:$16 sps:$4 sm:$0xff]  }
 0x80a   : > { %v1679_v9 = vadd.f32 %v1678_v6, %v1635_v47  ;;  %v3592_v10 = vpop.f32.mrb[19].mxu1  ;;  %v1682_v13 = vmul.f32 %v3941_v11, %v1676_v24  ;;  %v3945_v30 = vpop.eup %3944  ;;  %v3822_v24 = vld [vmem:[%s5309_s15 + $0x4] ss:$16 sps:$4 sm:$0xff]   ;;  %v3825_v6 = vld [vmem:[%s5309_s15 + $0xc] ss:$16 sps:$4 sm:$0xff]  }
 0x80b   : > { %v3947_v29 = vpop.eup %3946  ;;  %2445 = vmatprep.subr.bf16.mxu1 %v3822_v24  ;;  %2488 = vmatprep.subr.bf16.mxu0 %v3825_v6  ;;  %v3826_v10 = vld [vmem:[%s5309_s15 + $0x20] ss:$16 sps:$4 sm:$0xff]   ;;  %v3829_v11 = vld [vmem:[%s5309_s15 + $0x28] ss:$16 sps:$4 sm:$0xff]  }
 0x80c   : > { %v1683_v14 = vmul.f32 %v3939_v8, %v1679_v9  ;;  %v3828_v8 = vld [vmem:[%s5309_s15 + $0x24] ss:$16 sps:$4 sm:$0xff]   ;;  %v3831_v9 = vld [vmem:[%s5309_s15 + $0x2c] ss:$16 sps:$4 sm:$0xff]  }
 0x80d   : > { %v3871_v24 = vld [vmem:[%s5319_s17 + $0x80] sm:$0xff]   ;;  %v3872_v6 = vld [vmem:[%s5319_s17 + $0x48] sm:$0xff]  }
 0x80e   : > { %v1684_v16 = vpack.c.bf16 %v1683_v14, %v1682_v13 }
 0x80f   : > { %v1867_v18 = vpop.f32.mrb[20].mxu1 }
 0x810   : > { %v1868_v19 = vadd.f32 %v1867_v18, %v1825_v48  ;;  %1686 = vrot.lane.b32.xlu0 %v1684_v16, %s4572_s10  ;;  %v3603_v20 = vpop.f32.mrb[21].mxu1 }
 0x811   : > { %v1870_v23 = vpop.f32.mrb[22].mxu1  ;;  %v3837_v20 = vld [vmem:[%s5309_s15 + $0x4c] ss:$16 sps:$4 sm:$0xff]  }
 0x812   : > { %v1871_v17 = vadd.f32 %v1870_v23, %v1827_v3  ;;  %v3604_v28 = vpop.f32.mrb[23].mxu1  ;;  %v1874_v34 = vmul.f32 %v3943_v26, %v1868_v19  ;;  %v3834_v19 = vld [vmem:[%s5309_s15 + $0x44] ss:$16 sps:$4 sm:$0xff]   ;;  %v3832_v23 = vld [vmem:[%s5309_s15 + $0x40] ss:$16 sps:$4 sm:$0xff]  }
 0x813   : > { %v3949_v44 = vpop.eup %3948  ;;  %v3835_v26 = vld [vmem:[%s5309_s15 + $0x48] ss:$16 sps:$4 sm:$0xff]   ;;  %v3843_v28 = vld [vmem:[%s5309_s15 + $0x6c] ss:$16 sps:$4 sm:$0xff]  }
 0x814   : > { %v1875_v37 = vmul.f32 %v3945_v30, %v1871_v17  ;;  %v3840_v17 = vld [vmem:[%s5309_s15 + $0x64] ss:$16 sps:$4 sm:$0xff]   ;;  %v3838_v30 = vld [vmem:[%s5309_s15 + $0x60] ss:$16 sps:$4 sm:$0xff]  }
 0x816   : > { %v1876_v39 = vpack.c.bf16 %v1875_v37, %v1874_v34  ;;  %v3846_v34 = vld [vmem:[%s5309_s15 + $0x84] ss:$16 sps:$4 sm:$0xff]   ;;  %v3849_v37 = vld [vmem:[%s5309_s15 + $0x8c] ss:$16 sps:$4 sm:$0xff]  }
 0x817   : > { %v2059_v43 = vpop.f32.mrb[24].mxu1 }
 0x818   : > { %v2060_v36 = vadd.f32 %v2059_v43, %v2017_v42  ;;  %1878 = vrot.lane.b32.xlu1 %v1876_v39, %s4571_s1  ;;  %v3615_v40 = vpop.f32.mrb[25].mxu1  ;;  %v3847_v39 = vld [vmem:[%s5309_s15 + $0x88] ss:$16 sps:$4 sm:$0xff]   ;;  %v3852_v42 = vld [vmem:[%s5309_s15 + $0xa4] ss:$16 sps:$4 sm:$0xff]  }
 0x819   : > { %v2062_v25 = vpop.f32.mrb[26].mxu1  ;;  %v3855_v43 = vld [vmem:[%s5309_s15 + $0xac] ss:$16 sps:$4 sm:$0xff]   ;;  %v3853_v40 = vld [vmem:[%s5309_s15 + $0xa8] ss:$16 sps:$4 sm:$0xff]  }
 0x81a   : > { %v2063_v32 = vadd.f32 %v2062_v25, %v5566_v49  ;;  %v3616_v5 = vpop.f32.mrb[27].mxu1  ;;  %v2066_v45 = vmul.f32 %v3947_v29, %v2060_v36  ;;  %v3850_v36 = vld [vmem:[%s5309_s15 + $0xa0] ss:$16 sps:$4 sm:$0xff]   ;;  %v3858_v29 = vld [vmem:[%s5309_s15 + $0xc4] ss:$16 sps:$4 sm:$0xff]  }
 0x81b   : > { %v3856_v25 = vld [vmem:[%s5309_s15 + $0xc0] ss:$16 sps:$4 sm:$0xff]   ;;  %v3861_v5 = vld [vmem:[%s5309_s15 + $0xcc] ss:$16 sps:$4 sm:$0xff]  }
 0x81c   : > { %v2067_v46 = vmul.f32 %v3949_v44, %v2063_v32  ;;  %v3859_v32 = vld [vmem:[%s5309_s15 + $0xc8] ss:$16 sps:$4 sm:$0xff]   ;;  %v3864_v44 = vld [vmem:[%s5309_s15 + $0xe4] ss:$16 sps:$4 sm:$0xff]  }
 0x81e   : > { %v2068_v22 = vpack.c.bf16 %v2067_v46, %v2066_v45  ;;  %v3867_v45 = vld [vmem:[%s5309_s15 + $0xec] ss:$16 sps:$4 sm:$0xff]   ;;  %v3862_v46 = vld [vmem:[%s5309_s15 + $0xe0] ss:$16 sps:$4 sm:$0xff]  }
 0x820   : > { %2070 = vrot.lane.b32.xlu1 %v2068_v22, %s4570_s2  ;;  %v3865_v22 = vld [vmem:[%s5309_s15 + $0xe8] ss:$16 sps:$4 sm:$0xff]  }
 0x82a   : > { %v1434_v47 = vpop.xlane.xlu1 %1433 }
 0x82b   : > { %v1438_v7 = vadd.f32 %v5462_v21, %v1434_v47  ;;  %v3382_v21 = vld [vmem:[%s5876_s18] ss:$0 sm:$0xff]  ;;  %v3868_v47 = vld [vmem:[%s5319_s17 + $0x40] sm:$0xff]  }
 0x82d   : > { %3950 = vrcp.f32 %v1438_v7  ;;  %v3869_v7 = vld [vmem:[%s5319_s17 + $0xc0] sm:$0xff]  }
 0x837   : > { %v3951_v48 = vpop.eup %3950 }
 0x838   : > { %v1495_v3 = vmul.f32 %v3951_v48, %v5474_v35 }
 0x83a   : > { %v1497_v50 = vpack.c.bf16 %v5574_v2, %v1495_v3 }
 0x83c   : > { %1498 = vst.msk [vmem:[#allocation4] sm:$0xff] %vm1341_vm1, %v1497_v50 }
 0x882   : > { %v1687_v49 = vpop.permute.xlu0 %1686 }
 0x883   : > { %1690 = vst.msk [vmem:[#allocation4] sm:$0xff] %vm1689_vm4, %v1687_v49 }
 0x88a   : > { %v1879_v51 = vpop.permute.xlu1 %1878 }
 0x88b   : > { %1882 = vst.msk [vmem:[#allocation4] sm:$0xff] %vm1881_vm5, %v1879_v51 }
 0x892   : > { %v2071_v52 = vpop.permute.xlu1 %2070 }
 0x893   : > { %2074 = vst.msk [vmem:[#allocation4] sm:$0xff] %vm2073_vm6, %v2071_v52 }
 0x89a   : > { %v2075_v53 = vld [vmem:[#allocation4] sm:$0xff] }
 0x89b   : > { %3634 = vmatmul.mubr.bf16.vlgmr.msra.gmra.mrb[12].mxu0 %v2075_v53 }
 0x89c   : > { %2520 = vmatprep.mubr.bf16.mxu0 %v4568_v33  ;;  %v3820_v33 = vld [vmem:[%s5309_s15] ss:$16 sps:$4 sm:$0xff]   ;;  %2489 = vmatpush1.bf16.msra.mxu0 %v3823_v4 }
 0x89d   : > { %2446 = vmatpush1.bf16.msra.mxu1 %v3820_v33  ;;  %2490 = vmatprep.subr.bf16.mxu0 %v3831_v9  ;;  %v3870_v33 = vld [vmem:[%s5319_s17] sm:$0xff]   ;;  %v3874_v9 = vld [vmem:[%s5319_s17 + $0x8] sm:$0xff]  }
 0x89e   : > { %2447 = vmatprep.subr.bf16.mxu1 %v3828_v8  ;;  %v3873_v8 = vld [vmem:[%s5319_s17 + $0xc8] sm:$0xff]  }
 0x8a0   : > { %2491 = vmatpush1.bf16.msra.mxu0 %v3829_v11  ;;  %v3876_v11 = vld [vmem:[%s5319_s17 + $0x50] sm:$0xff]  }
 0x8a1   : > { %2448 = vmatpush1.bf16.msra.mxu1 %v3826_v10  ;;  %2492 = vmatprep.subr.bf16.mxu0 %v3837_v20  ;;  %v3875_v10 = vld [vmem:[%s5319_s17 + $0x88] sm:$0xff]   ;;  %v3886_v20 = vld [vmem:[%s5319_s17 + $0x20] sm:$0xff]  }
 0x8a2   : > { %2449 = vmatprep.subr.bf16.mxu1 %v3834_v19  ;;  %v3885_v19 = vld [vmem:[%s5319_s17 + $0xe0] sm:$0xff]  }
 0x8a4   : > { %2493 = vmatpush1.bf16.msra.mxu0 %v3835_v26  ;;  %v3888_v26 = vld [vmem:[%s5319_s17 + $0x68] sm:$0xff]  }
 0x8a5   : > { %2450 = vmatpush1.bf16.msra.mxu1 %v3832_v23  ;;  %2494 = vmatprep.subr.bf16.mxu0 %v3843_v28  ;;  %v3887_v23 = vld [vmem:[%s5319_s17 + $0xa0] sm:$0xff]   ;;  %v3890_v28 = vld [vmem:[%s5319_s17 + $0x28] sm:$0xff]  }
 0x8a6   : > { %2451 = vmatprep.subr.bf16.mxu1 %v3840_v17  ;;  %v3889_v17 = vld [vmem:[%s5319_s17 + $0xe8] sm:$0xff]  }
 0x8a8   : > { %2495 = vmatpush1.bf16.msra.mxu0 %v3841_v31  ;;  %v3892_v31 = vld [vmem:[%s5319_s17 + $0x70] sm:$0xff]  }
 0x8a9   : > { %2452 = vmatpush1.bf16.msra.mxu1 %v3838_v30  ;;  %2496 = vmatprep.subr.bf16.mxu0 %v3849_v37  ;;  %v3891_v30 = vld [vmem:[%s5319_s17 + $0xa8] sm:$0xff]   ;;  %v3894_v37 = vld [vmem:[%s5319_s17 + $0x30] sm:$0xff]  }
 0x8aa   : > { %2453 = vmatprep.subr.bf16.mxu1 %v3846_v34  ;;  %v3893_v34 = vld [vmem:[%s5319_s17 + $0xf0] sm:$0xff]  }
 0x8ac   : > { %2497 = vmatpush1.bf16.msra.mxu0 %v3847_v39  ;;  %v3896_v39 = vld [vmem:[%s5319_s17 + $0x78] sm:$0xff]  }
 0x8ad   : > { %2454 = vmatpush1.bf16.msra.mxu1 %v3844_v38  ;;  %2498 = vmatprep.subr.bf16.mxu0 %v3855_v43  ;;  %v3895_v38 = vld [vmem:[%s5319_s17 + $0xb0] sm:$0xff]   ;;  %v3898_v43 = vld [vmem:[%s5319_s17 + $0x38] sm:$0xff]  }
 0x8ae   : > { %2455 = vmatprep.subr.bf16.mxu1 %v3852_v42  ;;  %v3897_v42 = vld [vmem:[%s5319_s17 + $0xf8] sm:$0xff]  }
 0x8b0   : > { %2499 = vmatpush1.bf16.msra.mxu0 %v3853_v40  ;;  %v2263_v40 = vld [vmem:[%s5316_s20] sm:$0xf] }
 0x8b1   : > { %2456 = vmatpush1.bf16.msra.mxu1 %v3850_v36  ;;  %2500 = vmatprep.subr.bf16.mxu0 %v3861_v5  ;;  %v3899_v36 = vld [vmem:[%s5319_s17 + $0xb8] sm:$0xff]   ;;  %v2272_v5 = vrot.slane %v2263_v40, %v1106_v61 }
 0x8b2   : > { %2457 = vmatprep.subr.bf16.mxu1 %v3858_v29  ;;  %v2268_v29 = vrot.slane %v2263_v40, %v1102_v58 }
 0x8b4   : > { %2501 = vmatpush1.bf16.msra.mxu0 %v3859_v32  ;;  %v2276_v32 = vrot.slane %v2263_v40, %v1110_v59 }
 0x8b5   : > { %2458 = vmatpush1.bf16.msra.mxu1 %v3856_v25  ;;  %2502 = vmatprep.subr.bf16.mxu0 %v3867_v45  ;;  %v2279_v25 = vsub.s32 3, %v5386_v57 }
 0x8b6   : > { %2459 = vmatprep.subr.bf16.mxu1 %v3864_v44 }
 0x8b7   : > { %v2280_v44 = vrot.slane %v2263_v40, %v2279_v25 }
 0x8b8   : > { %2503 = vmatpush1.bf16.msra.mxu0 %v3865_v22 }
 0x8b9   : > { %2460 = vmatpush1.bf16.msra.mxu1 %v3862_v46  ;;  %3527 = vmatprep.subr.bf16.mxu0 %v3869_v7 }
 0x8ba   : > { %3505 = vmatprep.subr.bf16.mxu1 %v3868_v47 }
 0x96e   : > { %v2181_v35 = vpop.f32.mrb[12].mxu0 }
 0x96f   : > { %v2182_v54 = vadd.f32 %v3382_v21, %v2181_v35  ;;  %v3635_v55 = vpop.f32.mrb[13].mxu0  ;;  %v3391_v35 = vld [vmem:[%s5877_s3] ss:$0 sm:$0xff] }
 0x970   : > { %v2184_v56 = vpop.f32.mrb[14].mxu0 }
 0x971   : > { %v5596_v62 = vadd.f32 %v3972_v60, %v2182_v54  ;;  %v2185_v63 = vadd.f32 %v3382_v21, %v2184_v56  ;;  %v3636_v0 = vpop.f32.mrb[15].mxu0  ;;  %v3392_v60 = vld [vmem:[%s5878_s5] ss:$0 sm:$0xff] }
 0x973   : > { %v5598_v2 = vadd.f32 %v3973_v1, %v2185_v63  ;;  %2192 = vadd.xlane.f32.xlu0 %v5596_v62 }
 0x975   : > { %2194 = vadd.xlane.f32.xlu1 %v5598_v2 }
 0xa00   : > { %v2193_v12 = vpop.xlane.xlu0 %2192 }
 0xa01   : > { %v2196_v27 = vmul.f32 0.0078125, %v2193_v12  ;;  %v3877_v12 = vld [vmem:[%s5319_s17 + $0xd0] sm:$0xff]  }
 0xa02   : > { %v2195_v13 = vpop.xlane.xlu1 %2194 }
 0xa03   : > { %v5611_v14 = vsub.f32 %v5596_v62, %v2196_v27  ;;  %v2197_v41 = vmul.f32 0.0078125, %v2195_v13  ;;  %v3878_v27 = vld [vmem:[%s5319_s17 + $0x10] sm:$0xff]  }
 0xa04   : > { %v3879_v13 = vld [vmem:[%s5319_s17 + $0x90] sm:$0xff]  }
 0xa05   : > { %v5614_v15 = vsub.f32 %v5598_v2, %v2197_v41  ;;  %v2200_v16 = vmul.f32 %v5611_v14, %v5611_v14  ;;  %v3881_v41 = vld [vmem:[%s5319_s17 + $0xd8] sm:$0xff]  }
 0xa07   : > { %2202 = vadd.xlane.f32.xlu0 %v2200_v16  ;;  %v2201_v18 = vmul.f32 %v5614_v15, %v5614_v15  ;;  %v3883_v16 = vld [vmem:[%s5319_s17 + $0x98] sm:$0xff]  }
 0xa0b   : > { %2204 = vadd.xlane.f32.xlu0 %v2201_v18  ;;  %v3884_v18 = vld [vmem:[%s5319_s17 + $0x60] sm:$0xff]  }
 0xa94   : > { %v2203_v48 = vpop.xlane.xlu0 %2202 }
 0xa95   : > { %v2206_v3 = vmul.f32 0.0078125, %v2203_v48 }
 0xa97   : > { %v2208_v50 = vadd.f32 1e-06, %v2206_v3 }
 0xa98   : > { %v2205_v49 = vpop.xlane.xlu0 %2204 }
 0xa99   : > { %3952 = vrsqrt.f32 %v2208_v50  ;;  %v2207_v51 = vmul.f32 0.0078125, %v2205_v49 }
 0xa9b   : > { %v2209_v52 = vadd.f32 1e-06, %v2207_v51 }
 0xa9d   : > { %3954 = vrsqrt.f32 %v2209_v52 }
 0xaa3   : > { %v3953_v53 = vpop.eup %3952 }
 0xaa4   : > { %v2212_v21 = vmul.f32 %v3953_v53, %v5611_v14  ;;  %v3880_v14 = vld [vmem:[%s5319_s17 + $0x58] sm:$0xff]  }
 0xaa6   : > { %v2220_v56 = vmul.f32 %v3391_v35, %v2212_v21 }
 0xaa7   : > { %v3955_v54 = vpop.eup %3954 }
 0xaa8   : > { %v2213_v55 = vmul.f32 %v3955_v54, %v5614_v15  ;;  %v2228_v0 = vadd.f32 %v3392_v60, %v2220_v56  ;;  %v3882_v15 = vld [vmem:[%s5319_s17 + $0x18] sm:$0xff]   ;;  %s5879_s17 = sld [smem:[#allocation42_spill]] }
 0xaaa   : > { %v2221_v63 = vmul.f32 %v3391_v35, %v2213_v55 }
 0xaac   : > { %v2229_v1 = vadd.f32 %v3392_v60, %v2221_v63 }
 0xaae   : > { %v2230_v4 = vpack.c.bf16 %v2229_v1, %v2228_v0  ;;  %p3458_p2 = scmp.ne.s32.totalorder %s5879_s17, 1 }
 0xaaf   : > { %vm2931_vm7 = vcmask (!%p3458_p2), 1040384   ;;  %vm2932_vm8 = vsmask.f32 (!%p3458_p2), 256 }
 0xab0   : > { %2478 = vmatmul.mubr.bf16.vlgmr.msra.gmra.mrb[28].mxu1 %v2230_v4  ;;  %2521 = vmatmul.mubr.bf16.vlgmr.msra.gmra.mrb[16].mxu0 %v2230_v4  ;;  %vm2933_vm9 = vmand (!%p3458_p2), %vm2931_vm7, %vm2932_vm8 }
 0xab1   : > { %3506 = vmatpush3.bf16.msra.mxu1 %v3870_v33  ;;  %3528 = vmatpush3.bf16.msra.mxu0 %v3871_v24 }
 0xab2   : > { %3507 = vmatprep.subr.bf16.mxu1 %v3872_v6  ;;  %3529 = vmatprep.subr.bf16.mxu0 %v3873_v8 }
 0xab5   : > { %3508 = vmatpush3.bf16.msra.mxu1 %v3874_v9  ;;  %3530 = vmatpush3.bf16.msra.mxu0 %v3875_v10 }
 0xab6   : > { %3509 = vmatprep.subr.bf16.mxu1 %v3876_v11  ;;  %3531 = vmatprep.subr.bf16.mxu0 %v3877_v12 }
 0xab9   : > { %3510 = vmatpush3.bf16.msra.mxu1 %v3878_v27  ;;  %3532 = vmatpush3.bf16.msra.mxu0 %v3879_v13 }
 0xaba   : > { %3511 = vmatprep.subr.bf16.mxu1 %v3880_v14  ;;  %3533 = vmatprep.subr.bf16.mxu0 %v3881_v41 }
 0xabd   : > { %3512 = vmatpush3.bf16.msra.mxu1 %v3882_v15  ;;  %3534 = vmatpush3.bf16.msra.mxu0 %v3883_v16 }
 0xabe   : > { %3513 = vmatprep.subr.bf16.mxu1 %v3884_v18  ;;  %3535 = vmatprep.subr.bf16.mxu0 %v3885_v19 }
 0xac1   : > { %3514 = vmatpush3.bf16.msra.mxu1 %v3886_v20  ;;  %3536 = vmatpush3.bf16.msra.mxu0 %v3887_v23 }
 0xac2   : > { %3515 = vmatprep.subr.bf16.mxu1 %v3888_v26  ;;  %3537 = vmatprep.subr.bf16.mxu0 %v3889_v17 }
 0xac5   : > { %3516 = vmatpush3.bf16.msra.mxu1 %v3890_v28  ;;  %3538 = vmatpush3.bf16.msra.mxu0 %v3891_v30 }
 0xac6   : > { %3517 = vmatprep.subr.bf16.mxu1 %v3892_v31  ;;  %3539 = vmatprep.subr.bf16.mxu0 %v3893_v34 }
 0xac9   : > { %3518 = vmatpush3.bf16.msra.mxu1 %v3894_v37  ;;  %3540 = vmatpush3.bf16.msra.mxu0 %v3895_v38 }
 0xaca   : > { %3519 = vmatprep.subr.bf16.mxu1 %v3896_v39  ;;  %3541 = vmatprep.subr.bf16.mxu0 %v3897_v42 }
 0xacd   : > { %3520 = vmatpush3.bf16.msra.mxu1 %v3898_v43  ;;  %3542 = vmatpush3.bf16.msra.mxu0 %v3899_v36 }
 0xb83   : > { %v2479_v45 = vpop.f32.mrb[28].mxu1  ;;  %v2522_v46 = vpop.f32.mrb[16].mxu0 }
 0xb84   : > { %v2480_v22 = vadd.f32 %v2479_v45, %v2268_v29  ;;  %v2523_v47 = vadd.f32 %v2522_v46, %v2276_v32  ;;  %v2481_v7 = vpop.f32.mrb[29].mxu1  ;;  %v2524_v48 = vpop.f32.mrb[17].mxu0 }
 0xb85   : > { %v2482_v3 = vadd.f32 %v2481_v7, %v2272_v5  ;;  %v2525_v50 = vadd.f32 %v2524_v48, %v2280_v44  ;;  %v2483_v49 = vpop.f32.mrb[30].mxu1  ;;  %v2526_v51 = vpop.f32.mrb[18].mxu0 }
 0xb86   : > { %v2539_v52 = vmul.f32 0.70710677, %v2480_v22  ;;  %v2541_v53 = vmul.f32 0.70710677, %v2523_v47  ;;  %v2484_v59 = vadd.f32 %v2483_v49, %v2268_v29  ;;  %v2527_v35 = vadd.f32 %v2526_v51, %v2276_v32  ;;  %v2485_v57 = vpop.f32.mrb[31].mxu1  ;;  %v2528_v61 = vpop.f32.mrb[19].mxu0 }
 0xb87   : > { %v2540_v58 = vmul.f32 0.70710677, %v2482_v3  ;;  %v2542_v21 = vmul.f32 0.70710677, %v2525_v50  ;;  %v2486_v54 = vadd.f32 %v2485_v57, %v2272_v5  ;;  %v2529_v55 = vadd.f32 %v2528_v61, %v2280_v44 }
 0xb88   : > { %3956 = verf.f32 %v2539_v52  ;;  %v2543_v56 = vmul.f32 0.70710677, %v2484_v59  ;;  %v2545_v60 = vmul.f32 0.70710677, %v2527_v35  ;;  %v2531_v9 = vmul.f32 0.5, %v2480_v22 }
 0xb89   : > { %3958 = verf.f32 %v2541_v53  ;;  %v2544_v63 = vmul.f32 0.70710677, %v2486_v54  ;;  %v2546_v0 = vmul.f32 0.70710677, %v2529_v55  ;;  %v2533_v10 = vmul.f32 0.5, %v2523_v47 }
 0xb8a   : > { %3960 = verf.f32 %v2540_v58  ;;  %v2532_v27 = vmul.f32 0.5, %v2482_v3  ;;  %v2535_v14 = vmul.f32 0.5, %v2484_v59  ;;  %v2534_v16 = vmul.f32 0.5, %v2525_v50  ;;  %v3457_v53 = vld [vmem:[%s903_s25] ss:$0 sm:$0xff] }
 0xb8b   : > { %3962 = verf.f32 %v2542_v21  ;;  %v2537_v19 = vmul.f32 0.5, %v2527_v35  ;;  %v2536_v28 = vmul.f32 0.5, %v2486_v54  ;;  %v2538_v37 = vmul.f32 0.5, %v2529_v55  ;;  %v2934_v54 = vld [vmem:[%s5327_s8] sm:$0x1] (!%p3458_p2) }
 0xb8c   : > { %3964 = verf.f32 %v2543_v56 }
 0xb8d   : > { %3966 = verf.f32 %v2545_v60 }
 0xb8e   : > { %3968 = verf.f32 %v2544_v63 }
 0xb8f   : > { %3970 = verf.f32 %v2546_v0 }
 0xb92   : > { %v3957_v1 = vpop.eup %3956 }
 0xb93   : > { %v3959_v33 = vpop.eup %3958  ;;  %v2555_v6 = vadd.f32 1.0, %v3957_v1 }
 0xb94   : > { %v3961_v24 = vpop.eup %3960  ;;  %v2557_v11 = vadd.f32 1.0, %v3959_v33 }
 0xb95   : > { %v3963_v4 = vpop.eup %3962  ;;  %v2556_v13 = vadd.f32 1.0, %v3961_v24  ;;  %v2563_v26 = vmul.f32 %v2555_v6, %v2531_v9 }
 0xb96   : > { %v3965_v8 = vpop.eup %3964  ;;  %v2558_v18 = vadd.f32 1.0, %v3963_v4  ;;  %v2565_v31 = vmul.f32 %v2557_v11, %v2533_v10 }
 0xb97   : > { %v3967_v12 = vpop.eup %3966  ;;  %v2559_v41 = vadd.f32 1.0, %v3965_v8  ;;  %v2564_v39 = vmul.f32 %v2556_v13, %v2532_v27 }
 0xb98   : > { %v3969_v15 = vpop.eup %3968  ;;  %v2561_v20 = vadd.f32 1.0, %v3967_v12  ;;  %v2566_v36 = vmul.f32 %v2558_v18, %v2534_v16 }
 0xb99   : > { %v3971_v23 = vpop.eup %3970  ;;  %v2567_v17 = vmul.f32 %v2559_v41, %v2535_v14  ;;  %v2560_v30 = vadd.f32 1.0, %v3969_v15 }
 0xb9a   : > { %v2569_v34 = vmul.f32 %v2561_v20, %v2537_v19  ;;  %v2562_v38 = vadd.f32 1.0, %v3971_v23 }
 0xb9b   : > { %v2571_v42 = vpack.c.bf16 %v2567_v17, %v2563_v26  ;;  %v2568_v43 = vmul.f32 %v2560_v30, %v2536_v28 }
 0xb9c   : > { %v2573_v40 = vpack.c.bf16 %v2569_v34, %v2565_v31  ;;  %v2570_v25 = vmul.f32 %v2562_v38, %v2538_v37 }
 0xb9d   : > { %v2572_v29 = vpack.c.bf16 %v2568_v43, %v2564_v39 }
 0xb9e   : > { %v2574_v32 = vpack.c.bf16 %v2570_v25, %v2566_v36 }
 0xb9f   : > { %2863 = vmatprep.mubr.bf16.mxu1 %v2572_v29 }
 0xba0   : > { %2904 = vmatprep.mubr.bf16.mxu0 %v2574_v32  ;;  %2864 = vmatmul.mubr.bf16.vlgmr.msra.gmra.mrb[32].mxu1 %v2571_v42 }
 0xba1   : > { %2905 = vmatmul.mubr.bf16.vlgmr.msra.gmra.mrb[20].mxu0 %v2573_v40 }
 0xc73   : > { %v3521_v5 = vpop.f32.mrb[32].mxu1 }
 0xc74   : > { %v3543_v44 = vpop.f32.mrb[20].mxu0  ;;  %v3522_v45 = vpop.f32.mrb[33].mxu1 }
 0xc75   : > { %v3523_v46 = vadd.f32 %v3522_v45, %v3521_v5  ;;  %v3544_v22 = vpop.f32.mrb[21].mxu0  ;;  %v3524_v47 = vpop.f32.mrb[34].mxu1 }
 0xc76   : > { %v3545_v7 = vadd.f32 %v3544_v22, %v3543_v44  ;;  %v3546_v48 = vpop.f32.mrb[22].mxu0  ;;  %v3525_v3 = vpop.f32.mrb[35].mxu1 }
 0xc77   : > { %v3526_v50 = vadd.f32 %v3525_v3, %v3524_v47  ;;  %v3547_v49 = vpop.f32.mrb[23].mxu0 }
 0xc78   : > { %v2907_v51 = vadd.f32 %v3545_v7, %v3523_v46  ;;  %v3548_v52 = vadd.f32 %v3547_v49, %v3546_v48 }
 0xc7a   : > { %v2913_v58 = vadd.f32 %v2907_v51, %v5596_v62  ;;  %v2910_v21 = vadd.f32 %v3548_v52, %v3526_v50  ;;  %2929 = sbr.rel (%p3458_p2) target bundleno = 3202 (0xc82), region = 148 }
 0xc7c   : > { %v2922_v59 = vadd.f32 %v3457_v53, %v2913_v58  ;;  %v2914_v35 = vadd.f32 %v2910_v21, %v5598_v2 }
 0xc7e   : > { %2924 = vst [vmem:[#allocation2] sm:$0xff] %v2922_v59  ;;  %v2923_v57 = vadd.f32 %v3457_v53, %v2914_v35  ;;  %v2930_v61 = vpack.c.bf16 (!%p3458_p2), %v2922_v59, %v2922_v59 }
 0xc80   : > { %2925 = vst [vmem:[#allocation2 + $0x8] sm:$0xff] %v2923_v57  ;;  %v2935_v55 = vsel (!%p3458_p2), %vm2933_vm9, %v2930_v61, %v2934_v54 }
 0xc81   : > { %2936 = vst [vmem:[%s5327_s8] sm:$0x1] %v2935_v55 }
 0xc82 PF: > { %s5880_s21 = sld [smem:[#allocation43_spill]]  ;;  %s5881_s20 = sld [smem:[#allocation50_spill]] }
 0xc83   : > { %s5882_s15 = sld [smem:[#allocation64_spill]]  ;;  %s2950_s0 = sshll.u32 %s5327_s8, 4  ;;  %s2951_s0 = int_to_ptr.vmem [resolvable:$true] %s2950_s0 }
 0xc84   : > { %s2938_s6 = scalar_lea.sflag [#allocation7], %s5250_s16  ;;  %s4394_s2 = scalar_lea.vmem %s2951_s0, 16 }
 0xc85   : > { %p4395_p3 = scmp.ne.s32.totalorder %s2951_s0, %s4394_s2  ;;  %s4573_s1 = smov [#allocation29]  }
 0xc86   : > { %s4398_s10 = sshll.u32 %s4573_s1, 4  ;;  %s4399_s10 = int_to_ptr.vmem [resolvable:$false] %s4398_s10 }
 0xc87   : > { %s4400_s19 = scalar_lea.vmem %s4399_s10, 32  ;;  %p4401_p13 = scmp.lt.s32.totalorder %s2951_s0, %s4399_s10 }
 0xc88   : > { %s3459_s4 = sshll.u32 %s5880_s21, 4  ;;  %p5883_p0 = scmp.ne.s32.totalorder %s5881_s20, 0 }
 0xc89   : > { %s5701_s12 = scalar_lea.hbm %s5882_s15, %s3459_s4  ;;  %p4402_p9 = scmp.lt.s32.totalorder %s4400_s19, %s4394_s2 }
 0xc8a   : > { %p4396_p6 = pnand %p4395_p3, %p5883_p0 }
 0xc8b   : > { %p4403_p5 = por %p4402_p9, %p4401_p13 }
 0xc8c   : > { %p4397_p4 = pneg %p4396_p6 }
 0xc8e   : > { %p4404_p7 = pnand %p4403_p5, %p4397_p4 }
 0xc90   : > { %4407 = shalt.err (!%p4404_p7)
}
 0xc91   : > { %s4408_s16 = scalar_lea.hbm %s5701_s12, 16  ;;  %s4412_s3 = scalar_lea.hbm %s5882_s15, 32 }
 0xc92   : > { %p4409_p10 = scmp.ne.s32.totalorder %s5701_s12, %s4408_s16  ;;  %p4413_p12 = scmp.lt.u32.totalorder %s5701_s12, %s5882_s15 }
 0xc93   : > { %p4414_p8 = scmp.lt.u32.totalorder %s4412_s3, %s4408_s16  ;;  %p4416_p3 = scmp.lt.u32.totalorder %s4408_s16, %s5701_s12 }
 0xc94   : > { %p4410_p11 = pnand %p4409_p10, %p5883_p0 }
 0xc95   : > { %p4415_p2 = por %p4414_p8, %p4413_p12 }
 0xc96   : > { %p4411_p1 = pneg %p4410_p11 }
 0xc97   : > { %p4417_p6 = por %p4416_p3, %p4415_p2 }
 0xc99   : > { %p4418_p4 = pnand %p4417_p6, %p4411_p1 }
 0xc9b   : > { %4421 = shalt.err (!%p4418_p4)
}
 0xc9c   : > { %3673 = dma.vmem_to_hbm [thread:$0]  (%p5883_p0), %s2951_s0, 16, %s5701_s12, %s2938_s6  }
 0xc9d PF: > { %s5884_s21 = sld [smem:[#allocation41_spill]]  ;;  %s5885_s4 = sld [smem:[#allocation51_spill]] }
 0xc9e   : > { %p3679_p13 = scmp.ge.s32.totalorder %s4544_s28, 2 }
 0xca3   : > { %s2962_s24 = sand.u32 1, %s5884_s21   ;;  %p5886_p9 = scmp.ne.s32.totalorder %s5885_s4, 0 }
 0xca4   : > { %s2963_s25 = scalar_lea.sflag [#allocation7], %s2962_s24 }
 0xca5   : > { %p3676_p5 = pnand %p3679_p13, %p5886_p9 }
 0xca7   : > { %4499 = dma.done.wait (!%p3676_p5), %s2963_s25, 16  }
 0xca8   : > { %4501 = vsyncadd (!%p3676_p5), %s2963_s25, 4294967280  ;;  %s52_s28 = sadd.s32 1, %s4544_s28   ;;  %s5887_s18 = sld [smem:[#allocation39_spill]] }
 0xca9   : > { %p49_p7 = scmp.ge.s32.totalorder %s52_s28, 6   ;;  %s5888_s19 = sld [smem:[#allocation40_spill]] }
 0xcaa   : > { %s5889_s20 = sld [smem:[#allocation47_spill]]  ;;  %s5890_s12 = sld [smem:[#allocation48_spill]] }
 0xcab   : > { %s5891_s0 = sld [smem:[#allocation45_spill]]  ;;  %s5892_s6 = sld [smem:[#allocation46_spill]] }
 0xcac   : > { %s5893_s21 = smov %s4520_s22  ;;  %s5894_s22 = smov %s4524_s23 }
 0xcad   : > { %s5896_s24 = smov %s4536_s26  ;;  %s5897_s25 = smov %s4540_s27 }
 0xcae   :  { %51 = sbr.rel (!%p49_p7) target bundleno = 37 (0x25), region = 301 }
 0xcb0   : > { %s5895_s23 = smov %s5890_s12 }
 0xcb1   : > { %s5898_s26 = smov %s5891_s0  ;;  %s5899_s27 = smov %s5892_s6 }
 0xcb5   :  { %2967 = vsyncpa [#allocation6], 1 }
 0xcb6   :  { %2969 = vsyncpa [#allocation6 + $0x1], 1 }
 0xcb7   :  { %2970 = vsyncpa [#allocation9], 1 }
 0xcb8   :  { %2972 = vsyncpa [#allocation9 + $0x1], 1 }
 0xcb9   :  { %2973 = vsyncpa [#allocation12], 1 }
 0xcba   :  { %2975 = vsyncpa [#allocation12 + $0x1], 1 }
 0xcbb   :  { %2976 = vsyncpa [#allocation15], 1 }
 0xcbc   :  { %2978 = vsyncpa [#allocation15 + $0x1], 1 }
 0xcbd   :  { %2979 = vsyncpa [#allocation18], 1 }
 0xcbe   :  { %2981 = vsyncpa [#allocation18 + $0x1], 1 }
 0xcbf   :  { %2982 = vsyncpa [#allocation21], 1 }
 0xcc0   :  { %2984 = vsyncpa [#allocation21 + $0x1], 1 }
 0xcc1   :  { %2985 = vsyncpa [#allocation24], 1 }
 0xcc2   :  { %2987 = vsyncpa [#allocation24 + $0x1], 1 }
 0xcc3   :  { %2988 = vsyncpa [#allocation27], 1 }
 0xcc4   :  { %2990 = vsyncpa [#allocation27 + $0x1], 1 }
 0xcc5   :  { %2991 = vsyncpa [#allocation7], 1 }
 0xcc6   :  { %2993 = vsyncpa [#allocation7 + $0x1], 1 }

</bundles_post_ra>
